<compile_context>
chip_gen: v7x
topology: tpu7x:2x2x1
jax: 0.10.0
libtpu: 0.0.40
codegen_flags: <defaults>
</compile_context>

<pallas_src>
import jax
import jax.numpy as jnp
from jax.experimental import pallas as pl
from jax.experimental.pallas import tpu as pltpu

# ---------------------------------------------------------------------------
# Config (small shapes consistent with the module: hidden=32, out=16, heads=4)
# ---------------------------------------------------------------------------
HIDDEN_DIM = 32
OUT_DIM = 16
NUM_HEADS = 4
NEG_SLOPE = 0.2   # GATConv default negative_slope
IN_DIM = 4        # input_dims in the module are all 4
PACK_LANES = 128  # lane-dense packed output width
MAXN = 16         # max node count -> padded mask tile

NODE_ORDER = ("user", "product", "category", "style")
NODE_COUNTS = {"user": 8, "product": 16, "category": 8, "style": 8}
EDGE_TYPES = (
    ("product", "similar_to", "product"),
    ("product", "belongs_to", "category"),
    ("product", "has_style", "style"),
    ("user", "prefers", "product"),
    ("user", "viewed", "product"),
)

ROW_OFFSETS = {}
_off = 0
for _nt in NODE_ORDER:
    ROW_OFFSETS[_nt] = _off
    _off += NODE_COUNTS[_nt]
TOTAL_ROWS = _off  # 40

# --- static lane offsets inside wslab (32, 864) ----------------------------
# conv1 product-source group occupies lanes [0:384], user group [384:640]
# conv2 product-source group lanes [640:688], user group [768:800] (128-aligned starts)
# dim_proj weights lanes [800:864]
C1_GROUP_SLICE = {"product": (0, 384), "user": (384, 256)}
C1_LOCAL = {0: ("product", 0), 1: ("product", 128), 2: ("product", 256),
            3: ("user", 0), 4: ("user", 128)}
C2_GROUP_SLICE = {"product": (640, 48), "user": (768, 32)}
C2_LOCAL = {0: ("product", 0), 1: ("product", 16), 2: ("product", 32),
            3: ("user", 0), 4: ("user", 16)}
DIMPROJ_OFF = 800
WSLAB_LANES = 864

# --- static row offsets inside smallw (136, 32) -----------------------------
SW_S1W = 0      # rows [0:16]   : node_proj weights stacked along K
SW_S1B = 16     # rows [16:56]  : stage-1 bias rows (one row per node)
SW_C1ATT = 56   # rows [56:96]  : conv1 vs/vd per edge (8 rows each: 4 vs + 4 vd)
SW_C1B = 96     # rows [96:104] : conv1 bias per edge
SW_C2ATT = 104  # rows [104:120]: conv2 vs/vd per edge (2 rows each)
SW_C2B = 120    # rows [120:128]: conv2 bias per edge (lanes [:16])
SW_DPB = 128    # rows [128:136]: dim_proj bias per node type (lanes [:16])
SW_ROWS = 136

_VMEM = pl.BlockSpec(memory_space=pltpu.MemorySpace.VMEM)


# ---------------------------------------------------------------------------
# Fused Pallas kernel (single invocation, no grid, everything in VMEM)
# ---------------------------------------------------------------------------
def _fused_hetero_gnn_kernel(x_ref, edge_ref, sw_ref, w_ref, nout_ref, o_ref):
    f32 = jnp.float32

    def mm(a, b):
        return jnp.dot(a, b, preferred_element_type=f32)

    def dot_nt(a, b):
        # (M, K) x (N, K) -> (M, N): contract last dims of both, no explicit .T
        return jax.lax.dot_general(a, b, (((1,), (1,)), ((), ())),
                                   preferred_element_type=f32)

    # ---- Stage 1: one packed matmul for every node_proj + ReLU -------------
    # x_ref is block-structured: type t's 4 features at cols [4t:4t+4].
    h0_all = jnp.maximum(mm(x_ref[...], sw_ref[SW_S1W:SW_S1W + 16, :])
                         + sw_ref[SW_S1B:SW_S1B + TOTAL_ROWS, :], 0.0)       # (40,32)
    h0 = {}
    for nt in NODE_ORDER:
        off, n = ROW_OFFSETS[nt], NODE_COUNTS[nt]
        h0[nt] = h0_all[off:off + n, :]

    # ---- conv1: message projections batched per SOURCE node type -----------
    xs1 = {}
    for grp, (base, width) in C1_GROUP_SLICE.items():
        xs1[grp] = mm(h0[grp], w_ref[:, base:base + width])   # (Ns, 128*n_edges_in_grp)

    def softmax_rows(lg, keep):
        m = jnp.max(lg, axis=-1, keepdims=True)
        p = keep * jnp.exp(lg - m)
        denom = jnp.sum(p, axis=-1, keepdims=True)
        return p * (1.0 / jnp.where(denom > 0.0, denom, 1.0))

    def gat1(e, h_src, h_dst):
        s, _, t = EDGE_TYPES[e]
        ns, nd = NODE_COUNTS[s], NODE_COUNTS[t]
        keep = edge_ref[32 * e:32 * e + nd, 0:ns]                 # float 0/1
        nbias = edge_ref[32 * e + 16:32 * e + 16 + nd, 0:ns]      # 0 / -1e30
        vs = sw_ref[SW_C1ATT + 8 * e:SW_C1ATT + 8 * e + 4, :]     # (4,32)
        vd = sw_ref[SW_C1ATT + 8 * e + 4:SW_C1ATT + 8 * e + 8, :] # (4,32)
        a_src = dot_nt(vs, h_src)                                 # (4, ns)
        a_dst = dot_nt(h_dst, vd)                                 # (nd, 4)
        grp, base = C1_LOCAL[e]
        xs = xs1[grp]
        acc = jnp.zeros((nd, HIDDEN_DIM), f32)
        for h in range(NUM_HEADS):                                # static unroll (4)
            lg = a_dst[:, h:h + 1] + a_src[h:h + 1, :]            # (nd, ns)
            lg = jnp.where(lg >= 0.0, lg, NEG_SLOPE * lg) + nbias
            p = softmax_rows(lg, keep)
            acc = acc + mm(p, xs[:, base + 32 * h:base + 32 * h + 32])
        return acc * (1.0 / NUM_HEADS) + sw_ref[SW_C1B + e:SW_C1B + e + 1, :]

    grouped1 = {}
    for e, (s, _, t) in enumerate(EDGE_TYPES):
        grouped1.setdefault(t, []).append(gat1(e, h0[s], h0[t]))
    h1 = dict(h0)
    for t, outs in grouped1.items():
        agg = outs[0]
        for extra in outs[1:]:
            agg = agg + extra
        h1[t] = jnp.maximum(agg * (1.0 / len(outs)), 0.0)

    # ---- conv2: heads=1, hidden->out; messages batched per source type -----
    xs2 = {}
    for grp, (base, width) in C2_GROUP_SLICE.items():
        xs2[grp] = mm(h1[grp], w_ref[:, base:base + width])      # (Ns, 16*n_edges_in_grp)

    def gat2(e, h_src, h_dst):
        s, _, t = EDGE_TYPES[e]
        ns, nd = NODE_COUNTS[s], NODE_COUNTS[t]
        keep = edge_ref[32 * e:32 * e + nd, 0:ns]
        nbias = edge_ref[32 * e + 16:32 * e + 16 + nd, 0:ns]
        vs = sw_ref[SW_C2ATT + 2 * e:SW_C2ATT + 2 * e + 1, :]     # (1,32)
        vd = sw_ref[SW_C2ATT + 2 * e + 1:SW_C2ATT + 2 * e + 2, :] # (1,32)
        a_src = dot_nt(vs, h_src)                                 # (1, ns)
        a_dst = dot_nt(h_dst, vd)                                 # (nd, 1)
        lg = a_dst + a_src
        lg = jnp.where(lg >= 0.0, lg, NEG_SLOPE * lg) + nbias
        p = softmax_rows(lg, keep)
        grp, base = C2_LOCAL[e]
        out = mm(p, xs2[grp][:, base:base + OUT_DIM])
        return out + sw_ref[SW_C2B + e:SW_C2B + e + 1, 0:OUT_DIM]

    grouped2 = {}
    for e, (s, _, t) in enumerate(EDGE_TYPES):
        grouped2.setdefault(t, []).append(gat2(e, h1[s], h1[t]))
    h2 = {}
    for t, outs in grouped2.items():
        agg = outs[0]
        for extra in outs[1:]:
            agg = agg + extra
        h2[t] = agg * (1.0 / len(outs)) if len(outs) > 1 else agg

    # ---- dim projection for node types conv2 did not update (statically: user)
    for t_idx, nt in enumerate(NODE_ORDER):
        if nt not in h2:
            wdp = w_ref[:, DIMPROJ_OFF + 16 * t_idx:DIMPROJ_OFF + 16 * t_idx + 16]
            h2[nt] = mm(h1[nt], wdp) + sw_ref[SW_DPB + t_idx:SW_DPB + t_idx + 1, 0:OUT_DIM]

    # ---- node_out -> packed lane-dense (40,128) slab, full-width stores -----
    for t_idx, nt in enumerate(NODE_ORDER):
        off, n = ROW_OFFSETS[nt], NODE_COUNTS[nt]
        y = mm(h2[nt], nout_ref[16 * t_idx:16 * t_idx + 16, :]) \
            + nout_ref[64 + t_idx:65 + t_idx, :]
        o_ref[off:off + n, :] = y.astype(o_ref.dtype)


# ---------------------------------------------------------------------------
# One-time glue: parameter packing (hoisted out of the per-call path)
# ---------------------------------------------------------------------------
def pack_params(params):
    f32 = jnp.float32

    def att_vec(w, att):  # (H,F,O),(H,1,O) -> (H,F): rows are W_h @ att_h
        return jnp.einsum("hfo,ho->hf", w, att[:, 0, :])

    # --- smallw (136, 32) ----------------------------------------------------
    sw = jnp.zeros((SW_ROWS, HIDDEN_DIM), f32)
    for t_idx, nt in enumerate(NODE_ORDER):
        sw = sw.at[SW_S1W + 4 * t_idx:SW_S1W + 4 * t_idx + 4, :].set(
            params["node_proj"][nt]["w"])
        off, n = ROW_OFFSETS[nt], NODE_COUNTS[nt]
        sw = sw.at[SW_S1B + off:SW_S1B + off + n, :].set(
            jnp.broadcast_to(params["node_proj"][nt]["b"], (n, HIDDEN_DIM)))
        sw = sw.at[SW_DPB + t_idx, :OUT_DIM].set(params["dim_proj"][nt]["b"][0])
    for e, et in enumerate(EDGE_TYPES):
        p1, p2 = params["conv1"][et], params["conv2"][et]
        sw = sw.at[SW_C1ATT + 8 * e:SW_C1ATT + 8 * e + 4, :].set(
            att_vec(p1["w"], p1["att_src"]))
        sw = sw.at[SW_C1ATT + 8 * e + 4:SW_C1ATT + 8 * e + 8, :].set(
            att_vec(p1["w"], p1["att_dst"]))
        sw = sw.at[SW_C1B + e, :].set(p1["bias"][0])
        sw = sw.at[SW_C2ATT + 2 * e, :].set(att_vec(p2["w"], p2["att_src"])[0])
        sw = sw.at[SW_C2ATT + 2 * e + 1, :].set(att_vec(p2["w"], p2["att_dst"])[0])
        sw = sw.at[SW_C2B + e, :OUT_DIM].set(p2["bias"][0])

    # --- wslab (32, 864) ------------------------------------------------------
    wsl = jnp.zeros((HIDDEN_DIM, WSLAB_LANES), f32)
    c1_base = {0: 0, 1: 128, 2: 256, 3: 384, 4: 512}
    c2_base = {0: 640, 1: 656, 2: 672, 3: 768, 4: 784}
    for e, et in enumerate(EDGE_TYPES):
        w1 = params["conv1"][et]["w"]                       # (4, 32, 32)
        for h in range(NUM_HEADS):
            wsl = wsl.at[:, c1_base[e] + 32 * h:c1_base[e] + 32 * h + 32].set(w1[h])
        wsl = wsl.at[:, c2_base[e]:c2_base[e] + OUT_DIM].set(params["conv2"][et]["w"][0])
    for t_idx, nt in enumerate(NODE_ORDER):
        wsl = wsl.at[:, DIMPROJ_OFF + 16 * t_idx:DIMPROJ_OFF + 16 * t_idx + 16].set(
            params["dim_proj"][nt]["w"])

    # --- nout (68, 128): lane-padded node_out weights + bias rows -------------
    no = jnp.zeros((68, PACK_LANES), f32)
    for t_idx, nt in enumerate(NODE_ORDER):
        no = no.at[16 * t_idx:16 * t_idx + 16, :OUT_DIM].set(params["node_out"][nt]["w"])
        no = no.at[64 + t_idx, :OUT_DIM].set(params["node_out"][nt]["b"][0])

    return {"smallw": sw, "wslab": wsl, "nout": no}


# One-time glue: dense adjacency keep-mask + additive bias (edge_index is static per graph)
def pack_edges(edge_index_dict):
    f32 = jnp.float32
    slab = jnp.zeros((32 * len(EDGE_TYPES), MAXN), f32)
    for e, et in enumerate(EDGE_TYPES):
        s, _, t = et
        ns, nd = NODE_COUNTS[s], NODE_COUNTS[t]
        ei = edge_index_dict[et]
        adj = jnp.zeros((nd, ns), f32).at[ei[1], ei[0]].set(1.0)
        if s == t:                                   # self-loops for non-bipartite types
            adj = jnp.maximum(adj, jnp.eye(nd, ns, dtype=f32))
        bias = jnp.where(adj > 0.5, 0.0, -1e30)
        slab = slab.at[32 * e:32 * e + nd, :ns].set(adj)
        slab = slab.at[32 * e + 16:32 * e + 16 + nd, :ns].set(bias)
    return slab


# ---------------------------------------------------------------------------
# Per-call forward: only the (40,16) feature slab is built per call
# ---------------------------------------------------------------------------
def hetero_gnn_forward(packed, edge_slab, x_dict):
    f32 = jnp.float32
    x_slab = jnp.zeros((TOTAL_ROWS, 4 * len(NODE_ORDER)), f32)
    for t_idx, nt in enumerate(NODE_ORDER):
        off, n = ROW_OFFSETS[nt], NODE_COUNTS[nt]
        x_slab = x_slab.at[off:off + n, 4 * t_idx:4 * t_idx + 4].set(x_dict[nt])

    slab = pl.pallas_call(
        _fused_hetero_gnn_kernel,
        out_shape=jax.ShapeDtypeStruct((TOTAL_ROWS, PACK_LANES), f32),
        in_specs=[_VMEM] * 5,
        out_specs=_VMEM,
    )(x_slab, edge_slab, packed["smallw"], packed["wslab"], packed["nout"])

    out = {}
    for nt in NODE_ORDER:
        off = ROW_OFFSETS[nt]
        out[nt] = slab[off:off + NODE_COUNTS[nt], :OUT_DIM]
    return out


# ---------------------------------------------------------------------------
# Deterministic parameter init (synthetic; no checkpoint load)
# ---------------------------------------------------------------------------
def _uniform(key, shape, bound):
    return jax.random.uniform(key, shape, jnp.float32, -bound, bound)


def init_params(key):
    keys = iter(jax.random.split(key, 512))
    nxt = lambda: next(keys)
    params = {"node_proj": {}, "conv1": {}, "conv2": {}, "dim_proj": {}, "node_out": {}}
    for nt in NODE_ORDER:
        b_in = 1.0 / (IN_DIM ** 0.5)
        params["node_proj"][nt] = {"w": _uniform(nxt(), (IN_DIM, HIDDEN_DIM), b_in),
                                   "b": _uniform(nxt(), (1, HIDDEN_DIM), b_in)}
        b_h = 1.0 / (HIDDEN_DIM ** 0.5)
        params["dim_proj"][nt] = {"w": _uniform(nxt(), (HIDDEN_DIM, OUT_DIM), b_h),
                                  "b": _uniform(nxt(), (1, OUT_DIM), b_h)}
        b_o = 1.0 / (OUT_DIM ** 0.5)
        params["node_out"][nt] = {"w": _uniform(nxt(), (OUT_DIM, OUT_DIM), b_o),
                                  "b": _uniform(nxt(), (1, OUT_DIM), b_o)}
    for et in EDGE_TYPES:
        b_h = 1.0 / (HIDDEN_DIM ** 0.5)
        params["conv1"][et] = {
            "w": _uniform(nxt(), (NUM_HEADS, HIDDEN_DIM, HIDDEN_DIM), b_h),
            "att_src": _uniform(nxt(), (NUM_HEADS, 1, HIDDEN_DIM), b_h),
            "att_dst": _uniform(nxt(), (NUM_HEADS, 1, HIDDEN_DIM), b_h),
            "bias": jnp.zeros((1, HIDDEN_DIM), jnp.float32),
        }
        params["conv2"][et] = {
            "w": _uniform(nxt(), (1, HIDDEN_DIM, OUT_DIM), b_h),
            "att_src": _uniform(nxt(), (1, 1, OUT_DIM), b_h),
            "att_dst": _uniform(nxt(), (1, 1, OUT_DIM), b_h),
            "bias": jnp.zeros((1, OUT_DIM), jnp.float32),
        }
    return params


# ---------------------------------------------------------------------------
if __name__ == "__main__":
    key = jax.random.PRNGKey(0)
    kp, kx, ke = jax.random.split(key, 3)

    params = init_params(kp)

    xkeys = jax.random.split(kx, len(NODE_ORDER))
    x_dict = {nt: jax.random.normal(k, (NODE_COUNTS[nt], IN_DIM), jnp.float32)
              for nt, k in zip(NODE_ORDER, xkeys)}

    ekeys = jax.random.split(ke, len(EDGE_TYPES))
    edge_index_dict = {}
    for et, k in zip(EDGE_TYPES, ekeys):
        s, _, t = et
        n_edges = 24
        k1, k2 = jax.random.split(k)
        src = jax.random.randint(k1, (n_edges,), 0, NODE_COUNTS[s], dtype=jnp.int32)
        dst = jax.random.randint(k2, (n_edges,), 0, NODE_COUNTS[t], dtype=jnp.int32)
        edge_index_dict[et] = jnp.stack([src, dst])

    # One-time packing (hoisted out of the per-call hot path).
    packed = jax.tree_util.tree_map(jax.block_until_ready, pack_params(params))
    edge_slab = jax.block_until_ready(pack_edges(edge_index_dict))

    fwd = jax.jit(hetero_gnn_forward)
    out = fwd(packed, edge_slab, x_dict)
    out = jax.tree_util.tree_map(jax.block_until_ready, out)

    assert out["user"].shape == (NODE_COUNTS["user"], OUT_DIM)
    assert out["product"].shape == (NODE_COUNTS["product"], OUT_DIM)
    assert out["category"].shape == (NODE_COUNTS["category"], OUT_DIM)
    assert out["style"].shape == (NODE_COUNTS["style"], OUT_DIM)
    assert all(bool(jnp.all(jnp.isfinite(v))) for v in out.values())
    print("KERNEL_OK")
</pallas_src>

<mosaic_0001>
module attributes {stable_mosaic.version = 11 : i64} {
  func.func @_fused_hetero_gnn_kernel(%arg0: memref<40x16xf32, #tpu.memory_space<vmem>>, %arg1: memref<160x16xf32, #tpu.memory_space<vmem>>, %arg2: memref<136x32xf32, #tpu.memory_space<vmem>>, %arg3: memref<32x864xf32, #tpu.memory_space<vmem>>, %arg4: memref<68x128xf32, #tpu.memory_space<vmem>>, %arg5: memref<40x128xf32, #tpu.memory_space<vmem>>) attributes {dimension_semantics = [], scalar_prefetch = 0 : i64, scratch_operands = 0 : i64, tpu.core_type = #tpu.core_type<tc>} {
    %c0 = arith.constant 0 : index
    %c0_0 = arith.constant 0 : index
    %0 = vector.load %arg0[%c0, %c0_0] : memref<40x16xf32, #tpu.memory_space<vmem>>, vector<40x16xf32>
    %c0_1 = arith.constant 0 : index
    %c0_2 = arith.constant 0 : index
    %1 = vector.load %arg2[%c0_1, %c0_2] : memref<136x32xf32, #tpu.memory_space<vmem>>, vector<16x32xf32>
    %cst = arith.constant dense<0.000000e+00> : vector<40x32xf32>
    %2 = tpu.matmul %0, %1, %cst {dimension_numbers = #tpu.dot_dimension_numbers<[1], [0], [0], [1], [0, 0, 1, 1], [], []>} : vector<40x16xf32>, vector<16x32xf32>, vector<40x32xf32> -> vector<40x32xf32>
    %c16 = arith.constant 16 : index
    %c0_3 = arith.constant 0 : index
    %3 = vector.load %arg2[%c16, %c0_3] : memref<136x32xf32, #tpu.memory_space<vmem>>, vector<40x32xf32>
    %4 = arith.addf %2, %3 : vector<40x32xf32>
    %cst_4 = arith.constant 0.000000e+00 : f32
    %5 = vector.broadcast %cst_4 : f32 to vector<40x32xf32>
    %6 = arith.maximumf %4, %5 : vector<40x32xf32>
    %7 = vector.extract_strided_slice %6 {offsets = [0, 0], sizes = [8, 32], strides = [1, 1]} : vector<40x32xf32> to vector<8x32xf32>
    %8 = vector.extract_strided_slice %6 {offsets = [8, 0], sizes = [16, 32], strides = [1, 1]} : vector<40x32xf32> to vector<16x32xf32>
    %9 = vector.extract_strided_slice %6 {offsets = [24, 0], sizes = [8, 32], strides = [1, 1]} : vector<40x32xf32> to vector<8x32xf32>
    %10 = vector.extract_strided_slice %6 {offsets = [32, 0], sizes = [8, 32], strides = [1, 1]} : vector<40x32xf32> to vector<8x32xf32>
    %c0_5 = arith.constant 0 : index
    %c0_6 = arith.constant 0 : index
    %11 = vector.load %arg3[%c0_5, %c0_6] : memref<32x864xf32, #tpu.memory_space<vmem>>, vector<32x384xf32>
    %cst_7 = arith.constant dense<0.000000e+00> : vector<16x384xf32>
    %12 = tpu.matmul %8, %11, %cst_7 {dimension_numbers = #tpu.dot_dimension_numbers<[1], [0], [0], [1], [0, 0, 1, 1], [], []>} : vector<16x32xf32>, vector<32x384xf32>, vector<16x384xf32> -> vector<16x384xf32>
    %c0_8 = arith.constant 0 : index
    %c384 = arith.constant 384 : index
    %13 = vector.load %arg3[%c0_8, %c384] : memref<32x864xf32, #tpu.memory_space<vmem>>, vector<32x256xf32>
    %cst_9 = arith.constant dense<0.000000e+00> : vector<8x256xf32>
    %14 = tpu.matmul %7, %13, %cst_9 {dimension_numbers = #tpu.dot_dimension_numbers<[1], [0], [0], [1], [0, 0, 1, 1], [], []>} : vector<8x32xf32>, vector<32x256xf32>, vector<8x256xf32> -> vector<8x256xf32>
    %c0_10 = arith.constant 0 : index
    %c0_11 = arith.constant 0 : index
    %15 = vector.load %arg1[%c0_10, %c0_11] : memref<160x16xf32, #tpu.memory_space<vmem>>, vector<16x16xf32>
    %c16_12 = arith.constant 16 : index
    %c0_13 = arith.constant 0 : index
    %16 = vector.load %arg1[%c16_12, %c0_13] : memref<160x16xf32, #tpu.memory_space<vmem>>, vector<16x16xf32>
    %c56 = arith.constant 56 : index
    %c0_14 = arith.constant 0 : index
    %17 = vector.load %arg2[%c56, %c0_14] : memref<136x32xf32, #tpu.memory_space<vmem>>, vector<4x32xf32>
    %c60 = arith.constant 60 : index
    %c0_15 = arith.constant 0 : index
    %18 = vector.load %arg2[%c60, %c0_15] : memref<136x32xf32, #tpu.memory_space<vmem>>, vector<4x32xf32>
    %cst_16 = arith.constant dense<0.000000e+00> : vector<4x16xf32>
    %19 = tpu.matmul %17, %8, %cst_16 {dimension_numbers = #tpu.dot_dimension_numbers<[1], [1], [0], [0], [0, 0, 1, 0], [], []>} : vector<4x32xf32>, vector<16x32xf32>, vector<4x16xf32> -> vector<4x16xf32>
    %cst_17 = arith.constant dense<0.000000e+00> : vector<16x4xf32>
    %20 = tpu.matmul %8, %18, %cst_17 {dimension_numbers = #tpu.dot_dimension_numbers<[1], [1], [0], [0], [0, 0, 1, 0], [], []>} : vector<16x32xf32>, vector<4x32xf32>, vector<16x4xf32> -> vector<16x4xf32>
    %cst_18 = arith.constant 0.000000e+00 : f32
    %21 = vector.broadcast %cst_18 : f32 to vector<16x32xf32>
    %22 = vector.extract_strided_slice %20 {offsets = [0, 0], sizes = [16, 1], strides = [1, 1]} : vector<16x4xf32> to vector<16x1xf32>
    %23 = vector.extract_strided_slice %19 {offsets = [0, 0], sizes = [1, 16], strides = [1, 1]} : vector<4x16xf32> to vector<1x16xf32>
    %24 = vector.broadcast %22 : vector<16x1xf32> to vector<16x16xf32>
    %25 = vector.broadcast %23 : vector<1x16xf32> to vector<16x16xf32>
    %26 = arith.addf %24, %25 : vector<16x16xf32>
    %cst_19 = arith.constant 0.000000e+00 : f32
    %27 = vector.broadcast %cst_19 : f32 to vector<16x16xf32>
    %28 = arith.cmpf oge, %26, %27 : vector<16x16xf32>
    %cst_20 = arith.constant 2.000000e-01 : f32
    %29 = vector.broadcast %cst_20 : f32 to vector<16x16xf32>
    %30 = arith.mulf %29, %26 : vector<16x16xf32>
    %31 = arith.select %28, %26, %30 : vector<16x16xi1>, vector<16x16xf32>
    %32 = arith.addf %31, %16 : vector<16x16xf32>
    %cst_21 = arith.constant dense<0xFF800000> : vector<16xf32>
    %33 = vector.multi_reduction <maximumf>, %32, %cst_21 [1] : vector<16x16xf32> to vector<16xf32>
    %34 = vector.shape_cast %33 : vector<16xf32> to vector<16x1xf32>
    %35 = vector.broadcast %34 : vector<16x1xf32> to vector<16x16xf32>
    %36 = arith.subf %32, %35 : vector<16x16xf32>
    %37 = math.exp %36 : vector<16x16xf32>
    %38 = arith.mulf %15, %37 : vector<16x16xf32>
    %cst_22 = arith.constant dense<0.000000e+00> : vector<16xf32>
    %39 = vector.multi_reduction <add>, %38, %cst_22 [1] : vector<16x16xf32> to vector<16xf32>
    %40 = vector.shape_cast %39 : vector<16xf32> to vector<16x1xf32>
    %cst_23 = arith.constant 0.000000e+00 : f32
    %41 = vector.broadcast %cst_23 : f32 to vector<16x1xf32>
    %42 = arith.cmpf ogt, %40, %41 : vector<16x1xf32>
    %cst_24 = arith.constant 1.000000e+00 : f32
    %43 = vector.broadcast %cst_24 : f32 to vector<16x1xf32>
    %44 = arith.select %42, %40, %43 : vector<16x1xi1>, vector<16x1xf32>
    %cst_25 = arith.constant 1.000000e+00 : f32
    %45 = vector.broadcast %cst_25 : f32 to vector<16x1xf32>
    %46 = arith.divf %45, %44 : vector<16x1xf32>
    %47 = vector.broadcast %46 : vector<16x1xf32> to vector<16x16xf32>
    %48 = arith.mulf %38, %47 : vector<16x16xf32>
    %49 = vector.extract_strided_slice %12 {offsets = [0, 0], sizes = [16, 32], strides = [1, 1]} : vector<16x384xf32> to vector<16x32xf32>
    %cst_26 = arith.constant dense<0.000000e+00> : vector<16x32xf32>
    %50 = tpu.matmul %48, %49, %cst_26 {dimension_numbers = #tpu.dot_dimension_numbers<[1], [0], [0], [1], [0, 0, 1, 1], [], []>} : vector<16x16xf32>, vector<16x32xf32>, vector<16x32xf32> -> vector<16x32xf32>
    %51 = arith.addf %21, %50 : vector<16x32xf32>
    %52 = vector.extract_strided_slice %20 {offsets = [0, 1], sizes = [16, 1], strides = [1, 1]} : vector<16x4xf32> to vector<16x1xf32>
    %53 = vector.extract_strided_slice %19 {offsets = [1, 0], sizes = [1, 16], strides = [1, 1]} : vector<4x16xf32> to vector<1x16xf32>
    %54 = vector.broadcast %52 : vector<16x1xf32> to vector<16x16xf32>
    %55 = vector.broadcast %53 : vector<1x16xf32> to vector<16x16xf32>
    %56 = arith.addf %54, %55 : vector<16x16xf32>
    %cst_27 = arith.constant 0.000000e+00 : f32
    %57 = vector.broadcast %cst_27 : f32 to vector<16x16xf32>
    %58 = arith.cmpf oge, %56, %57 : vector<16x16xf32>
    %cst_28 = arith.constant 2.000000e-01 : f32
    %59 = vector.broadcast %cst_28 : f32 to vector<16x16xf32>
    %60 = arith.mulf %59, %56 : vector<16x16xf32>
    %61 = arith.select %58, %56, %60 : vector<16x16xi1>, vector<16x16xf32>
    %62 = arith.addf %61, %16 : vector<16x16xf32>
    %cst_29 = arith.constant dense<0xFF800000> : vector<16xf32>
    %63 = vector.multi_reduction <maximumf>, %62, %cst_29 [1] : vector<16x16xf32> to vector<16xf32>
    %64 = vector.shape_cast %63 : vector<16xf32> to vector<16x1xf32>
    %65 = vector.broadcast %64 : vector<16x1xf32> to vector<16x16xf32>
    %66 = arith.subf %62, %65 : vector<16x16xf32>
    %67 = math.exp %66 : vector<16x16xf32>
    %68 = arith.mulf %15, %67 : vector<16x16xf32>
    %cst_30 = arith.constant dense<0.000000e+00> : vector<16xf32>
    %69 = vector.multi_reduction <add>, %68, %cst_30 [1] : vector<16x16xf32> to vector<16xf32>
    %70 = vector.shape_cast %69 : vector<16xf32> to vector<16x1xf32>
    %cst_31 = arith.constant 0.000000e+00 : f32
    %71 = vector.broadcast %cst_31 : f32 to vector<16x1xf32>
    %72 = arith.cmpf ogt, %70, %71 : vector<16x1xf32>
    %cst_32 = arith.constant 1.000000e+00 : f32
    %73 = vector.broadcast %cst_32 : f32 to vector<16x1xf32>
    %74 = arith.select %72, %70, %73 : vector<16x1xi1>, vector<16x1xf32>
    %cst_33 = arith.constant 1.000000e+00 : f32
    %75 = vector.broadcast %cst_33 : f32 to vector<16x1xf32>
    %76 = arith.divf %75, %74 : vector<16x1xf32>
    %77 = vector.broadcast %76 : vector<16x1xf32> to vector<16x16xf32>
    %78 = arith.mulf %68, %77 : vector<16x16xf32>
    %79 = vector.extract_strided_slice %12 {offsets = [0, 32], sizes = [16, 32], strides = [1, 1]} : vector<16x384xf32> to vector<16x32xf32>
    %cst_34 = arith.constant dense<0.000000e+00> : vector<16x32xf32>
    %80 = tpu.matmul %78, %79, %cst_34 {dimension_numbers = #tpu.dot_dimension_numbers<[1], [0], [0], [1], [0, 0, 1, 1], [], []>} : vector<16x16xf32>, vector<16x32xf32>, vector<16x32xf32> -> vector<16x32xf32>
    %81 = arith.addf %51, %80 : vector<16x32xf32>
    %82 = vector.extract_strided_slice %20 {offsets = [0, 2], sizes = [16, 1], strides = [1, 1]} : vector<16x4xf32> to vector<16x1xf32>
    %83 = vector.extract_strided_slice %19 {offsets = [2, 0], sizes = [1, 16], strides = [1, 1]} : vector<4x16xf32> to vector<1x16xf32>
    %84 = vector.broadcast %82 : vector<16x1xf32> to vector<16x16xf32>
    %85 = vector.broadcast %83 : vector<1x16xf32> to vector<16x16xf32>
    %86 = arith.addf %84, %85 : vector<16x16xf32>
    %cst_35 = arith.constant 0.000000e+00 : f32
    %87 = vector.broadcast %cst_35 : f32 to vector<16x16xf32>
    %88 = arith.cmpf oge, %86, %87 : vector<16x16xf32>
    %cst_36 = arith.constant 2.000000e-01 : f32
    %89 = vector.broadcast %cst_36 : f32 to vector<16x16xf32>
    %90 = arith.mulf %89, %86 : vector<16x16xf32>
    %91 = arith.select %88, %86, %90 : vector<16x16xi1>, vector<16x16xf32>
    %92 = arith.addf %91, %16 : vector<16x16xf32>
    %cst_37 = arith.constant dense<0xFF800000> : vector<16xf32>
    %93 = vector.multi_reduction <maximumf>, %92, %cst_37 [1] : vector<16x16xf32> to vector<16xf32>
    %94 = vector.shape_cast %93 : vector<16xf32> to vector<16x1xf32>
    %95 = vector.broadcast %94 : vector<16x1xf32> to vector<16x16xf32>
    %96 = arith.subf %92, %95 : vector<16x16xf32>
    %97 = math.exp %96 : vector<16x16xf32>
    %98 = arith.mulf %15, %97 : vector<16x16xf32>
    %cst_38 = arith.constant dense<0.000000e+00> : vector<16xf32>
    %99 = vector.multi_reduction <add>, %98, %cst_38 [1] : vector<16x16xf32> to vector<16xf32>
    %100 = vector.shape_cast %99 : vector<16xf32> to vector<16x1xf32>
    %cst_39 = arith.constant 0.000000e+00 : f32
    %101 = vector.broadcast %cst_39 : f32 to vector<16x1xf32>
    %102 = arith.cmpf ogt, %100, %101 : vector<16x1xf32>
    %cst_40 = arith.constant 1.000000e+00 : f32
    %103 = vector.broadcast %cst_40 : f32 to vector<16x1xf32>
    %104 = arith.select %102, %100, %103 : vector<16x1xi1>, vector<16x1xf32>
    %cst_41 = arith.constant 1.000000e+00 : f32
    %105 = vector.broadcast %cst_41 : f32 to vector<16x1xf32>
    %106 = arith.divf %105, %104 : vector<16x1xf32>
    %107 = vector.broadcast %106 : vector<16x1xf32> to vector<16x16xf32>
    %108 = arith.mulf %98, %107 : vector<16x16xf32>
    %109 = vector.extract_strided_slice %12 {offsets = [0, 64], sizes = [16, 32], strides = [1, 1]} : vector<16x384xf32> to vector<16x32xf32>
    %cst_42 = arith.constant dense<0.000000e+00> : vector<16x32xf32>
    %110 = tpu.matmul %108, %109, %cst_42 {dimension_numbers = #tpu.dot_dimension_numbers<[1], [0], [0], [1], [0, 0, 1, 1], [], []>} : vector<16x16xf32>, vector<16x32xf32>, vector<16x32xf32> -> vector<16x32xf32>
    %111 = arith.addf %81, %110 : vector<16x32xf32>
    %112 = vector.extract_strided_slice %20 {offsets = [0, 3], sizes = [16, 1], strides = [1, 1]} : vector<16x4xf32> to vector<16x1xf32>
    %113 = vector.extract_strided_slice %19 {offsets = [3, 0], sizes = [1, 16], strides = [1, 1]} : vector<4x16xf32> to vector<1x16xf32>
    %114 = vector.broadcast %112 : vector<16x1xf32> to vector<16x16xf32>
    %115 = vector.broadcast %113 : vector<1x16xf32> to vector<16x16xf32>
    %116 = arith.addf %114, %115 : vector<16x16xf32>
    %cst_43 = arith.constant 0.000000e+00 : f32
    %117 = vector.broadcast %cst_43 : f32 to vector<16x16xf32>
    %118 = arith.cmpf oge, %116, %117 : vector<16x16xf32>
    %cst_44 = arith.constant 2.000000e-01 : f32
    %119 = vector.broadcast %cst_44 : f32 to vector<16x16xf32>
    %120 = arith.mulf %119, %116 : vector<16x16xf32>
    %121 = arith.select %118, %116, %120 : vector<16x16xi1>, vector<16x16xf32>
    %122 = arith.addf %121, %16 : vector<16x16xf32>
    %cst_45 = arith.constant dense<0xFF800000> : vector<16xf32>
    %123 = vector.multi_reduction <maximumf>, %122, %cst_45 [1] : vector<16x16xf32> to vector<16xf32>
    %124 = vector.shape_cast %123 : vector<16xf32> to vector<16x1xf32>
    %125 = vector.broadcast %124 : vector<16x1xf32> to vector<16x16xf32>
    %126 = arith.subf %122, %125 : vector<16x16xf32>
    %127 = math.exp %126 : vector<16x16xf32>
    %128 = arith.mulf %15, %127 : vector<16x16xf32>
    %cst_46 = arith.constant dense<0.000000e+00> : vector<16xf32>
    %129 = vector.multi_reduction <add>, %128, %cst_46 [1] : vector<16x16xf32> to vector<16xf32>
    %130 = vector.shape_cast %129 : vector<16xf32> to vector<16x1xf32>
    %cst_47 = arith.constant 0.000000e+00 : f32
    %131 = vector.broadcast %cst_47 : f32 to vector<16x1xf32>
    %132 = arith.cmpf ogt, %130, %131 : vector<16x1xf32>
    %cst_48 = arith.constant 1.000000e+00 : f32
    %133 = vector.broadcast %cst_48 : f32 to vector<16x1xf32>
    %134 = arith.select %132, %130, %133 : vector<16x1xi1>, vector<16x1xf32>
    %cst_49 = arith.constant 1.000000e+00 : f32
    %135 = vector.broadcast %cst_49 : f32 to vector<16x1xf32>
    %136 = arith.divf %135, %134 : vector<16x1xf32>
    %137 = vector.broadcast %136 : vector<16x1xf32> to vector<16x16xf32>
    %138 = arith.mulf %128, %137 : vector<16x16xf32>
    %139 = vector.extract_strided_slice %12 {offsets = [0, 96], sizes = [16, 32], strides = [1, 1]} : vector<16x384xf32> to vector<16x32xf32>
    %cst_50 = arith.constant dense<0.000000e+00> : vector<16x32xf32>
    %140 = tpu.matmul %138, %139, %cst_50 {dimension_numbers = #tpu.dot_dimension_numbers<[1], [0], [0], [1], [0, 0, 1, 1], [], []>} : vector<16x16xf32>, vector<16x32xf32>, vector<16x32xf32> -> vector<16x32xf32>
    %141 = arith.addf %111, %140 : vector<16x32xf32>
    %cst_51 = arith.constant 2.500000e-01 : f32
    %142 = vector.broadcast %cst_51 : f32 to vector<16x32xf32>
    %143 = arith.mulf %141, %142 : vector<16x32xf32>
    %c96 = arith.constant 96 : index
    %c0_52 = arith.constant 0 : index
    %144 = vector.load %arg2[%c96, %c0_52] : memref<136x32xf32, #tpu.memory_space<vmem>>, vector<1x32xf32>
    %145 = vector.broadcast %144 : vector<1x32xf32> to vector<16x32xf32>
    %146 = arith.addf %143, %145 : vector<16x32xf32>
    %c32 = arith.constant 32 : index
    %c0_53 = arith.constant 0 : index
    %147 = vector.load %arg1[%c32, %c0_53] : memref<160x16xf32, #tpu.memory_space<vmem>>, vector<8x16xf32>
    %c48 = arith.constant 48 : index
    %c0_54 = arith.constant 0 : index
    %148 = vector.load %arg1[%c48, %c0_54] : memref<160x16xf32, #tpu.memory_space<vmem>>, vector<8x16xf32>
    %c64 = arith.constant 64 : index
    %c0_55 = arith.constant 0 : index
    %149 = vector.load %arg2[%c64, %c0_55] : memref<136x32xf32, #tpu.memory_space<vmem>>, vector<4x32xf32>
    %c68 = arith.constant 68 : index
    %c0_56 = arith.constant 0 : index
    %150 = vector.load %arg2[%c68, %c0_56] : memref<136x32xf32, #tpu.memory_space<vmem>>, vector<4x32xf32>
    %cst_57 = arith.constant dense<0.000000e+00> : vector<4x16xf32>
    %151 = tpu.matmul %149, %8, %cst_57 {dimension_numbers = #tpu.dot_dimension_numbers<[1], [1], [0], [0], [0, 0, 1, 0], [], []>} : vector<4x32xf32>, vector<16x32xf32>, vector<4x16xf32> -> vector<4x16xf32>
    %cst_58 = arith.constant dense<0.000000e+00> : vector<8x4xf32>
    %152 = tpu.matmul %9, %150, %cst_58 {dimension_numbers = #tpu.dot_dimension_numbers<[1], [1], [0], [0], [0, 0, 1, 0], [], []>} : vector<8x32xf32>, vector<4x32xf32>, vector<8x4xf32> -> vector<8x4xf32>
    %cst_59 = arith.constant 0.000000e+00 : f32
    %153 = vector.broadcast %cst_59 : f32 to vector<8x32xf32>
    %154 = vector.extract_strided_slice %152 {offsets = [0, 0], sizes = [8, 1], strides = [1, 1]} : vector<8x4xf32> to vector<8x1xf32>
    %155 = vector.extract_strided_slice %151 {offsets = [0, 0], sizes = [1, 16], strides = [1, 1]} : vector<4x16xf32> to vector<1x16xf32>
    %156 = vector.broadcast %154 : vector<8x1xf32> to vector<8x16xf32>
    %157 = vector.broadcast %155 : vector<1x16xf32> to vector<8x16xf32>
    %158 = arith.addf %156, %157 : vector<8x16xf32>
    %cst_60 = arith.constant 0.000000e+00 : f32
    %159 = vector.broadcast %cst_60 : f32 to vector<8x16xf32>
    %160 = arith.cmpf oge, %158, %159 : vector<8x16xf32>
    %cst_61 = arith.constant 2.000000e-01 : f32
    %161 = vector.broadcast %cst_61 : f32 to vector<8x16xf32>
    %162 = arith.mulf %161, %158 : vector<8x16xf32>
    %163 = arith.select %160, %158, %162 : vector<8x16xi1>, vector<8x16xf32>
    %164 = arith.addf %163, %148 : vector<8x16xf32>
    %cst_62 = arith.constant dense<0xFF800000> : vector<8xf32>
    %165 = vector.multi_reduction <maximumf>, %164, %cst_62 [1] : vector<8x16xf32> to vector<8xf32>
    %166 = vector.shape_cast %165 : vector<8xf32> to vector<8x1xf32>
    %167 = vector.broadcast %166 : vector<8x1xf32> to vector<8x16xf32>
    %168 = arith.subf %164, %167 : vector<8x16xf32>
    %169 = math.exp %168 : vector<8x16xf32>
    %170 = arith.mulf %147, %169 : vector<8x16xf32>
    %cst_63 = arith.constant dense<0.000000e+00> : vector<8xf32>
    %171 = vector.multi_reduction <add>, %170, %cst_63 [1] : vector<8x16xf32> to vector<8xf32>
    %172 = vector.shape_cast %171 : vector<8xf32> to vector<8x1xf32>
    %cst_64 = arith.constant 0.000000e+00 : f32
    %173 = vector.broadcast %cst_64 : f32 to vector<8x1xf32>
    %174 = arith.cmpf ogt, %172, %173 : vector<8x1xf32>
    %cst_65 = arith.constant 1.000000e+00 : f32
    %175 = vector.broadcast %cst_65 : f32 to vector<8x1xf32>
    %176 = arith.select %174, %172, %175 : vector<8x1xi1>, vector<8x1xf32>
    %cst_66 = arith.constant 1.000000e+00 : f32
    %177 = vector.broadcast %cst_66 : f32 to vector<8x1xf32>
    %178 = arith.divf %177, %176 : vector<8x1xf32>
    %179 = vector.broadcast %178 : vector<8x1xf32> to vector<8x16xf32>
    %180 = arith.mulf %170, %179 : vector<8x16xf32>
    %181 = vector.extract_strided_slice %12 {offsets = [0, 128], sizes = [16, 32], strides = [1, 1]} : vector<16x384xf32> to vector<16x32xf32>
    %cst_67 = arith.constant dense<0.000000e+00> : vector<8x32xf32>
    %182 = tpu.matmul %180, %181, %cst_67 {dimension_numbers = #tpu.dot_dimension_numbers<[1], [0], [0], [1], [0, 0, 1, 1], [], []>} : vector<8x16xf32>, vector<16x32xf32>, vector<8x32xf32> -> vector<8x32xf32>
    %183 = arith.addf %153, %182 : vector<8x32xf32>
    %184 = vector.extract_strided_slice %152 {offsets = [0, 1], sizes = [8, 1], strides = [1, 1]} : vector<8x4xf32> to vector<8x1xf32>
    %185 = vector.extract_strided_slice %151 {offsets = [1, 0], sizes = [1, 16], strides = [1, 1]} : vector<4x16xf32> to vector<1x16xf32>
    %186 = vector.broadcast %184 : vector<8x1xf32> to vector<8x16xf32>
    %187 = vector.broadcast %185 : vector<1x16xf32> to vector<8x16xf32>
    %188 = arith.addf %186, %187 : vector<8x16xf32>
    %cst_68 = arith.constant 0.000000e+00 : f32
    %189 = vector.broadcast %cst_68 : f32 to vector<8x16xf32>
    %190 = arith.cmpf oge, %188, %189 : vector<8x16xf32>
    %cst_69 = arith.constant 2.000000e-01 : f32
    %191 = vector.broadcast %cst_69 : f32 to vector<8x16xf32>
    %192 = arith.mulf %191, %188 : vector<8x16xf32>
    %193 = arith.select %190, %188, %192 : vector<8x16xi1>, vector<8x16xf32>
    %194 = arith.addf %193, %148 : vector<8x16xf32>
    %cst_70 = arith.constant dense<0xFF800000> : vector<8xf32>
    %195 = vector.multi_reduction <maximumf>, %194, %cst_70 [1] : vector<8x16xf32> to vector<8xf32>
    %196 = vector.shape_cast %195 : vector<8xf32> to vector<8x1xf32>
    %197 = vector.broadcast %196 : vector<8x1xf32> to vector<8x16xf32>
    %198 = arith.subf %194, %197 : vector<8x16xf32>
    %199 = math.exp %198 : vector<8x16xf32>
    %200 = arith.mulf %147, %199 : vector<8x16xf32>
    %cst_71 = arith.constant dense<0.000000e+00> : vector<8xf32>
    %201 = vector.multi_reduction <add>, %200, %cst_71 [1] : vector<8x16xf32> to vector<8xf32>
    %202 = vector.shape_cast %201 : vector<8xf32> to vector<8x1xf32>
    %cst_72 = arith.constant 0.000000e+00 : f32
    %203 = vector.broadcast %cst_72 : f32 to vector<8x1xf32>
    %204 = arith.cmpf ogt, %202, %203 : vector<8x1xf32>
    %cst_73 = arith.constant 1.000000e+00 : f32
    %205 = vector.broadcast %cst_73 : f32 to vector<8x1xf32>
    %206 = arith.select %204, %202, %205 : vector<8x1xi1>, vector<8x1xf32>
    %cst_74 = arith.constant 1.000000e+00 : f32
    %207 = vector.broadcast %cst_74 : f32 to vector<8x1xf32>
    %208 = arith.divf %207, %206 : vector<8x1xf32>
    %209 = vector.broadcast %208 : vector<8x1xf32> to vector<8x16xf32>
    %210 = arith.mulf %200, %209 : vector<8x16xf32>
    %211 = vector.extract_strided_slice %12 {offsets = [0, 160], sizes = [16, 32], strides = [1, 1]} : vector<16x384xf32> to vector<16x32xf32>
    %cst_75 = arith.constant dense<0.000000e+00> : vector<8x32xf32>
    %212 = tpu.matmul %210, %211, %cst_75 {dimension_numbers = #tpu.dot_dimension_numbers<[1], [0], [0], [1], [0, 0, 1, 1], [], []>} : vector<8x16xf32>, vector<16x32xf32>, vector<8x32xf32> -> vector<8x32xf32>
    %213 = arith.addf %183, %212 : vector<8x32xf32>
    %214 = vector.extract_strided_slice %152 {offsets = [0, 2], sizes = [8, 1], strides = [1, 1]} : vector<8x4xf32> to vector<8x1xf32>
    %215 = vector.extract_strided_slice %151 {offsets = [2, 0], sizes = [1, 16], strides = [1, 1]} : vector<4x16xf32> to vector<1x16xf32>
    %216 = vector.broadcast %214 : vector<8x1xf32> to vector<8x16xf32>
    %217 = vector.broadcast %215 : vector<1x16xf32> to vector<8x16xf32>
    %218 = arith.addf %216, %217 : vector<8x16xf32>
    %cst_76 = arith.constant 0.000000e+00 : f32
    %219 = vector.broadcast %cst_76 : f32 to vector<8x16xf32>
    %220 = arith.cmpf oge, %218, %219 : vector<8x16xf32>
    %cst_77 = arith.constant 2.000000e-01 : f32
    %221 = vector.broadcast %cst_77 : f32 to vector<8x16xf32>
    %222 = arith.mulf %221, %218 : vector<8x16xf32>
    %223 = arith.select %220, %218, %222 : vector<8x16xi1>, vector<8x16xf32>
    %224 = arith.addf %223, %148 : vector<8x16xf32>
    %cst_78 = arith.constant dense<0xFF800000> : vector<8xf32>
    %225 = vector.multi_reduction <maximumf>, %224, %cst_78 [1] : vector<8x16xf32> to vector<8xf32>
    %226 = vector.shape_cast %225 : vector<8xf32> to vector<8x1xf32>
    %227 = vector.broadcast %226 : vector<8x1xf32> to vector<8x16xf32>
    %228 = arith.subf %224, %227 : vector<8x16xf32>
    %229 = math.exp %228 : vector<8x16xf32>
    %230 = arith.mulf %147, %229 : vector<8x16xf32>
    %cst_79 = arith.constant dense<0.000000e+00> : vector<8xf32>
    %231 = vector.multi_reduction <add>, %230, %cst_79 [1] : vector<8x16xf32> to vector<8xf32>
    %232 = vector.shape_cast %231 : vector<8xf32> to vector<8x1xf32>
    %cst_80 = arith.constant 0.000000e+00 : f32
    %233 = vector.broadcast %cst_80 : f32 to vector<8x1xf32>
    %234 = arith.cmpf ogt, %232, %233 : vector<8x1xf32>
    %cst_81 = arith.constant 1.000000e+00 : f32
    %235 = vector.broadcast %cst_81 : f32 to vector<8x1xf32>
    %236 = arith.select %234, %232, %235 : vector<8x1xi1>, vector<8x1xf32>
    %cst_82 = arith.constant 1.000000e+00 : f32
    %237 = vector.broadcast %cst_82 : f32 to vector<8x1xf32>
    %238 = arith.divf %237, %236 : vector<8x1xf32>
    %239 = vector.broadcast %238 : vector<8x1xf32> to vector<8x16xf32>
    %240 = arith.mulf %230, %239 : vector<8x16xf32>
    %241 = vector.extract_strided_slice %12 {offsets = [0, 192], sizes = [16, 32], strides = [1, 1]} : vector<16x384xf32> to vector<16x32xf32>
    %cst_83 = arith.constant dense<0.000000e+00> : vector<8x32xf32>
    %242 = tpu.matmul %240, %241, %cst_83 {dimension_numbers = #tpu.dot_dimension_numbers<[1], [0], [0], [1], [0, 0, 1, 1], [], []>} : vector<8x16xf32>, vector<16x32xf32>, vector<8x32xf32> -> vector<8x32xf32>
    %243 = arith.addf %213, %242 : vector<8x32xf32>
    %244 = vector.extract_strided_slice %152 {offsets = [0, 3], sizes = [8, 1], strides = [1, 1]} : vector<8x4xf32> to vector<8x1xf32>
    %245 = vector.extract_strided_slice %151 {offsets = [3, 0], sizes = [1, 16], strides = [1, 1]} : vector<4x16xf32> to vector<1x16xf32>
    %246 = vector.broadcast %244 : vector<8x1xf32> to vector<8x16xf32>
    %247 = vector.broadcast %245 : vector<1x16xf32> to vector<8x16xf32>
    %248 = arith.addf %246, %247 : vector<8x16xf32>
    %cst_84 = arith.constant 0.000000e+00 : f32
    %249 = vector.broadcast %cst_84 : f32 to vector<8x16xf32>
    %250 = arith.cmpf oge, %248, %249 : vector<8x16xf32>
    %cst_85 = arith.constant 2.000000e-01 : f32
    %251 = vector.broadcast %cst_85 : f32 to vector<8x16xf32>
    %252 = arith.mulf %251, %248 : vector<8x16xf32>
    %253 = arith.select %250, %248, %252 : vector<8x16xi1>, vector<8x16xf32>
    %254 = arith.addf %253, %148 : vector<8x16xf32>
    %cst_86 = arith.constant dense<0xFF800000> : vector<8xf32>
    %255 = vector.multi_reduction <maximumf>, %254, %cst_86 [1] : vector<8x16xf32> to vector<8xf32>
    %256 = vector.shape_cast %255 : vector<8xf32> to vector<8x1xf32>
    %257 = vector.broadcast %256 : vector<8x1xf32> to vector<8x16xf32>
    %258 = arith.subf %254, %257 : vector<8x16xf32>
    %259 = math.exp %258 : vector<8x16xf32>
    %260 = arith.mulf %147, %259 : vector<8x16xf32>
    %cst_87 = arith.constant dense<0.000000e+00> : vector<8xf32>
    %261 = vector.multi_reduction <add>, %260, %cst_87 [1] : vector<8x16xf32> to vector<8xf32>
    %262 = vector.shape_cast %261 : vector<8xf32> to vector<8x1xf32>
    %cst_88 = arith.constant 0.000000e+00 : f32
    %263 = vector.broadcast %cst_88 : f32 to vector<8x1xf32>
    %264 = arith.cmpf ogt, %262, %263 : vector<8x1xf32>
    %cst_89 = arith.constant 1.000000e+00 : f32
    %265 = vector.broadcast %cst_89 : f32 to vector<8x1xf32>
    %266 = arith.select %264, %262, %265 : vector<8x1xi1>, vector<8x1xf32>
    %cst_90 = arith.constant 1.000000e+00 : f32
    %267 = vector.broadcast %cst_90 : f32 to vector<8x1xf32>
    %268 = arith.divf %267, %266 : vector<8x1xf32>
    %269 = vector.broadcast %268 : vector<8x1xf32> to vector<8x16xf32>
    %270 = arith.mulf %260, %269 : vector<8x16xf32>
    %271 = vector.extract_strided_slice %12 {offsets = [0, 224], sizes = [16, 32], strides = [1, 1]} : vector<16x384xf32> to vector<16x32xf32>
    %cst_91 = arith.constant dense<0.000000e+00> : vector<8x32xf32>
    %272 = tpu.matmul %270, %271, %cst_91 {dimension_numbers = #tpu.dot_dimension_numbers<[1], [0], [0], [1], [0, 0, 1, 1], [], []>} : vector<8x16xf32>, vector<16x32xf32>, vector<8x32xf32> -> vector<8x32xf32>
    %273 = arith.addf %243, %272 : vector<8x32xf32>
    %cst_92 = arith.constant 2.500000e-01 : f32
    %274 = vector.broadcast %cst_92 : f32 to vector<8x32xf32>
    %275 = arith.mulf %273, %274 : vector<8x32xf32>
    %c97 = arith.constant 97 : index
    %c0_93 = arith.constant 0 : index
    %276 = vector.load %arg2[%c97, %c0_93] : memref<136x32xf32, #tpu.memory_space<vmem>>, vector<1x32xf32>
    %277 = vector.broadcast %276 : vector<1x32xf32> to vector<8x32xf32>
    %278 = arith.addf %275, %277 : vector<8x32xf32>
    %c64_94 = arith.constant 64 : index
    %c0_95 = arith.constant 0 : index
    %279 = vector.load %arg1[%c64_94, %c0_95] : memref<160x16xf32, #tpu.memory_space<vmem>>, vector<8x16xf32>
    %c80 = arith.constant 80 : index
    %c0_96 = arith.constant 0 : index
    %280 = vector.load %arg1[%c80, %c0_96] : memref<160x16xf32, #tpu.memory_space<vmem>>, vector<8x16xf32>
    %c72 = arith.constant 72 : index
    %c0_97 = arith.constant 0 : index
    %281 = vector.load %arg2[%c72, %c0_97] : memref<136x32xf32, #tpu.memory_space<vmem>>, vector<4x32xf32>
    %c76 = arith.constant 76 : index
    %c0_98 = arith.constant 0 : index
    %282 = vector.load %arg2[%c76, %c0_98] : memref<136x32xf32, #tpu.memory_space<vmem>>, vector<4x32xf32>
    %cst_99 = arith.constant dense<0.000000e+00> : vector<4x16xf32>
    %283 = tpu.matmul %281, %8, %cst_99 {dimension_numbers = #tpu.dot_dimension_numbers<[1], [1], [0], [0], [0, 0, 1, 0], [], []>} : vector<4x32xf32>, vector<16x32xf32>, vector<4x16xf32> -> vector<4x16xf32>
    %cst_100 = arith.constant dense<0.000000e+00> : vector<8x4xf32>
    %284 = tpu.matmul %10, %282, %cst_100 {dimension_numbers = #tpu.dot_dimension_numbers<[1], [1], [0], [0], [0, 0, 1, 0], [], []>} : vector<8x32xf32>, vector<4x32xf32>, vector<8x4xf32> -> vector<8x4xf32>
    %cst_101 = arith.constant 0.000000e+00 : f32
    %285 = vector.broadcast %cst_101 : f32 to vector<8x32xf32>
    %286 = vector.extract_strided_slice %284 {offsets = [0, 0], sizes = [8, 1], strides = [1, 1]} : vector<8x4xf32> to vector<8x1xf32>
    %287 = vector.extract_strided_slice %283 {offsets = [0, 0], sizes = [1, 16], strides = [1, 1]} : vector<4x16xf32> to vector<1x16xf32>
    %288 = vector.broadcast %286 : vector<8x1xf32> to vector<8x16xf32>
    %289 = vector.broadcast %287 : vector<1x16xf32> to vector<8x16xf32>
    %290 = arith.addf %288, %289 : vector<8x16xf32>
    %cst_102 = arith.constant 0.000000e+00 : f32
    %291 = vector.broadcast %cst_102 : f32 to vector<8x16xf32>
    %292 = arith.cmpf oge, %290, %291 : vector<8x16xf32>
    %cst_103 = arith.constant 2.000000e-01 : f32
    %293 = vector.broadcast %cst_103 : f32 to vector<8x16xf32>
    %294 = arith.mulf %293, %290 : vector<8x16xf32>
    %295 = arith.select %292, %290, %294 : vector<8x16xi1>, vector<8x16xf32>
    %296 = arith.addf %295, %280 : vector<8x16xf32>
    %cst_104 = arith.constant dense<0xFF800000> : vector<8xf32>
    %297 = vector.multi_reduction <maximumf>, %296, %cst_104 [1] : vector<8x16xf32> to vector<8xf32>
    %298 = vector.shape_cast %297 : vector<8xf32> to vector<8x1xf32>
    %299 = vector.broadcast %298 : vector<8x1xf32> to vector<8x16xf32>
    %300 = arith.subf %296, %299 : vector<8x16xf32>
    %301 = math.exp %300 : vector<8x16xf32>
    %302 = arith.mulf %279, %301 : vector<8x16xf32>
    %cst_105 = arith.constant dense<0.000000e+00> : vector<8xf32>
    %303 = vector.multi_reduction <add>, %302, %cst_105 [1] : vector<8x16xf32> to vector<8xf32>
    %304 = vector.shape_cast %303 : vector<8xf32> to vector<8x1xf32>
    %cst_106 = arith.constant 0.000000e+00 : f32
    %305 = vector.broadcast %cst_106 : f32 to vector<8x1xf32>
    %306 = arith.cmpf ogt, %304, %305 : vector<8x1xf32>
    %cst_107 = arith.constant 1.000000e+00 : f32
    %307 = vector.broadcast %cst_107 : f32 to vector<8x1xf32>
    %308 = arith.select %306, %304, %307 : vector<8x1xi1>, vector<8x1xf32>
    %cst_108 = arith.constant 1.000000e+00 : f32
    %309 = vector.broadcast %cst_108 : f32 to vector<8x1xf32>
    %310 = arith.divf %309, %308 : vector<8x1xf32>
    %311 = vector.broadcast %310 : vector<8x1xf32> to vector<8x16xf32>
    %312 = arith.mulf %302, %311 : vector<8x16xf32>
    %313 = vector.extract_strided_slice %12 {offsets = [0, 256], sizes = [16, 32], strides = [1, 1]} : vector<16x384xf32> to vector<16x32xf32>
    %cst_109 = arith.constant dense<0.000000e+00> : vector<8x32xf32>
    %314 = tpu.matmul %312, %313, %cst_109 {dimension_numbers = #tpu.dot_dimension_numbers<[1], [0], [0], [1], [0, 0, 1, 1], [], []>} : vector<8x16xf32>, vector<16x32xf32>, vector<8x32xf32> -> vector<8x32xf32>
    %315 = arith.addf %285, %314 : vector<8x32xf32>
    %316 = vector.extract_strided_slice %284 {offsets = [0, 1], sizes = [8, 1], strides = [1, 1]} : vector<8x4xf32> to vector<8x1xf32>
    %317 = vector.extract_strided_slice %283 {offsets = [1, 0], sizes = [1, 16], strides = [1, 1]} : vector<4x16xf32> to vector<1x16xf32>
    %318 = vector.broadcast %316 : vector<8x1xf32> to vector<8x16xf32>
    %319 = vector.broadcast %317 : vector<1x16xf32> to vector<8x16xf32>
    %320 = arith.addf %318, %319 : vector<8x16xf32>
    %cst_110 = arith.constant 0.000000e+00 : f32
    %321 = vector.broadcast %cst_110 : f32 to vector<8x16xf32>
    %322 = arith.cmpf oge, %320, %321 : vector<8x16xf32>
    %cst_111 = arith.constant 2.000000e-01 : f32
    %323 = vector.broadcast %cst_111 : f32 to vector<8x16xf32>
    %324 = arith.mulf %323, %320 : vector<8x16xf32>
    %325 = arith.select %322, %320, %324 : vector<8x16xi1>, vector<8x16xf32>
    %326 = arith.addf %325, %280 : vector<8x16xf32>
    %cst_112 = arith.constant dense<0xFF800000> : vector<8xf32>
    %327 = vector.multi_reduction <maximumf>, %326, %cst_112 [1] : vector<8x16xf32> to vector<8xf32>
    %328 = vector.shape_cast %327 : vector<8xf32> to vector<8x1xf32>
    %329 = vector.broadcast %328 : vector<8x1xf32> to vector<8x16xf32>
    %330 = arith.subf %326, %329 : vector<8x16xf32>
    %331 = math.exp %330 : vector<8x16xf32>
    %332 = arith.mulf %279, %331 : vector<8x16xf32>
    %cst_113 = arith.constant dense<0.000000e+00> : vector<8xf32>
    %333 = vector.multi_reduction <add>, %332, %cst_113 [1] : vector<8x16xf32> to vector<8xf32>
    %334 = vector.shape_cast %333 : vector<8xf32> to vector<8x1xf32>
    %cst_114 = arith.constant 0.000000e+00 : f32
    %335 = vector.broadcast %cst_114 : f32 to vector<8x1xf32>
    %336 = arith.cmpf ogt, %334, %335 : vector<8x1xf32>
    %cst_115 = arith.constant 1.000000e+00 : f32
    %337 = vector.broadcast %cst_115 : f32 to vector<8x1xf32>
    %338 = arith.select %336, %334, %337 : vector<8x1xi1>, vector<8x1xf32>
    %cst_116 = arith.constant 1.000000e+00 : f32
    %339 = vector.broadcast %cst_116 : f32 to vector<8x1xf32>
    %340 = arith.divf %339, %338 : vector<8x1xf32>
    %341 = vector.broadcast %340 : vector<8x1xf32> to vector<8x16xf32>
    %342 = arith.mulf %332, %341 : vector<8x16xf32>
    %343 = vector.extract_strided_slice %12 {offsets = [0, 288], sizes = [16, 32], strides = [1, 1]} : vector<16x384xf32> to vector<16x32xf32>
    %cst_117 = arith.constant dense<0.000000e+00> : vector<8x32xf32>
    %344 = tpu.matmul %342, %343, %cst_117 {dimension_numbers = #tpu.dot_dimension_numbers<[1], [0], [0], [1], [0, 0, 1, 1], [], []>} : vector<8x16xf32>, vector<16x32xf32>, vector<8x32xf32> -> vector<8x32xf32>
    %345 = arith.addf %315, %344 : vector<8x32xf32>
    %346 = vector.extract_strided_slice %284 {offsets = [0, 2], sizes = [8, 1], strides = [1, 1]} : vector<8x4xf32> to vector<8x1xf32>
    %347 = vector.extract_strided_slice %283 {offsets = [2, 0], sizes = [1, 16], strides = [1, 1]} : vector<4x16xf32> to vector<1x16xf32>
    %348 = vector.broadcast %346 : vector<8x1xf32> to vector<8x16xf32>
    %349 = vector.broadcast %347 : vector<1x16xf32> to vector<8x16xf32>
    %350 = arith.addf %348, %349 : vector<8x16xf32>
    %cst_118 = arith.constant 0.000000e+00 : f32
    %351 = vector.broadcast %cst_118 : f32 to vector<8x16xf32>
    %352 = arith.cmpf oge, %350, %351 : vector<8x16xf32>
    %cst_119 = arith.constant 2.000000e-01 : f32
    %353 = vector.broadcast %cst_119 : f32 to vector<8x16xf32>
    %354 = arith.mulf %353, %350 : vector<8x16xf32>
    %355 = arith.select %352, %350, %354 : vector<8x16xi1>, vector<8x16xf32>
    %356 = arith.addf %355, %280 : vector<8x16xf32>
    %cst_120 = arith.constant dense<0xFF800000> : vector<8xf32>
    %357 = vector.multi_reduction <maximumf>, %356, %cst_120 [1] : vector<8x16xf32> to vector<8xf32>
    %358 = vector.shape_cast %357 : vector<8xf32> to vector<8x1xf32>
    %359 = vector.broadcast %358 : vector<8x1xf32> to vector<8x16xf32>
    %360 = arith.subf %356, %359 : vector<8x16xf32>
    %361 = math.exp %360 : vector<8x16xf32>
    %362 = arith.mulf %279, %361 : vector<8x16xf32>
    %cst_121 = arith.constant dense<0.000000e+00> : vector<8xf32>
    %363 = vector.multi_reduction <add>, %362, %cst_121 [1] : vector<8x16xf32> to vector<8xf32>
    %364 = vector.shape_cast %363 : vector<8xf32> to vector<8x1xf32>
    %cst_122 = arith.constant 0.000000e+00 : f32
    %365 = vector.broadcast %cst_122 : f32 to vector<8x1xf32>
    %366 = arith.cmpf ogt, %364, %365 : vector<8x1xf32>
    %cst_123 = arith.constant 1.000000e+00 : f32
    %367 = vector.broadcast %cst_123 : f32 to vector<8x1xf32>
    %368 = arith.select %366, %364, %367 : vector<8x1xi1>, vector<8x1xf32>
    %cst_124 = arith.constant 1.000000e+00 : f32
    %369 = vector.broadcast %cst_124 : f32 to vector<8x1xf32>
    %370 = arith.divf %369, %368 : vector<8x1xf32>
    %371 = vector.broadcast %370 : vector<8x1xf32> to vector<8x16xf32>
    %372 = arith.mulf %362, %371 : vector<8x16xf32>
    %373 = vector.extract_strided_slice %12 {offsets = [0, 320], sizes = [16, 32], strides = [1, 1]} : vector<16x384xf32> to vector<16x32xf32>
    %cst_125 = arith.constant dense<0.000000e+00> : vector<8x32xf32>
    %374 = tpu.matmul %372, %373, %cst_125 {dimension_numbers = #tpu.dot_dimension_numbers<[1], [0], [0], [1], [0, 0, 1, 1], [], []>} : vector<8x16xf32>, vector<16x32xf32>, vector<8x32xf32> -> vector<8x32xf32>
    %375 = arith.addf %345, %374 : vector<8x32xf32>
    %376 = vector.extract_strided_slice %284 {offsets = [0, 3], sizes = [8, 1], strides = [1, 1]} : vector<8x4xf32> to vector<8x1xf32>
    %377 = vector.extract_strided_slice %283 {offsets = [3, 0], sizes = [1, 16], strides = [1, 1]} : vector<4x16xf32> to vector<1x16xf32>
    %378 = vector.broadcast %376 : vector<8x1xf32> to vector<8x16xf32>
    %379 = vector.broadcast %377 : vector<1x16xf32> to vector<8x16xf32>
    %380 = arith.addf %378, %379 : vector<8x16xf32>
    %cst_126 = arith.constant 0.000000e+00 : f32
    %381 = vector.broadcast %cst_126 : f32 to vector<8x16xf32>
    %382 = arith.cmpf oge, %380, %381 : vector<8x16xf32>
    %cst_127 = arith.constant 2.000000e-01 : f32
    %383 = vector.broadcast %cst_127 : f32 to vector<8x16xf32>
    %384 = arith.mulf %383, %380 : vector<8x16xf32>
    %385 = arith.select %382, %380, %384 : vector<8x16xi1>, vector<8x16xf32>
    %386 = arith.addf %385, %280 : vector<8x16xf32>
    %cst_128 = arith.constant dense<0xFF800000> : vector<8xf32>
    %387 = vector.multi_reduction <maximumf>, %386, %cst_128 [1] : vector<8x16xf32> to vector<8xf32>
    %388 = vector.shape_cast %387 : vector<8xf32> to vector<8x1xf32>
    %389 = vector.broadcast %388 : vector<8x1xf32> to vector<8x16xf32>
    %390 = arith.subf %386, %389 : vector<8x16xf32>
    %391 = math.exp %390 : vector<8x16xf32>
    %392 = arith.mulf %279, %391 : vector<8x16xf32>
    %cst_129 = arith.constant dense<0.000000e+00> : vector<8xf32>
    %393 = vector.multi_reduction <add>, %392, %cst_129 [1] : vector<8x16xf32> to vector<8xf32>
    %394 = vector.shape_cast %393 : vector<8xf32> to vector<8x1xf32>
    %cst_130 = arith.constant 0.000000e+00 : f32
    %395 = vector.broadcast %cst_130 : f32 to vector<8x1xf32>
    %396 = arith.cmpf ogt, %394, %395 : vector<8x1xf32>
    %cst_131 = arith.constant 1.000000e+00 : f32
    %397 = vector.broadcast %cst_131 : f32 to vector<8x1xf32>
    %398 = arith.select %396, %394, %397 : vector<8x1xi1>, vector<8x1xf32>
    %cst_132 = arith.constant 1.000000e+00 : f32
    %399 = vector.broadcast %cst_132 : f32 to vector<8x1xf32>
    %400 = arith.divf %399, %398 : vector<8x1xf32>
    %401 = vector.broadcast %400 : vector<8x1xf32> to vector<8x16xf32>
    %402 = arith.mulf %392, %401 : vector<8x16xf32>
    %403 = vector.extract_strided_slice %12 {offsets = [0, 352], sizes = [16, 32], strides = [1, 1]} : vector<16x384xf32> to vector<16x32xf32>
    %cst_133 = arith.constant dense<0.000000e+00> : vector<8x32xf32>
    %404 = tpu.matmul %402, %403, %cst_133 {dimension_numbers = #tpu.dot_dimension_numbers<[1], [0], [0], [1], [0, 0, 1, 1], [], []>} : vector<8x16xf32>, vector<16x32xf32>, vector<8x32xf32> -> vector<8x32xf32>
    %405 = arith.addf %375, %404 : vector<8x32xf32>
    %cst_134 = arith.constant 2.500000e-01 : f32
    %406 = vector.broadcast %cst_134 : f32 to vector<8x32xf32>
    %407 = arith.mulf %405, %406 : vector<8x32xf32>
    %c98 = arith.constant 98 : index
    %c0_135 = arith.constant 0 : index
    %408 = vector.load %arg2[%c98, %c0_135] : memref<136x32xf32, #tpu.memory_space<vmem>>, vector<1x32xf32>
    %409 = vector.broadcast %408 : vector<1x32xf32> to vector<8x32xf32>
    %410 = arith.addf %407, %409 : vector<8x32xf32>
    %c96_136 = arith.constant 96 : index
    %c0_137 = arith.constant 0 : index
    %411 = vector.load %arg1[%c96_136, %c0_137] : memref<160x16xf32, #tpu.memory_space<vmem>>, vector<16x8xf32>
    %c112 = arith.constant 112 : index
    %c0_138 = arith.constant 0 : index
    %412 = vector.load %arg1[%c112, %c0_138] : memref<160x16xf32, #tpu.memory_space<vmem>>, vector<16x8xf32>
    %c80_139 = arith.constant 80 : index
    %c0_140 = arith.constant 0 : index
    %413 = vector.load %arg2[%c80_139, %c0_140] : memref<136x32xf32, #tpu.memory_space<vmem>>, vector<4x32xf32>
    %c84 = arith.constant 84 : index
    %c0_141 = arith.constant 0 : index
    %414 = vector.load %arg2[%c84, %c0_141] : memref<136x32xf32, #tpu.memory_space<vmem>>, vector<4x32xf32>
    %cst_142 = arith.constant dense<0.000000e+00> : vector<4x8xf32>
    %415 = tpu.matmul %413, %7, %cst_142 {dimension_numbers = #tpu.dot_dimension_numbers<[1], [1], [0], [0], [0, 0, 1, 0], [], []>} : vector<4x32xf32>, vector<8x32xf32>, vector<4x8xf32> -> vector<4x8xf32>
    %cst_143 = arith.constant dense<0.000000e+00> : vector<16x4xf32>
    %416 = tpu.matmul %8, %414, %cst_143 {dimension_numbers = #tpu.dot_dimension_numbers<[1], [1], [0], [0], [0, 0, 1, 0], [], []>} : vector<16x32xf32>, vector<4x32xf32>, vector<16x4xf32> -> vector<16x4xf32>
    %cst_144 = arith.constant 0.000000e+00 : f32
    %417 = vector.broadcast %cst_144 : f32 to vector<16x32xf32>
    %418 = vector.extract_strided_slice %416 {offsets = [0, 0], sizes = [16, 1], strides = [1, 1]} : vector<16x4xf32> to vector<16x1xf32>
    %419 = vector.extract_strided_slice %415 {offsets = [0, 0], sizes = [1, 8], strides = [1, 1]} : vector<4x8xf32> to vector<1x8xf32>
    %420 = vector.broadcast %418 : vector<16x1xf32> to vector<16x8xf32>
    %421 = vector.broadcast %419 : vector<1x8xf32> to vector<16x8xf32>
    %422 = arith.addf %420, %421 : vector<16x8xf32>
    %cst_145 = arith.constant 0.000000e+00 : f32
    %423 = vector.broadcast %cst_145 : f32 to vector<16x8xf32>
    %424 = arith.cmpf oge, %422, %423 : vector<16x8xf32>
    %cst_146 = arith.constant 2.000000e-01 : f32
    %425 = vector.broadcast %cst_146 : f32 to vector<16x8xf32>
    %426 = arith.mulf %425, %422 : vector<16x8xf32>
    %427 = arith.select %424, %422, %426 : vector<16x8xi1>, vector<16x8xf32>
    %428 = arith.addf %427, %412 : vector<16x8xf32>
    %cst_147 = arith.constant dense<0xFF800000> : vector<16xf32>
    %429 = vector.multi_reduction <maximumf>, %428, %cst_147 [1] : vector<16x8xf32> to vector<16xf32>
    %430 = vector.shape_cast %429 : vector<16xf32> to vector<16x1xf32>
    %431 = vector.broadcast %430 : vector<16x1xf32> to vector<16x8xf32>
    %432 = arith.subf %428, %431 : vector<16x8xf32>
    %433 = math.exp %432 : vector<16x8xf32>
    %434 = arith.mulf %411, %433 : vector<16x8xf32>
    %cst_148 = arith.constant dense<0.000000e+00> : vector<16xf32>
    %435 = vector.multi_reduction <add>, %434, %cst_148 [1] : vector<16x8xf32> to vector<16xf32>
    %436 = vector.shape_cast %435 : vector<16xf32> to vector<16x1xf32>
    %cst_149 = arith.constant 0.000000e+00 : f32
    %437 = vector.broadcast %cst_149 : f32 to vector<16x1xf32>
    %438 = arith.cmpf ogt, %436, %437 : vector<16x1xf32>
    %cst_150 = arith.constant 1.000000e+00 : f32
    %439 = vector.broadcast %cst_150 : f32 to vector<16x1xf32>
    %440 = arith.select %438, %436, %439 : vector<16x1xi1>, vector<16x1xf32>
    %cst_151 = arith.constant 1.000000e+00 : f32
    %441 = vector.broadcast %cst_151 : f32 to vector<16x1xf32>
    %442 = arith.divf %441, %440 : vector<16x1xf32>
    %443 = vector.broadcast %442 : vector<16x1xf32> to vector<16x8xf32>
    %444 = arith.mulf %434, %443 : vector<16x8xf32>
    %445 = vector.extract_strided_slice %14 {offsets = [0, 0], sizes = [8, 32], strides = [1, 1]} : vector<8x256xf32> to vector<8x32xf32>
    %cst_152 = arith.constant dense<0.000000e+00> : vector<16x32xf32>
    %446 = tpu.matmul %444, %445, %cst_152 {dimension_numbers = #tpu.dot_dimension_numbers<[1], [0], [0], [1], [0, 0, 1, 1], [], []>} : vector<16x8xf32>, vector<8x32xf32>, vector<16x32xf32> -> vector<16x32xf32>
    %447 = arith.addf %417, %446 : vector<16x32xf32>
    %448 = vector.extract_strided_slice %416 {offsets = [0, 1], sizes = [16, 1], strides = [1, 1]} : vector<16x4xf32> to vector<16x1xf32>
    %449 = vector.extract_strided_slice %415 {offsets = [1, 0], sizes = [1, 8], strides = [1, 1]} : vector<4x8xf32> to vector<1x8xf32>
    %450 = vector.broadcast %448 : vector<16x1xf32> to vector<16x8xf32>
    %451 = vector.broadcast %449 : vector<1x8xf32> to vector<16x8xf32>
    %452 = arith.addf %450, %451 : vector<16x8xf32>
    %cst_153 = arith.constant 0.000000e+00 : f32
    %453 = vector.broadcast %cst_153 : f32 to vector<16x8xf32>
    %454 = arith.cmpf oge, %452, %453 : vector<16x8xf32>
    %cst_154 = arith.constant 2.000000e-01 : f32
    %455 = vector.broadcast %cst_154 : f32 to vector<16x8xf32>
    %456 = arith.mulf %455, %452 : vector<16x8xf32>
    %457 = arith.select %454, %452, %456 : vector<16x8xi1>, vector<16x8xf32>
    %458 = arith.addf %457, %412 : vector<16x8xf32>
    %cst_155 = arith.constant dense<0xFF800000> : vector<16xf32>
    %459 = vector.multi_reduction <maximumf>, %458, %cst_155 [1] : vector<16x8xf32> to vector<16xf32>
    %460 = vector.shape_cast %459 : vector<16xf32> to vector<16x1xf32>
    %461 = vector.broadcast %460 : vector<16x1xf32> to vector<16x8xf32>
    %462 = arith.subf %458, %461 : vector<16x8xf32>
    %463 = math.exp %462 : vector<16x8xf32>
    %464 = arith.mulf %411, %463 : vector<16x8xf32>
    %cst_156 = arith.constant dense<0.000000e+00> : vector<16xf32>
    %465 = vector.multi_reduction <add>, %464, %cst_156 [1] : vector<16x8xf32> to vector<16xf32>
    %466 = vector.shape_cast %465 : vector<16xf32> to vector<16x1xf32>
    %cst_157 = arith.constant 0.000000e+00 : f32
    %467 = vector.broadcast %cst_157 : f32 to vector<16x1xf32>
    %468 = arith.cmpf ogt, %466, %467 : vector<16x1xf32>
    %cst_158 = arith.constant 1.000000e+00 : f32
    %469 = vector.broadcast %cst_158 : f32 to vector<16x1xf32>
    %470 = arith.select %468, %466, %469 : vector<16x1xi1>, vector<16x1xf32>
    %cst_159 = arith.constant 1.000000e+00 : f32
    %471 = vector.broadcast %cst_159 : f32 to vector<16x1xf32>
    %472 = arith.divf %471, %470 : vector<16x1xf32>
    %473 = vector.broadcast %472 : vector<16x1xf32> to vector<16x8xf32>
    %474 = arith.mulf %464, %473 : vector<16x8xf32>
    %475 = vector.extract_strided_slice %14 {offsets = [0, 32], sizes = [8, 32], strides = [1, 1]} : vector<8x256xf32> to vector<8x32xf32>
    %cst_160 = arith.constant dense<0.000000e+00> : vector<16x32xf32>
    %476 = tpu.matmul %474, %475, %cst_160 {dimension_numbers = #tpu.dot_dimension_numbers<[1], [0], [0], [1], [0, 0, 1, 1], [], []>} : vector<16x8xf32>, vector<8x32xf32>, vector<16x32xf32> -> vector<16x32xf32>
    %477 = arith.addf %447, %476 : vector<16x32xf32>
    %478 = vector.extract_strided_slice %416 {offsets = [0, 2], sizes = [16, 1], strides = [1, 1]} : vector<16x4xf32> to vector<16x1xf32>
    %479 = vector.extract_strided_slice %415 {offsets = [2, 0], sizes = [1, 8], strides = [1, 1]} : vector<4x8xf32> to vector<1x8xf32>
    %480 = vector.broadcast %478 : vector<16x1xf32> to vector<16x8xf32>
    %481 = vector.broadcast %479 : vector<1x8xf32> to vector<16x8xf32>
    %482 = arith.addf %480, %481 : vector<16x8xf32>
    %cst_161 = arith.constant 0.000000e+00 : f32
    %483 = vector.broadcast %cst_161 : f32 to vector<16x8xf32>
    %484 = arith.cmpf oge, %482, %483 : vector<16x8xf32>
    %cst_162 = arith.constant 2.000000e-01 : f32
    %485 = vector.broadcast %cst_162 : f32 to vector<16x8xf32>
    %486 = arith.mulf %485, %482 : vector<16x8xf32>
    %487 = arith.select %484, %482, %486 : vector<16x8xi1>, vector<16x8xf32>
    %488 = arith.addf %487, %412 : vector<16x8xf32>
    %cst_163 = arith.constant dense<0xFF800000> : vector<16xf32>
    %489 = vector.multi_reduction <maximumf>, %488, %cst_163 [1] : vector<16x8xf32> to vector<16xf32>
    %490 = vector.shape_cast %489 : vector<16xf32> to vector<16x1xf32>
    %491 = vector.broadcast %490 : vector<16x1xf32> to vector<16x8xf32>
    %492 = arith.subf %488, %491 : vector<16x8xf32>
    %493 = math.exp %492 : vector<16x8xf32>
    %494 = arith.mulf %411, %493 : vector<16x8xf32>
    %cst_164 = arith.constant dense<0.000000e+00> : vector<16xf32>
    %495 = vector.multi_reduction <add>, %494, %cst_164 [1] : vector<16x8xf32> to vector<16xf32>
    %496 = vector.shape_cast %495 : vector<16xf32> to vector<16x1xf32>
    %cst_165 = arith.constant 0.000000e+00 : f32
    %497 = vector.broadcast %cst_165 : f32 to vector<16x1xf32>
    %498 = arith.cmpf ogt, %496, %497 : vector<16x1xf32>
    %cst_166 = arith.constant 1.000000e+00 : f32
    %499 = vector.broadcast %cst_166 : f32 to vector<16x1xf32>
    %500 = arith.select %498, %496, %499 : vector<16x1xi1>, vector<16x1xf32>
    %cst_167 = arith.constant 1.000000e+00 : f32
    %501 = vector.broadcast %cst_167 : f32 to vector<16x1xf32>
    %502 = arith.divf %501, %500 : vector<16x1xf32>
    %503 = vector.broadcast %502 : vector<16x1xf32> to vector<16x8xf32>
    %504 = arith.mulf %494, %503 : vector<16x8xf32>
    %505 = vector.extract_strided_slice %14 {offsets = [0, 64], sizes = [8, 32], strides = [1, 1]} : vector<8x256xf32> to vector<8x32xf32>
    %cst_168 = arith.constant dense<0.000000e+00> : vector<16x32xf32>
    %506 = tpu.matmul %504, %505, %cst_168 {dimension_numbers = #tpu.dot_dimension_numbers<[1], [0], [0], [1], [0, 0, 1, 1], [], []>} : vector<16x8xf32>, vector<8x32xf32>, vector<16x32xf32> -> vector<16x32xf32>
    %507 = arith.addf %477, %506 : vector<16x32xf32>
    %508 = vector.extract_strided_slice %416 {offsets = [0, 3], sizes = [16, 1], strides = [1, 1]} : vector<16x4xf32> to vector<16x1xf32>
    %509 = vector.extract_strided_slice %415 {offsets = [3, 0], sizes = [1, 8], strides = [1, 1]} : vector<4x8xf32> to vector<1x8xf32>
    %510 = vector.broadcast %508 : vector<16x1xf32> to vector<16x8xf32>
    %511 = vector.broadcast %509 : vector<1x8xf32> to vector<16x8xf32>
    %512 = arith.addf %510, %511 : vector<16x8xf32>
    %cst_169 = arith.constant 0.000000e+00 : f32
    %513 = vector.broadcast %cst_169 : f32 to vector<16x8xf32>
    %514 = arith.cmpf oge, %512, %513 : vector<16x8xf32>
    %cst_170 = arith.constant 2.000000e-01 : f32
    %515 = vector.broadcast %cst_170 : f32 to vector<16x8xf32>
    %516 = arith.mulf %515, %512 : vector<16x8xf32>
    %517 = arith.select %514, %512, %516 : vector<16x8xi1>, vector<16x8xf32>
    %518 = arith.addf %517, %412 : vector<16x8xf32>
    %cst_171 = arith.constant dense<0xFF800000> : vector<16xf32>
    %519 = vector.multi_reduction <maximumf>, %518, %cst_171 [1] : vector<16x8xf32> to vector<16xf32>
    %520 = vector.shape_cast %519 : vector<16xf32> to vector<16x1xf32>
    %521 = vector.broadcast %520 : vector<16x1xf32> to vector<16x8xf32>
    %522 = arith.subf %518, %521 : vector<16x8xf32>
    %523 = math.exp %522 : vector<16x8xf32>
    %524 = arith.mulf %411, %523 : vector<16x8xf32>
    %cst_172 = arith.constant dense<0.000000e+00> : vector<16xf32>
    %525 = vector.multi_reduction <add>, %524, %cst_172 [1] : vector<16x8xf32> to vector<16xf32>
    %526 = vector.shape_cast %525 : vector<16xf32> to vector<16x1xf32>
    %cst_173 = arith.constant 0.000000e+00 : f32
    %527 = vector.broadcast %cst_173 : f32 to vector<16x1xf32>
    %528 = arith.cmpf ogt, %526, %527 : vector<16x1xf32>
    %cst_174 = arith.constant 1.000000e+00 : f32
    %529 = vector.broadcast %cst_174 : f32 to vector<16x1xf32>
    %530 = arith.select %528, %526, %529 : vector<16x1xi1>, vector<16x1xf32>
    %cst_175 = arith.constant 1.000000e+00 : f32
    %531 = vector.broadcast %cst_175 : f32 to vector<16x1xf32>
    %532 = arith.divf %531, %530 : vector<16x1xf32>
    %533 = vector.broadcast %532 : vector<16x1xf32> to vector<16x8xf32>
    %534 = arith.mulf %524, %533 : vector<16x8xf32>
    %535 = vector.extract_strided_slice %14 {offsets = [0, 96], sizes = [8, 32], strides = [1, 1]} : vector<8x256xf32> to vector<8x32xf32>
    %cst_176 = arith.constant dense<0.000000e+00> : vector<16x32xf32>
    %536 = tpu.matmul %534, %535, %cst_176 {dimension_numbers = #tpu.dot_dimension_numbers<[1], [0], [0], [1], [0, 0, 1, 1], [], []>} : vector<16x8xf32>, vector<8x32xf32>, vector<16x32xf32> -> vector<16x32xf32>
    %537 = arith.addf %507, %536 : vector<16x32xf32>
    %cst_177 = arith.constant 2.500000e-01 : f32
    %538 = vector.broadcast %cst_177 : f32 to vector<16x32xf32>
    %539 = arith.mulf %537, %538 : vector<16x32xf32>
    %c99 = arith.constant 99 : index
    %c0_178 = arith.constant 0 : index
    %540 = vector.load %arg2[%c99, %c0_178] : memref<136x32xf32, #tpu.memory_space<vmem>>, vector<1x32xf32>
    %541 = vector.broadcast %540 : vector<1x32xf32> to vector<16x32xf32>
    %542 = arith.addf %539, %541 : vector<16x32xf32>
    %c128 = arith.constant 128 : index
    %c0_179 = arith.constant 0 : index
    %543 = vector.load %arg1[%c128, %c0_179] : memref<160x16xf32, #tpu.memory_space<vmem>>, vector<16x8xf32>
    %c144 = arith.constant 144 : index
    %c0_180 = arith.constant 0 : index
    %544 = vector.load %arg1[%c144, %c0_180] : memref<160x16xf32, #tpu.memory_space<vmem>>, vector<16x8xf32>
    %c88 = arith.constant 88 : index
    %c0_181 = arith.constant 0 : index
    %545 = vector.load %arg2[%c88, %c0_181] : memref<136x32xf32, #tpu.memory_space<vmem>>, vector<4x32xf32>
    %c92 = arith.constant 92 : index
    %c0_182 = arith.constant 0 : index
    %546 = vector.load %arg2[%c92, %c0_182] : memref<136x32xf32, #tpu.memory_space<vmem>>, vector<4x32xf32>
    %cst_183 = arith.constant dense<0.000000e+00> : vector<4x8xf32>
    %547 = tpu.matmul %545, %7, %cst_183 {dimension_numbers = #tpu.dot_dimension_numbers<[1], [1], [0], [0], [0, 0, 1, 0], [], []>} : vector<4x32xf32>, vector<8x32xf32>, vector<4x8xf32> -> vector<4x8xf32>
    %cst_184 = arith.constant dense<0.000000e+00> : vector<16x4xf32>
    %548 = tpu.matmul %8, %546, %cst_184 {dimension_numbers = #tpu.dot_dimension_numbers<[1], [1], [0], [0], [0, 0, 1, 0], [], []>} : vector<16x32xf32>, vector<4x32xf32>, vector<16x4xf32> -> vector<16x4xf32>
    %cst_185 = arith.constant 0.000000e+00 : f32
    %549 = vector.broadcast %cst_185 : f32 to vector<16x32xf32>
    %550 = vector.extract_strided_slice %548 {offsets = [0, 0], sizes = [16, 1], strides = [1, 1]} : vector<16x4xf32> to vector<16x1xf32>
    %551 = vector.extract_strided_slice %547 {offsets = [0, 0], sizes = [1, 8], strides = [1, 1]} : vector<4x8xf32> to vector<1x8xf32>
    %552 = vector.broadcast %550 : vector<16x1xf32> to vector<16x8xf32>
    %553 = vector.broadcast %551 : vector<1x8xf32> to vector<16x8xf32>
    %554 = arith.addf %552, %553 : vector<16x8xf32>
    %cst_186 = arith.constant 0.000000e+00 : f32
    %555 = vector.broadcast %cst_186 : f32 to vector<16x8xf32>
    %556 = arith.cmpf oge, %554, %555 : vector<16x8xf32>
    %cst_187 = arith.constant 2.000000e-01 : f32
    %557 = vector.broadcast %cst_187 : f32 to vector<16x8xf32>
    %558 = arith.mulf %557, %554 : vector<16x8xf32>
    %559 = arith.select %556, %554, %558 : vector<16x8xi1>, vector<16x8xf32>
    %560 = arith.addf %559, %544 : vector<16x8xf32>
    %cst_188 = arith.constant dense<0xFF800000> : vector<16xf32>
    %561 = vector.multi_reduction <maximumf>, %560, %cst_188 [1] : vector<16x8xf32> to vector<16xf32>
    %562 = vector.shape_cast %561 : vector<16xf32> to vector<16x1xf32>
    %563 = vector.broadcast %562 : vector<16x1xf32> to vector<16x8xf32>
    %564 = arith.subf %560, %563 : vector<16x8xf32>
    %565 = math.exp %564 : vector<16x8xf32>
    %566 = arith.mulf %543, %565 : vector<16x8xf32>
    %cst_189 = arith.constant dense<0.000000e+00> : vector<16xf32>
    %567 = vector.multi_reduction <add>, %566, %cst_189 [1] : vector<16x8xf32> to vector<16xf32>
    %568 = vector.shape_cast %567 : vector<16xf32> to vector<16x1xf32>
    %cst_190 = arith.constant 0.000000e+00 : f32
    %569 = vector.broadcast %cst_190 : f32 to vector<16x1xf32>
    %570 = arith.cmpf ogt, %568, %569 : vector<16x1xf32>
    %cst_191 = arith.constant 1.000000e+00 : f32
    %571 = vector.broadcast %cst_191 : f32 to vector<16x1xf32>
    %572 = arith.select %570, %568, %571 : vector<16x1xi1>, vector<16x1xf32>
    %cst_192 = arith.constant 1.000000e+00 : f32
    %573 = vector.broadcast %cst_192 : f32 to vector<16x1xf32>
    %574 = arith.divf %573, %572 : vector<16x1xf32>
    %575 = vector.broadcast %574 : vector<16x1xf32> to vector<16x8xf32>
    %576 = arith.mulf %566, %575 : vector<16x8xf32>
    %577 = vector.extract_strided_slice %14 {offsets = [0, 128], sizes = [8, 32], strides = [1, 1]} : vector<8x256xf32> to vector<8x32xf32>
    %cst_193 = arith.constant dense<0.000000e+00> : vector<16x32xf32>
    %578 = tpu.matmul %576, %577, %cst_193 {dimension_numbers = #tpu.dot_dimension_numbers<[1], [0], [0], [1], [0, 0, 1, 1], [], []>} : vector<16x8xf32>, vector<8x32xf32>, vector<16x32xf32> -> vector<16x32xf32>
    %579 = arith.addf %549, %578 : vector<16x32xf32>
    %580 = vector.extract_strided_slice %548 {offsets = [0, 1], sizes = [16, 1], strides = [1, 1]} : vector<16x4xf32> to vector<16x1xf32>
    %581 = vector.extract_strided_slice %547 {offsets = [1, 0], sizes = [1, 8], strides = [1, 1]} : vector<4x8xf32> to vector<1x8xf32>
    %582 = vector.broadcast %580 : vector<16x1xf32> to vector<16x8xf32>
    %583 = vector.broadcast %581 : vector<1x8xf32> to vector<16x8xf32>
    %584 = arith.addf %582, %583 : vector<16x8xf32>
    %cst_194 = arith.constant 0.000000e+00 : f32
    %585 = vector.broadcast %cst_194 : f32 to vector<16x8xf32>
    %586 = arith.cmpf oge, %584, %585 : vector<16x8xf32>
    %cst_195 = arith.constant 2.000000e-01 : f32
    %587 = vector.broadcast %cst_195 : f32 to vector<16x8xf32>
    %588 = arith.mulf %587, %584 : vector<16x8xf32>
    %589 = arith.select %586, %584, %588 : vector<16x8xi1>, vector<16x8xf32>
    %590 = arith.addf %589, %544 : vector<16x8xf32>
    %cst_196 = arith.constant dense<0xFF800000> : vector<16xf32>
    %591 = vector.multi_reduction <maximumf>, %590, %cst_196 [1] : vector<16x8xf32> to vector<16xf32>
    %592 = vector.shape_cast %591 : vector<16xf32> to vector<16x1xf32>
    %593 = vector.broadcast %592 : vector<16x1xf32> to vector<16x8xf32>
    %594 = arith.subf %590, %593 : vector<16x8xf32>
    %595 = math.exp %594 : vector<16x8xf32>
    %596 = arith.mulf %543, %595 : vector<16x8xf32>
    %cst_197 = arith.constant dense<0.000000e+00> : vector<16xf32>
    %597 = vector.multi_reduction <add>, %596, %cst_197 [1] : vector<16x8xf32> to vector<16xf32>
    %598 = vector.shape_cast %597 : vector<16xf32> to vector<16x1xf32>
    %cst_198 = arith.constant 0.000000e+00 : f32
    %599 = vector.broadcast %cst_198 : f32 to vector<16x1xf32>
    %600 = arith.cmpf ogt, %598, %599 : vector<16x1xf32>
    %cst_199 = arith.constant 1.000000e+00 : f32
    %601 = vector.broadcast %cst_199 : f32 to vector<16x1xf32>
    %602 = arith.select %600, %598, %601 : vector<16x1xi1>, vector<16x1xf32>
    %cst_200 = arith.constant 1.000000e+00 : f32
    %603 = vector.broadcast %cst_200 : f32 to vector<16x1xf32>
    %604 = arith.divf %603, %602 : vector<16x1xf32>
    %605 = vector.broadcast %604 : vector<16x1xf32> to vector<16x8xf32>
    %606 = arith.mulf %596, %605 : vector<16x8xf32>
    %607 = vector.extract_strided_slice %14 {offsets = [0, 160], sizes = [8, 32], strides = [1, 1]} : vector<8x256xf32> to vector<8x32xf32>
    %cst_201 = arith.constant dense<0.000000e+00> : vector<16x32xf32>
    %608 = tpu.matmul %606, %607, %cst_201 {dimension_numbers = #tpu.dot_dimension_numbers<[1], [0], [0], [1], [0, 0, 1, 1], [], []>} : vector<16x8xf32>, vector<8x32xf32>, vector<16x32xf32> -> vector<16x32xf32>
    %609 = arith.addf %579, %608 : vector<16x32xf32>
    %610 = vector.extract_strided_slice %548 {offsets = [0, 2], sizes = [16, 1], strides = [1, 1]} : vector<16x4xf32> to vector<16x1xf32>
    %611 = vector.extract_strided_slice %547 {offsets = [2, 0], sizes = [1, 8], strides = [1, 1]} : vector<4x8xf32> to vector<1x8xf32>
    %612 = vector.broadcast %610 : vector<16x1xf32> to vector<16x8xf32>
    %613 = vector.broadcast %611 : vector<1x8xf32> to vector<16x8xf32>
    %614 = arith.addf %612, %613 : vector<16x8xf32>
    %cst_202 = arith.constant 0.000000e+00 : f32
    %615 = vector.broadcast %cst_202 : f32 to vector<16x8xf32>
    %616 = arith.cmpf oge, %614, %615 : vector<16x8xf32>
    %cst_203 = arith.constant 2.000000e-01 : f32
    %617 = vector.broadcast %cst_203 : f32 to vector<16x8xf32>
    %618 = arith.mulf %617, %614 : vector<16x8xf32>
    %619 = arith.select %616, %614, %618 : vector<16x8xi1>, vector<16x8xf32>
    %620 = arith.addf %619, %544 : vector<16x8xf32>
    %cst_204 = arith.constant dense<0xFF800000> : vector<16xf32>
    %621 = vector.multi_reduction <maximumf>, %620, %cst_204 [1] : vector<16x8xf32> to vector<16xf32>
    %622 = vector.shape_cast %621 : vector<16xf32> to vector<16x1xf32>
    %623 = vector.broadcast %622 : vector<16x1xf32> to vector<16x8xf32>
    %624 = arith.subf %620, %623 : vector<16x8xf32>
    %625 = math.exp %624 : vector<16x8xf32>
    %626 = arith.mulf %543, %625 : vector<16x8xf32>
    %cst_205 = arith.constant dense<0.000000e+00> : vector<16xf32>
    %627 = vector.multi_reduction <add>, %626, %cst_205 [1] : vector<16x8xf32> to vector<16xf32>
    %628 = vector.shape_cast %627 : vector<16xf32> to vector<16x1xf32>
    %cst_206 = arith.constant 0.000000e+00 : f32
    %629 = vector.broadcast %cst_206 : f32 to vector<16x1xf32>
    %630 = arith.cmpf ogt, %628, %629 : vector<16x1xf32>
    %cst_207 = arith.constant 1.000000e+00 : f32
    %631 = vector.broadcast %cst_207 : f32 to vector<16x1xf32>
    %632 = arith.select %630, %628, %631 : vector<16x1xi1>, vector<16x1xf32>
    %cst_208 = arith.constant 1.000000e+00 : f32
    %633 = vector.broadcast %cst_208 : f32 to vector<16x1xf32>
    %634 = arith.divf %633, %632 : vector<16x1xf32>
    %635 = vector.broadcast %634 : vector<16x1xf32> to vector<16x8xf32>
    %636 = arith.mulf %626, %635 : vector<16x8xf32>
    %637 = vector.extract_strided_slice %14 {offsets = [0, 192], sizes = [8, 32], strides = [1, 1]} : vector<8x256xf32> to vector<8x32xf32>
    %cst_209 = arith.constant dense<0.000000e+00> : vector<16x32xf32>
    %638 = tpu.matmul %636, %637, %cst_209 {dimension_numbers = #tpu.dot_dimension_numbers<[1], [0], [0], [1], [0, 0, 1, 1], [], []>} : vector<16x8xf32>, vector<8x32xf32>, vector<16x32xf32> -> vector<16x32xf32>
    %639 = arith.addf %609, %638 : vector<16x32xf32>
    %640 = vector.extract_strided_slice %548 {offsets = [0, 3], sizes = [16, 1], strides = [1, 1]} : vector<16x4xf32> to vector<16x1xf32>
    %641 = vector.extract_strided_slice %547 {offsets = [3, 0], sizes = [1, 8], strides = [1, 1]} : vector<4x8xf32> to vector<1x8xf32>
    %642 = vector.broadcast %640 : vector<16x1xf32> to vector<16x8xf32>
    %643 = vector.broadcast %641 : vector<1x8xf32> to vector<16x8xf32>
    %644 = arith.addf %642, %643 : vector<16x8xf32>
    %cst_210 = arith.constant 0.000000e+00 : f32
    %645 = vector.broadcast %cst_210 : f32 to vector<16x8xf32>
    %646 = arith.cmpf oge, %644, %645 : vector<16x8xf32>
    %cst_211 = arith.constant 2.000000e-01 : f32
    %647 = vector.broadcast %cst_211 : f32 to vector<16x8xf32>
    %648 = arith.mulf %647, %644 : vector<16x8xf32>
    %649 = arith.select %646, %644, %648 : vector<16x8xi1>, vector<16x8xf32>
    %650 = arith.addf %649, %544 : vector<16x8xf32>
    %cst_212 = arith.constant dense<0xFF800000> : vector<16xf32>
    %651 = vector.multi_reduction <maximumf>, %650, %cst_212 [1] : vector<16x8xf32> to vector<16xf32>
    %652 = vector.shape_cast %651 : vector<16xf32> to vector<16x1xf32>
    %653 = vector.broadcast %652 : vector<16x1xf32> to vector<16x8xf32>
    %654 = arith.subf %650, %653 : vector<16x8xf32>
    %655 = math.exp %654 : vector<16x8xf32>
    %656 = arith.mulf %543, %655 : vector<16x8xf32>
    %cst_213 = arith.constant dense<0.000000e+00> : vector<16xf32>
    %657 = vector.multi_reduction <add>, %656, %cst_213 [1] : vector<16x8xf32> to vector<16xf32>
    %658 = vector.shape_cast %657 : vector<16xf32> to vector<16x1xf32>
    %cst_214 = arith.constant 0.000000e+00 : f32
    %659 = vector.broadcast %cst_214 : f32 to vector<16x1xf32>
    %660 = arith.cmpf ogt, %658, %659 : vector<16x1xf32>
    %cst_215 = arith.constant 1.000000e+00 : f32
    %661 = vector.broadcast %cst_215 : f32 to vector<16x1xf32>
    %662 = arith.select %660, %658, %661 : vector<16x1xi1>, vector<16x1xf32>
    %cst_216 = arith.constant 1.000000e+00 : f32
    %663 = vector.broadcast %cst_216 : f32 to vector<16x1xf32>
    %664 = arith.divf %663, %662 : vector<16x1xf32>
    %665 = vector.broadcast %664 : vector<16x1xf32> to vector<16x8xf32>
    %666 = arith.mulf %656, %665 : vector<16x8xf32>
    %667 = vector.extract_strided_slice %14 {offsets = [0, 224], sizes = [8, 32], strides = [1, 1]} : vector<8x256xf32> to vector<8x32xf32>
    %cst_217 = arith.constant dense<0.000000e+00> : vector<16x32xf32>
    %668 = tpu.matmul %666, %667, %cst_217 {dimension_numbers = #tpu.dot_dimension_numbers<[1], [0], [0], [1], [0, 0, 1, 1], [], []>} : vector<16x8xf32>, vector<8x32xf32>, vector<16x32xf32> -> vector<16x32xf32>
    %669 = arith.addf %639, %668 : vector<16x32xf32>
    %cst_218 = arith.constant 2.500000e-01 : f32
    %670 = vector.broadcast %cst_218 : f32 to vector<16x32xf32>
    %671 = arith.mulf %669, %670 : vector<16x32xf32>
    %c100 = arith.constant 100 : index
    %c0_219 = arith.constant 0 : index
    %672 = vector.load %arg2[%c100, %c0_219] : memref<136x32xf32, #tpu.memory_space<vmem>>, vector<1x32xf32>
    %673 = vector.broadcast %672 : vector<1x32xf32> to vector<16x32xf32>
    %674 = arith.addf %671, %673 : vector<16x32xf32>
    %675 = arith.addf %146, %542 : vector<16x32xf32>
    %676 = arith.addf %675, %674 : vector<16x32xf32>
    %cst_220 = arith.constant 0.333333343 : f32
    %677 = vector.broadcast %cst_220 : f32 to vector<16x32xf32>
    %678 = arith.mulf %676, %677 : vector<16x32xf32>
    %cst_221 = arith.constant 0.000000e+00 : f32
    %679 = vector.broadcast %cst_221 : f32 to vector<16x32xf32>
    %680 = arith.maximumf %678, %679 : vector<16x32xf32>
    %cst_222 = arith.constant 1.000000e+00 : f32
    %681 = vector.broadcast %cst_222 : f32 to vector<8x32xf32>
    %682 = arith.mulf %278, %681 : vector<8x32xf32>
    %cst_223 = arith.constant 0.000000e+00 : f32
    %683 = vector.broadcast %cst_223 : f32 to vector<8x32xf32>
    %684 = arith.maximumf %682, %683 : vector<8x32xf32>
    %cst_224 = arith.constant 1.000000e+00 : f32
    %685 = vector.broadcast %cst_224 : f32 to vector<8x32xf32>
    %686 = arith.mulf %410, %685 : vector<8x32xf32>
    %cst_225 = arith.constant 0.000000e+00 : f32
    %687 = vector.broadcast %cst_225 : f32 to vector<8x32xf32>
    %688 = arith.maximumf %686, %687 : vector<8x32xf32>
    %c0_226 = arith.constant 0 : index
    %c640 = arith.constant 640 : index
    %689 = vector.load %arg3[%c0_226, %c640] : memref<32x864xf32, #tpu.memory_space<vmem>>, vector<32x48xf32>
    %cst_227 = arith.constant dense<0.000000e+00> : vector<16x48xf32>
    %690 = tpu.matmul %680, %689, %cst_227 {dimension_numbers = #tpu.dot_dimension_numbers<[1], [0], [0], [1], [0, 0, 1, 1], [], []>} : vector<16x32xf32>, vector<32x48xf32>, vector<16x48xf32> -> vector<16x48xf32>
    %c0_228 = arith.constant 0 : index
    %c768 = arith.constant 768 : index
    %691 = vector.load %arg3[%c0_228, %c768] : memref<32x864xf32, #tpu.memory_space<vmem>>, vector<32x32xf32>
    %cst_229 = arith.constant dense<0.000000e+00> : vector<8x32xf32>
    %692 = tpu.matmul %7, %691, %cst_229 {dimension_numbers = #tpu.dot_dimension_numbers<[1], [0], [0], [1], [0, 0, 1, 1], [], []>} : vector<8x32xf32>, vector<32x32xf32>, vector<8x32xf32> -> vector<8x32xf32>
    %c0_230 = arith.constant 0 : index
    %c0_231 = arith.constant 0 : index
    %693 = vector.load %arg1[%c0_230, %c0_231] : memref<160x16xf32, #tpu.memory_space<vmem>>, vector<16x16xf32>
    %c16_232 = arith.constant 16 : index
    %c0_233 = arith.constant 0 : index
    %694 = vector.load %arg1[%c16_232, %c0_233] : memref<160x16xf32, #tpu.memory_space<vmem>>, vector<16x16xf32>
    %c104 = arith.constant 104 : index
    %c0_234 = arith.constant 0 : index
    %695 = vector.load %arg2[%c104, %c0_234] : memref<136x32xf32, #tpu.memory_space<vmem>>, vector<1x32xf32>
    %c105 = arith.constant 105 : index
    %c0_235 = arith.constant 0 : index
    %696 = vector.load %arg2[%c105, %c0_235] : memref<136x32xf32, #tpu.memory_space<vmem>>, vector<1x32xf32>
    %cst_236 = arith.constant dense<0.000000e+00> : vector<1x16xf32>
    %697 = tpu.matmul %695, %680, %cst_236 {dimension_numbers = #tpu.dot_dimension_numbers<[1], [1], [0], [0], [0, 0, 1, 0], [], []>} : vector<1x32xf32>, vector<16x32xf32>, vector<1x16xf32> -> vector<1x16xf32>
    %cst_237 = arith.constant dense<0.000000e+00> : vector<16x1xf32>
    %698 = tpu.matmul %680, %696, %cst_237 {dimension_numbers = #tpu.dot_dimension_numbers<[1], [1], [0], [0], [0, 0, 1, 0], [], []>} : vector<16x32xf32>, vector<1x32xf32>, vector<16x1xf32> -> vector<16x1xf32>
    %699 = vector.broadcast %698 : vector<16x1xf32> to vector<16x16xf32>
    %700 = vector.broadcast %697 : vector<1x16xf32> to vector<16x16xf32>
    %701 = arith.addf %699, %700 : vector<16x16xf32>
    %cst_238 = arith.constant 0.000000e+00 : f32
    %702 = vector.broadcast %cst_238 : f32 to vector<16x16xf32>
    %703 = arith.cmpf oge, %701, %702 : vector<16x16xf32>
    %cst_239 = arith.constant 2.000000e-01 : f32
    %704 = vector.broadcast %cst_239 : f32 to vector<16x16xf32>
    %705 = arith.mulf %704, %701 : vector<16x16xf32>
    %706 = arith.select %703, %701, %705 : vector<16x16xi1>, vector<16x16xf32>
    %707 = arith.addf %706, %694 : vector<16x16xf32>
    %cst_240 = arith.constant dense<0xFF800000> : vector<16xf32>
    %708 = vector.multi_reduction <maximumf>, %707, %cst_240 [1] : vector<16x16xf32> to vector<16xf32>
    %709 = vector.shape_cast %708 : vector<16xf32> to vector<16x1xf32>
    %710 = vector.broadcast %709 : vector<16x1xf32> to vector<16x16xf32>
    %711 = arith.subf %707, %710 : vector<16x16xf32>
    %712 = math.exp %711 : vector<16x16xf32>
    %713 = arith.mulf %693, %712 : vector<16x16xf32>
    %cst_241 = arith.constant dense<0.000000e+00> : vector<16xf32>
    %714 = vector.multi_reduction <add>, %713, %cst_241 [1] : vector<16x16xf32> to vector<16xf32>
    %715 = vector.shape_cast %714 : vector<16xf32> to vector<16x1xf32>
    %cst_242 = arith.constant 0.000000e+00 : f32
    %716 = vector.broadcast %cst_242 : f32 to vector<16x1xf32>
    %717 = arith.cmpf ogt, %715, %716 : vector<16x1xf32>
    %cst_243 = arith.constant 1.000000e+00 : f32
    %718 = vector.broadcast %cst_243 : f32 to vector<16x1xf32>
    %719 = arith.select %717, %715, %718 : vector<16x1xi1>, vector<16x1xf32>
    %cst_244 = arith.constant 1.000000e+00 : f32
    %720 = vector.broadcast %cst_244 : f32 to vector<16x1xf32>
    %721 = arith.divf %720, %719 : vector<16x1xf32>
    %722 = vector.broadcast %721 : vector<16x1xf32> to vector<16x16xf32>
    %723 = arith.mulf %713, %722 : vector<16x16xf32>
    %724 = vector.extract_strided_slice %690 {offsets = [0, 0], sizes = [16, 16], strides = [1, 1]} : vector<16x48xf32> to vector<16x16xf32>
    %cst_245 = arith.constant dense<0.000000e+00> : vector<16x16xf32>
    %725 = tpu.matmul %723, %724, %cst_245 {dimension_numbers = #tpu.dot_dimension_numbers<[1], [0], [0], [1], [0, 0, 1, 1], [], []>} : vector<16x16xf32>, vector<16x16xf32>, vector<16x16xf32> -> vector<16x16xf32>
    %c120 = arith.constant 120 : index
    %c0_246 = arith.constant 0 : index
    %726 = vector.load %arg2[%c120, %c0_246] : memref<136x32xf32, #tpu.memory_space<vmem>>, vector<1x16xf32>
    %727 = vector.broadcast %726 : vector<1x16xf32> to vector<16x16xf32>
    %728 = arith.addf %725, %727 : vector<16x16xf32>
    %c32_247 = arith.constant 32 : index
    %c0_248 = arith.constant 0 : index
    %729 = vector.load %arg1[%c32_247, %c0_248] : memref<160x16xf32, #tpu.memory_space<vmem>>, vector<8x16xf32>
    %c48_249 = arith.constant 48 : index
    %c0_250 = arith.constant 0 : index
    %730 = vector.load %arg1[%c48_249, %c0_250] : memref<160x16xf32, #tpu.memory_space<vmem>>, vector<8x16xf32>
    %c106 = arith.constant 106 : index
    %c0_251 = arith.constant 0 : index
    %731 = vector.load %arg2[%c106, %c0_251] : memref<136x32xf32, #tpu.memory_space<vmem>>, vector<1x32xf32>
    %c107 = arith.constant 107 : index
    %c0_252 = arith.constant 0 : index
    %732 = vector.load %arg2[%c107, %c0_252] : memref<136x32xf32, #tpu.memory_space<vmem>>, vector<1x32xf32>
    %cst_253 = arith.constant dense<0.000000e+00> : vector<1x16xf32>
    %733 = tpu.matmul %731, %680, %cst_253 {dimension_numbers = #tpu.dot_dimension_numbers<[1], [1], [0], [0], [0, 0, 1, 0], [], []>} : vector<1x32xf32>, vector<16x32xf32>, vector<1x16xf32> -> vector<1x16xf32>
    %cst_254 = arith.constant dense<0.000000e+00> : vector<8x1xf32>
    %734 = tpu.matmul %684, %732, %cst_254 {dimension_numbers = #tpu.dot_dimension_numbers<[1], [1], [0], [0], [0, 0, 1, 0], [], []>} : vector<8x32xf32>, vector<1x32xf32>, vector<8x1xf32> -> vector<8x1xf32>
    %735 = vector.broadcast %734 : vector<8x1xf32> to vector<8x16xf32>
    %736 = vector.broadcast %733 : vector<1x16xf32> to vector<8x16xf32>
    %737 = arith.addf %735, %736 : vector<8x16xf32>
    %cst_255 = arith.constant 0.000000e+00 : f32
    %738 = vector.broadcast %cst_255 : f32 to vector<8x16xf32>
    %739 = arith.cmpf oge, %737, %738 : vector<8x16xf32>
    %cst_256 = arith.constant 2.000000e-01 : f32
    %740 = vector.broadcast %cst_256 : f32 to vector<8x16xf32>
    %741 = arith.mulf %740, %737 : vector<8x16xf32>
    %742 = arith.select %739, %737, %741 : vector<8x16xi1>, vector<8x16xf32>
    %743 = arith.addf %742, %730 : vector<8x16xf32>
    %cst_257 = arith.constant dense<0xFF800000> : vector<8xf32>
    %744 = vector.multi_reduction <maximumf>, %743, %cst_257 [1] : vector<8x16xf32> to vector<8xf32>
    %745 = vector.shape_cast %744 : vector<8xf32> to vector<8x1xf32>
    %746 = vector.broadcast %745 : vector<8x1xf32> to vector<8x16xf32>
    %747 = arith.subf %743, %746 : vector<8x16xf32>
    %748 = math.exp %747 : vector<8x16xf32>
    %749 = arith.mulf %729, %748 : vector<8x16xf32>
    %cst_258 = arith.constant dense<0.000000e+00> : vector<8xf32>
    %750 = vector.multi_reduction <add>, %749, %cst_258 [1] : vector<8x16xf32> to vector<8xf32>
    %751 = vector.shape_cast %750 : vector<8xf32> to vector<8x1xf32>
    %cst_259 = arith.constant 0.000000e+00 : f32
    %752 = vector.broadcast %cst_259 : f32 to vector<8x1xf32>
    %753 = arith.cmpf ogt, %751, %752 : vector<8x1xf32>
    %cst_260 = arith.constant 1.000000e+00 : f32
    %754 = vector.broadcast %cst_260 : f32 to vector<8x1xf32>
    %755 = arith.select %753, %751, %754 : vector<8x1xi1>, vector<8x1xf32>
    %cst_261 = arith.constant 1.000000e+00 : f32
    %756 = vector.broadcast %cst_261 : f32 to vector<8x1xf32>
    %757 = arith.divf %756, %755 : vector<8x1xf32>
    %758 = vector.broadcast %757 : vector<8x1xf32> to vector<8x16xf32>
    %759 = arith.mulf %749, %758 : vector<8x16xf32>
    %760 = vector.extract_strided_slice %690 {offsets = [0, 16], sizes = [16, 16], strides = [1, 1]} : vector<16x48xf32> to vector<16x16xf32>
    %cst_262 = arith.constant dense<0.000000e+00> : vector<8x16xf32>
    %761 = tpu.matmul %759, %760, %cst_262 {dimension_numbers = #tpu.dot_dimension_numbers<[1], [0], [0], [1], [0, 0, 1, 1], [], []>} : vector<8x16xf32>, vector<16x16xf32>, vector<8x16xf32> -> vector<8x16xf32>
    %c121 = arith.constant 121 : index
    %c0_263 = arith.constant 0 : index
    %762 = vector.load %arg2[%c121, %c0_263] : memref<136x32xf32, #tpu.memory_space<vmem>>, vector<1x16xf32>
    %763 = vector.broadcast %762 : vector<1x16xf32> to vector<8x16xf32>
    %764 = arith.addf %761, %763 : vector<8x16xf32>
    %c64_264 = arith.constant 64 : index
    %c0_265 = arith.constant 0 : index
    %765 = vector.load %arg1[%c64_264, %c0_265] : memref<160x16xf32, #tpu.memory_space<vmem>>, vector<8x16xf32>
    %c80_266 = arith.constant 80 : index
    %c0_267 = arith.constant 0 : index
    %766 = vector.load %arg1[%c80_266, %c0_267] : memref<160x16xf32, #tpu.memory_space<vmem>>, vector<8x16xf32>
    %c108 = arith.constant 108 : index
    %c0_268 = arith.constant 0 : index
    %767 = vector.load %arg2[%c108, %c0_268] : memref<136x32xf32, #tpu.memory_space<vmem>>, vector<1x32xf32>
    %c109 = arith.constant 109 : index
    %c0_269 = arith.constant 0 : index
    %768 = vector.load %arg2[%c109, %c0_269] : memref<136x32xf32, #tpu.memory_space<vmem>>, vector<1x32xf32>
    %cst_270 = arith.constant dense<0.000000e+00> : vector<1x16xf32>
    %769 = tpu.matmul %767, %680, %cst_270 {dimension_numbers = #tpu.dot_dimension_numbers<[1], [1], [0], [0], [0, 0, 1, 0], [], []>} : vector<1x32xf32>, vector<16x32xf32>, vector<1x16xf32> -> vector<1x16xf32>
    %cst_271 = arith.constant dense<0.000000e+00> : vector<8x1xf32>
    %770 = tpu.matmul %688, %768, %cst_271 {dimension_numbers = #tpu.dot_dimension_numbers<[1], [1], [0], [0], [0, 0, 1, 0], [], []>} : vector<8x32xf32>, vector<1x32xf32>, vector<8x1xf32> -> vector<8x1xf32>
    %771 = vector.broadcast %770 : vector<8x1xf32> to vector<8x16xf32>
    %772 = vector.broadcast %769 : vector<1x16xf32> to vector<8x16xf32>
    %773 = arith.addf %771, %772 : vector<8x16xf32>
    %cst_272 = arith.constant 0.000000e+00 : f32
    %774 = vector.broadcast %cst_272 : f32 to vector<8x16xf32>
    %775 = arith.cmpf oge, %773, %774 : vector<8x16xf32>
    %cst_273 = arith.constant 2.000000e-01 : f32
    %776 = vector.broadcast %cst_273 : f32 to vector<8x16xf32>
    %777 = arith.mulf %776, %773 : vector<8x16xf32>
    %778 = arith.select %775, %773, %777 : vector<8x16xi1>, vector<8x16xf32>
    %779 = arith.addf %778, %766 : vector<8x16xf32>
    %cst_274 = arith.constant dense<0xFF800000> : vector<8xf32>
    %780 = vector.multi_reduction <maximumf>, %779, %cst_274 [1] : vector<8x16xf32> to vector<8xf32>
    %781 = vector.shape_cast %780 : vector<8xf32> to vector<8x1xf32>
    %782 = vector.broadcast %781 : vector<8x1xf32> to vector<8x16xf32>
    %783 = arith.subf %779, %782 : vector<8x16xf32>
    %784 = math.exp %783 : vector<8x16xf32>
    %785 = arith.mulf %765, %784 : vector<8x16xf32>
    %cst_275 = arith.constant dense<0.000000e+00> : vector<8xf32>
    %786 = vector.multi_reduction <add>, %785, %cst_275 [1] : vector<8x16xf32> to vector<8xf32>
    %787 = vector.shape_cast %786 : vector<8xf32> to vector<8x1xf32>
    %cst_276 = arith.constant 0.000000e+00 : f32
    %788 = vector.broadcast %cst_276 : f32 to vector<8x1xf32>
    %789 = arith.cmpf ogt, %787, %788 : vector<8x1xf32>
    %cst_277 = arith.constant 1.000000e+00 : f32
    %790 = vector.broadcast %cst_277 : f32 to vector<8x1xf32>
    %791 = arith.select %789, %787, %790 : vector<8x1xi1>, vector<8x1xf32>
    %cst_278 = arith.constant 1.000000e+00 : f32
    %792 = vector.broadcast %cst_278 : f32 to vector<8x1xf32>
    %793 = arith.divf %792, %791 : vector<8x1xf32>
    %794 = vector.broadcast %793 : vector<8x1xf32> to vector<8x16xf32>
    %795 = arith.mulf %785, %794 : vector<8x16xf32>
    %796 = vector.extract_strided_slice %690 {offsets = [0, 32], sizes = [16, 16], strides = [1, 1]} : vector<16x48xf32> to vector<16x16xf32>
    %cst_279 = arith.constant dense<0.000000e+00> : vector<8x16xf32>
    %797 = tpu.matmul %795, %796, %cst_279 {dimension_numbers = #tpu.dot_dimension_numbers<[1], [0], [0], [1], [0, 0, 1, 1], [], []>} : vector<8x16xf32>, vector<16x16xf32>, vector<8x16xf32> -> vector<8x16xf32>
    %c122 = arith.constant 122 : index
    %c0_280 = arith.constant 0 : index
    %798 = vector.load %arg2[%c122, %c0_280] : memref<136x32xf32, #tpu.memory_space<vmem>>, vector<1x16xf32>
    %799 = vector.broadcast %798 : vector<1x16xf32> to vector<8x16xf32>
    %800 = arith.addf %797, %799 : vector<8x16xf32>
    %c96_281 = arith.constant 96 : index
    %c0_282 = arith.constant 0 : index
    %801 = vector.load %arg1[%c96_281, %c0_282] : memref<160x16xf32, #tpu.memory_space<vmem>>, vector<16x8xf32>
    %c112_283 = arith.constant 112 : index
    %c0_284 = arith.constant 0 : index
    %802 = vector.load %arg1[%c112_283, %c0_284] : memref<160x16xf32, #tpu.memory_space<vmem>>, vector<16x8xf32>
    %c110 = arith.constant 110 : index
    %c0_285 = arith.constant 0 : index
    %803 = vector.load %arg2[%c110, %c0_285] : memref<136x32xf32, #tpu.memory_space<vmem>>, vector<1x32xf32>
    %c111 = arith.constant 111 : index
    %c0_286 = arith.constant 0 : index
    %804 = vector.load %arg2[%c111, %c0_286] : memref<136x32xf32, #tpu.memory_space<vmem>>, vector<1x32xf32>
    %cst_287 = arith.constant dense<0.000000e+00> : vector<1x8xf32>
    %805 = tpu.matmul %803, %7, %cst_287 {dimension_numbers = #tpu.dot_dimension_numbers<[1], [1], [0], [0], [0, 0, 1, 0], [], []>} : vector<1x32xf32>, vector<8x32xf32>, vector<1x8xf32> -> vector<1x8xf32>
    %cst_288 = arith.constant dense<0.000000e+00> : vector<16x1xf32>
    %806 = tpu.matmul %680, %804, %cst_288 {dimension_numbers = #tpu.dot_dimension_numbers<[1], [1], [0], [0], [0, 0, 1, 0], [], []>} : vector<16x32xf32>, vector<1x32xf32>, vector<16x1xf32> -> vector<16x1xf32>
    %807 = vector.broadcast %806 : vector<16x1xf32> to vector<16x8xf32>
    %808 = vector.broadcast %805 : vector<1x8xf32> to vector<16x8xf32>
    %809 = arith.addf %807, %808 : vector<16x8xf32>
    %cst_289 = arith.constant 0.000000e+00 : f32
    %810 = vector.broadcast %cst_289 : f32 to vector<16x8xf32>
    %811 = arith.cmpf oge, %809, %810 : vector<16x8xf32>
    %cst_290 = arith.constant 2.000000e-01 : f32
    %812 = vector.broadcast %cst_290 : f32 to vector<16x8xf32>
    %813 = arith.mulf %812, %809 : vector<16x8xf32>
    %814 = arith.select %811, %809, %813 : vector<16x8xi1>, vector<16x8xf32>
    %815 = arith.addf %814, %802 : vector<16x8xf32>
    %cst_291 = arith.constant dense<0xFF800000> : vector<16xf32>
    %816 = vector.multi_reduction <maximumf>, %815, %cst_291 [1] : vector<16x8xf32> to vector<16xf32>
    %817 = vector.shape_cast %816 : vector<16xf32> to vector<16x1xf32>
    %818 = vector.broadcast %817 : vector<16x1xf32> to vector<16x8xf32>
    %819 = arith.subf %815, %818 : vector<16x8xf32>
    %820 = math.exp %819 : vector<16x8xf32>
    %821 = arith.mulf %801, %820 : vector<16x8xf32>
    %cst_292 = arith.constant dense<0.000000e+00> : vector<16xf32>
    %822 = vector.multi_reduction <add>, %821, %cst_292 [1] : vector<16x8xf32> to vector<16xf32>
    %823 = vector.shape_cast %822 : vector<16xf32> to vector<16x1xf32>
    %cst_293 = arith.constant 0.000000e+00 : f32
    %824 = vector.broadcast %cst_293 : f32 to vector<16x1xf32>
    %825 = arith.cmpf ogt, %823, %824 : vector<16x1xf32>
    %cst_294 = arith.constant 1.000000e+00 : f32
    %826 = vector.broadcast %cst_294 : f32 to vector<16x1xf32>
    %827 = arith.select %825, %823, %826 : vector<16x1xi1>, vector<16x1xf32>
    %cst_295 = arith.constant 1.000000e+00 : f32
    %828 = vector.broadcast %cst_295 : f32 to vector<16x1xf32>
    %829 = arith.divf %828, %827 : vector<16x1xf32>
    %830 = vector.broadcast %829 : vector<16x1xf32> to vector<16x8xf32>
    %831 = arith.mulf %821, %830 : vector<16x8xf32>
    %832 = vector.extract_strided_slice %692 {offsets = [0, 0], sizes = [8, 16], strides = [1, 1]} : vector<8x32xf32> to vector<8x16xf32>
    %cst_296 = arith.constant dense<0.000000e+00> : vector<16x16xf32>
    %833 = tpu.matmul %831, %832, %cst_296 {dimension_numbers = #tpu.dot_dimension_numbers<[1], [0], [0], [1], [0, 0, 1, 1], [], []>} : vector<16x8xf32>, vector<8x16xf32>, vector<16x16xf32> -> vector<16x16xf32>
    %c123 = arith.constant 123 : index
    %c0_297 = arith.constant 0 : index
    %834 = vector.load %arg2[%c123, %c0_297] : memref<136x32xf32, #tpu.memory_space<vmem>>, vector<1x16xf32>
    %835 = vector.broadcast %834 : vector<1x16xf32> to vector<16x16xf32>
    %836 = arith.addf %833, %835 : vector<16x16xf32>
    %c128_298 = arith.constant 128 : index
    %c0_299 = arith.constant 0 : index
    %837 = vector.load %arg1[%c128_298, %c0_299] : memref<160x16xf32, #tpu.memory_space<vmem>>, vector<16x8xf32>
    %c144_300 = arith.constant 144 : index
    %c0_301 = arith.constant 0 : index
    %838 = vector.load %arg1[%c144_300, %c0_301] : memref<160x16xf32, #tpu.memory_space<vmem>>, vector<16x8xf32>
    %c112_302 = arith.constant 112 : index
    %c0_303 = arith.constant 0 : index
    %839 = vector.load %arg2[%c112_302, %c0_303] : memref<136x32xf32, #tpu.memory_space<vmem>>, vector<1x32xf32>
    %c113 = arith.constant 113 : index
    %c0_304 = arith.constant 0 : index
    %840 = vector.load %arg2[%c113, %c0_304] : memref<136x32xf32, #tpu.memory_space<vmem>>, vector<1x32xf32>
    %cst_305 = arith.constant dense<0.000000e+00> : vector<1x8xf32>
    %841 = tpu.matmul %839, %7, %cst_305 {dimension_numbers = #tpu.dot_dimension_numbers<[1], [1], [0], [0], [0, 0, 1, 0], [], []>} : vector<1x32xf32>, vector<8x32xf32>, vector<1x8xf32> -> vector<1x8xf32>
    %cst_306 = arith.constant dense<0.000000e+00> : vector<16x1xf32>
    %842 = tpu.matmul %680, %840, %cst_306 {dimension_numbers = #tpu.dot_dimension_numbers<[1], [1], [0], [0], [0, 0, 1, 0], [], []>} : vector<16x32xf32>, vector<1x32xf32>, vector<16x1xf32> -> vector<16x1xf32>
    %843 = vector.broadcast %842 : vector<16x1xf32> to vector<16x8xf32>
    %844 = vector.broadcast %841 : vector<1x8xf32> to vector<16x8xf32>
    %845 = arith.addf %843, %844 : vector<16x8xf32>
    %cst_307 = arith.constant 0.000000e+00 : f32
    %846 = vector.broadcast %cst_307 : f32 to vector<16x8xf32>
    %847 = arith.cmpf oge, %845, %846 : vector<16x8xf32>
    %cst_308 = arith.constant 2.000000e-01 : f32
    %848 = vector.broadcast %cst_308 : f32 to vector<16x8xf32>
    %849 = arith.mulf %848, %845 : vector<16x8xf32>
    %850 = arith.select %847, %845, %849 : vector<16x8xi1>, vector<16x8xf32>
    %851 = arith.addf %850, %838 : vector<16x8xf32>
    %cst_309 = arith.constant dense<0xFF800000> : vector<16xf32>
    %852 = vector.multi_reduction <maximumf>, %851, %cst_309 [1] : vector<16x8xf32> to vector<16xf32>
    %853 = vector.shape_cast %852 : vector<16xf32> to vector<16x1xf32>
    %854 = vector.broadcast %853 : vector<16x1xf32> to vector<16x8xf32>
    %855 = arith.subf %851, %854 : vector<16x8xf32>
    %856 = math.exp %855 : vector<16x8xf32>
    %857 = arith.mulf %837, %856 : vector<16x8xf32>
    %cst_310 = arith.constant dense<0.000000e+00> : vector<16xf32>
    %858 = vector.multi_reduction <add>, %857, %cst_310 [1] : vector<16x8xf32> to vector<16xf32>
    %859 = vector.shape_cast %858 : vector<16xf32> to vector<16x1xf32>
    %cst_311 = arith.constant 0.000000e+00 : f32
    %860 = vector.broadcast %cst_311 : f32 to vector<16x1xf32>
    %861 = arith.cmpf ogt, %859, %860 : vector<16x1xf32>
    %cst_312 = arith.constant 1.000000e+00 : f32
    %862 = vector.broadcast %cst_312 : f32 to vector<16x1xf32>
    %863 = arith.select %861, %859, %862 : vector<16x1xi1>, vector<16x1xf32>
    %cst_313 = arith.constant 1.000000e+00 : f32
    %864 = vector.broadcast %cst_313 : f32 to vector<16x1xf32>
    %865 = arith.divf %864, %863 : vector<16x1xf32>
    %866 = vector.broadcast %865 : vector<16x1xf32> to vector<16x8xf32>
    %867 = arith.mulf %857, %866 : vector<16x8xf32>
    %868 = vector.extract_strided_slice %692 {offsets = [0, 16], sizes = [8, 16], strides = [1, 1]} : vector<8x32xf32> to vector<8x16xf32>
    %cst_314 = arith.constant dense<0.000000e+00> : vector<16x16xf32>
    %869 = tpu.matmul %867, %868, %cst_314 {dimension_numbers = #tpu.dot_dimension_numbers<[1], [0], [0], [1], [0, 0, 1, 1], [], []>} : vector<16x8xf32>, vector<8x16xf32>, vector<16x16xf32> -> vector<16x16xf32>
    %c124 = arith.constant 124 : index
    %c0_315 = arith.constant 0 : index
    %870 = vector.load %arg2[%c124, %c0_315] : memref<136x32xf32, #tpu.memory_space<vmem>>, vector<1x16xf32>
    %871 = vector.broadcast %870 : vector<1x16xf32> to vector<16x16xf32>
    %872 = arith.addf %869, %871 : vector<16x16xf32>
    %873 = arith.addf %728, %836 : vector<16x16xf32>
    %874 = arith.addf %873, %872 : vector<16x16xf32>
    %cst_316 = arith.constant 0.333333343 : f32
    %875 = vector.broadcast %cst_316 : f32 to vector<16x16xf32>
    %876 = arith.mulf %874, %875 : vector<16x16xf32>
    %c0_317 = arith.constant 0 : index
    %c800 = arith.constant 800 : index
    %877 = vector.load %arg3[%c0_317, %c800] : memref<32x864xf32, #tpu.memory_space<vmem>>, vector<32x16xf32>
    %cst_318 = arith.constant dense<0.000000e+00> : vector<8x16xf32>
    %878 = tpu.matmul %7, %877, %cst_318 {dimension_numbers = #tpu.dot_dimension_numbers<[1], [0], [0], [1], [0, 0, 1, 1], [], []>} : vector<8x32xf32>, vector<32x16xf32>, vector<8x16xf32> -> vector<8x16xf32>
    %c128_319 = arith.constant 128 : index
    %c0_320 = arith.constant 0 : index
    %879 = vector.load %arg2[%c128_319, %c0_320] : memref<136x32xf32, #tpu.memory_space<vmem>>, vector<1x16xf32>
    %880 = vector.broadcast %879 : vector<1x16xf32> to vector<8x16xf32>
    %881 = arith.addf %878, %880 : vector<8x16xf32>
    %c0_321 = arith.constant 0 : index
    %c0_322 = arith.constant 0 : index
    %882 = vector.load %arg4[%c0_321, %c0_322] : memref<68x128xf32, #tpu.memory_space<vmem>>, vector<16x128xf32>
    %cst_323 = arith.constant dense<0.000000e+00> : vector<8x128xf32>
    %883 = tpu.matmul %881, %882, %cst_323 {dimension_numbers = #tpu.dot_dimension_numbers<[1], [0], [0], [1], [0, 0, 1, 1], [], []>} : vector<8x16xf32>, vector<16x128xf32>, vector<8x128xf32> -> vector<8x128xf32>
    %c64_324 = arith.constant 64 : index
    %c0_325 = arith.constant 0 : index
    %884 = vector.load %arg4[%c64_324, %c0_325] : memref<68x128xf32, #tpu.memory_space<vmem>>, vector<1x128xf32>
    %885 = vector.broadcast %884 : vector<1x128xf32> to vector<8x128xf32>
    %886 = arith.addf %883, %885 : vector<8x128xf32>
    %c0_326 = arith.constant 0 : index
    %c0_327 = arith.constant 0 : index
    %887 = vector.load %arg5[%c0_326, %c0_327] : memref<40x128xf32, #tpu.memory_space<vmem>>, vector<8x128xf32>
    tpu.vector_store %arg5[%c0_326, %c0_327], %886 {strides = array<i32>} : memref<40x128xf32, #tpu.memory_space<vmem>>, vector<8x128xf32>,
    %c16_328 = arith.constant 16 : index
    %c0_329 = arith.constant 0 : index
    %888 = vector.load %arg4[%c16_328, %c0_329] : memref<68x128xf32, #tpu.memory_space<vmem>>, vector<16x128xf32>
    %cst_330 = arith.constant dense<0.000000e+00> : vector<16x128xf32>
    %889 = tpu.matmul %876, %888, %cst_330 {dimension_numbers = #tpu.dot_dimension_numbers<[1], [0], [0], [1], [0, 0, 1, 1], [], []>} : vector<16x16xf32>, vector<16x128xf32>, vector<16x128xf32> -> vector<16x128xf32>
    %c65 = arith.constant 65 : index
    %c0_331 = arith.constant 0 : index
    %890 = vector.load %arg4[%c65, %c0_331] : memref<68x128xf32, #tpu.memory_space<vmem>>, vector<1x128xf32>
    %891 = vector.broadcast %890 : vector<1x128xf32> to vector<16x128xf32>
    %892 = arith.addf %889, %891 : vector<16x128xf32>
    %c8 = arith.constant 8 : index
    %c0_332 = arith.constant 0 : index
    %893 = vector.load %arg5[%c8, %c0_332] : memref<40x128xf32, #tpu.memory_space<vmem>>, vector<16x128xf32>
    tpu.vector_store %arg5[%c8, %c0_332], %892 {strides = array<i32>} : memref<40x128xf32, #tpu.memory_space<vmem>>, vector<16x128xf32>,
    %c32_333 = arith.constant 32 : index
    %c0_334 = arith.constant 0 : index
    %894 = vector.load %arg4[%c32_333, %c0_334] : memref<68x128xf32, #tpu.memory_space<vmem>>, vector<16x128xf32>
    %cst_335 = arith.constant dense<0.000000e+00> : vector<8x128xf32>
    %895 = tpu.matmul %764, %894, %cst_335 {dimension_numbers = #tpu.dot_dimension_numbers<[1], [0], [0], [1], [0, 0, 1, 1], [], []>} : vector<8x16xf32>, vector<16x128xf32>, vector<8x128xf32> -> vector<8x128xf32>
    %c66 = arith.constant 66 : index
    %c0_336 = arith.constant 0 : index
    %896 = vector.load %arg4[%c66, %c0_336] : memref<68x128xf32, #tpu.memory_space<vmem>>, vector<1x128xf32>
    %897 = vector.broadcast %896 : vector<1x128xf32> to vector<8x128xf32>
    %898 = arith.addf %895, %897 : vector<8x128xf32>
    %c24 = arith.constant 24 : index
    %c0_337 = arith.constant 0 : index
    %899 = vector.load %arg5[%c24, %c0_337] : memref<40x128xf32, #tpu.memory_space<vmem>>, vector<8x128xf32>
    tpu.vector_store %arg5[%c24, %c0_337], %898 {strides = array<i32>} : memref<40x128xf32, #tpu.memory_space<vmem>>, vector<8x128xf32>,
    %c48_338 = arith.constant 48 : index
    %c0_339 = arith.constant 0 : index
    %900 = vector.load %arg4[%c48_338, %c0_339] : memref<68x128xf32, #tpu.memory_space<vmem>>, vector<16x128xf32>
    %cst_340 = arith.constant dense<0.000000e+00> : vector<8x128xf32>
    %901 = tpu.matmul %800, %900, %cst_340 {dimension_numbers = #tpu.dot_dimension_numbers<[1], [0], [0], [1], [0, 0, 1, 1], [], []>} : vector<8x16xf32>, vector<16x128xf32>, vector<8x128xf32> -> vector<8x128xf32>
    %c67 = arith.constant 67 : index
    %c0_341 = arith.constant 0 : index
    %902 = vector.load %arg4[%c67, %c0_341] : memref<68x128xf32, #tpu.memory_space<vmem>>, vector<1x128xf32>
    %903 = vector.broadcast %902 : vector<1x128xf32> to vector<8x128xf32>
    %904 = arith.addf %901, %903 : vector<8x128xf32>
    %c32_342 = arith.constant 32 : index
    %c0_343 = arith.constant 0 : index
    %905 = vector.load %arg5[%c32_342, %c0_343] : memref<40x128xf32, #tpu.memory_space<vmem>>, vector<8x128xf32>
    tpu.vector_store %arg5[%c32_342, %c0_343], %904 {strides = array<i32>} : memref<40x128xf32, #tpu.memory_space<vmem>>, vector<8x128xf32>,
    return
  }
}

</mosaic_0001>

<bundles_post_ra>
// kernel: hetero_gnn_forward.1
= control target key start
LH: loop header
LB: loop body
LE: loop exit
PB: predicated region body
PF: predicated region fallthrough
CT: control target
= control target key end

     0   :  { %v6427_v0 = vmov 0.0|0.0   ;;  %vm6428_vm0 = vmmov 0   ;;  %v6429_v3 = vmov 0.0   ;;  %vm32_vm1 = vcmask 130048   ;;  %s6434_s15 = smov 96   ;;  %s6435_s20 = smov 32   ;;  %s7657_s2 = inlined_call_operand.vmem [shape: f32[136,32], index: 2, kind: input, shape index: {}]   ;;  %s7658_s3 = inlined_call_operand.vmem [shape: f32[32,864], index: 3, kind: input, shape index: {}]   ;;  %s7659_s0 = inlined_call_operand.vmem [shape: f32[40,16], index: 0, kind: input, shape index: {}]   ;;  %s7660_s1 = inlined_call_operand.vmem [shape: f32[160,16], index: 1, kind: input, shape index: {}]   ;;  %s7661_s4 = inlined_call_operand.vmem [shape: f32[68,128], index: 4, kind: input, shape index: {}]   ;;  %s7662_s5 = inlined_call_operand.vmem [shape: f32[40,128], index: 5, kind: output, shape index: {}]  }
   0x1   :  { %5977 = vmatprep.subr.bf16.mxu0 %v6427_v0  ;;  %v25_v1 = vld [vmem:[%s7657_s2] sm:$0xff]  ;;  %v26_v2 = vld [vmem:[%s7657_s2 + $0x8] sm:$0xff]  ;;  %5648 = vmatprep.mubr.msk.f32.mxu0 %vm6428_vm0, %v6429_v3  ;;  %v317_v6 = vld [vmem:[%s7658_s3 + $0x58] sm:$0xff]  ;;  %vm155_vm2 = vcmask 261120   ;;  %s6436_s21 = smov 64   ;;  %s6437_s30 = smov 112  }
   0x2   :  { %v5978_v4 = vpack.c.bf16 %v26_v2, %v25_v1  ;;  %v315_v5 = vld [vmem:[%s7658_s3 + $0x20] sm:$0xff]  ;;  %226 = vmatprep.mubr.f32.mxu1 %v6429_v3  ;;  %v314_v7 = vld [vmem:[%s7658_s3 + $0x18] sm:$0xff]  ;;  %v316_v8 = vld [vmem:[%s7658_s3 + $0x50] sm:$0xff] }
   0x3   :  { %v20_v9 = vld [vmem:[%s7659_s0] sm:$0xff]  ;;  %v5996_v10 = vpack.c.bf16 %v317_v6, %v315_v5  ;;  %v5998_v11 = vpack.c.bf16 %v316_v8, %v314_v7  ;;  %v21_v12 = vld [vmem:[%s7659_s0 + $0x8] sm:$0xff]  ;;  %v22_v13 = vld [vmem:[%s7659_s0 + $0x10] sm:$0xff]  ;;  %v6430_v6 = vmov 1   ;;  %v6431_v7 = vmov 0  }
   0x4   :  { %5979 = vmatpush3.bf16.msra.mxu0 %v5978_v4  ;;  %v23_v14 = vld [vmem:[%s7659_s0 + $0x18] sm:$0xff]  ;;  %v144_v15 = vld [vmem:[%s7658_s3 + $0x8] sm:$0xff]  ;;  %v147_v16 = vld [vmem:[%s7658_s3 + $0x40] sm:$0xff]  ;;  %6162 = vset.pattern.permute.xlu0 %v6430_v6 }
   0x5   :  { %5997 = vmatprep.subr.bf16.mxu0 %v5996_v10  ;;  %v319_v17 = vld [vmem:[%s7658_s3 + $0x90] sm:$0xff]  ;;  %v5980_v18 = vpack.c.bf16 %v147_v16, %v144_v15  ;;  %v321_v19 = vld [vmem:[%s7658_s3 + $0xc8] sm:$0xff]  ;;  %v143_v20 = vld [vmem:[%s7658_s3] sm:$0xff]  ;;  %6163 = vset.pattern.permute.xlu1 %v6431_v7 }
   0x6   :  { %v146_v21 = vld [vmem:[%s7658_s3 + $0x38] sm:$0xff]  ;;  %v6000_v22 = vpack.c.bf16 %v321_v19, %v319_v17  ;;  %v318_v24 = vld [vmem:[%s7658_s3 + $0x88] sm:$0xff]  ;;  %v320_v25 = vld [vmem:[%s7658_s3 + $0xc0] sm:$0xff] }
   0x7   :  { %5649 = vmatmul.mubr.msk.f32.vlgmr.msra.gmra.mrb[0].mxu0 %vm32_vm1, %v20_v9  ;;  %v5982_v23 = vpack.c.bf16 %v146_v21, %v143_v20  ;;  %5981 = vmatprep.subr.bf16.mxu1 %v5980_v18  ;;  %v24_v26 = vld [vmem:[%s7659_s0 + $0x20] sm:$0xff]  ;;  %v6002_v27 = vpack.c.bf16 %v320_v25, %v318_v24  ;;  %v150_v28 = vld [vmem:[%s7658_s3 + $0x78] sm:$0xff]  ;;  %v153_v29 = vld [vmem:[%s7658_s3 + $0xb0] sm:$0xff]  ;;  %v6432_v24 = vmov 2   ;;  %v6433_v25 = vmov 3  }
   0x8   :  { %5651 = vmatprep.mubr.msk.f32.mxu0 %vm6428_vm0, %v6429_v3  ;;  %5999 = vmatpush1.bf16.msra.mxu0 %v5998_v11  ;;  %v5984_v30 = vpack.c.bf16 %v153_v29, %v150_v28  ;;  %v149_v31 = vld [vmem:[%s7658_s3 + $0x70] sm:$0xff]  ;;  %v152_v32 = vld [vmem:[%s7658_s3 + $0xa8] sm:$0xff]  ;;  %v401_v37 = vld [vmem:[%s7657_s2 + $0x3c] sm:$0xf] }
   0x9   :  { %6001 = vmatprep.subr.bf16.mxu0 %v6000_v22  ;;  %5983 = vmatpush1.bf16.msra.mxu1 %v5982_v23  ;;  %v5986_v33 = vpack.c.bf16 %v152_v32, %v149_v31  ;;  %v145_v34 = vld [vmem:[%s7658_s3 + $0x10] sm:$0xff]  ;;  %v148_v35 = vld [vmem:[%s7658_s3 + $0x48] sm:$0xff]  ;;  %v28_v42 = vld [vmem:[%s7657_s2 + $0x18] sm:$0xff]  ;;  %v563_v32 = vlaneseq }
   0xa   :  { %5985 = vmatprep.subr.bf16.mxu1 %v5984_v30  ;;  %v5988_v36 = vpack.c.bf16 %v148_v35, %v145_v34  ;;  %v27_v38 = vld [vmem:[%s7657_s2 + $0x10] sm:$0xff]  ;;  %v151_v45 = vld [vmem:[%s7658_s3 + $0x80] sm:$0xff]  ;;  %v154_v46 = vld [vmem:[%s7658_s3 + $0xb8] sm:$0xff] }
   0xb   :  { %5652 = vmatmul.mubr.msk.f32.gmra.mrb[2].mxu0 %vm32_vm1, %v21_v12  ;;  %v29_v49 = vld [vmem:[%s7657_s2 + $0x20] sm:$0xff]  ;;  %v5992_v51 = vpack.c.bf16 %v154_v46, %v151_v45  ;;  %vm6597_vm3 = vmpackc.low %vm155_vm2, %vm155_vm2  ;;  %v30_v60 = vld [vmem:[%s7657_s2 + $0x28] sm:$0xff] }
   0xc   :  { %5654 = vmatprep.mubr.msk.f32.mxu0 %vm6428_vm0, %v6429_v3  ;;  %6003 = vmatpush1.bf16.msra.mxu0 %v6002_v27  ;;  %v1122_v62 = vld [vmem:[%s7657_s2 + $0x40] sm:$0xf]  ;;  %v1123_v63 = vld [vmem:[%s7657_s2 + $0x44] sm:$0xf]  ;;  %v400_v2 = vld [vmem:[%s7657_s2 + $0x38] sm:$0xf] }
   0xd   :  { %5987 = vmatpush1.bf16.msra.mxu1 %v5986_v33  ;;  %5681 = vmatprep.subr.msk.mxu0 %vm155_vm2, %v401_v37  ;;  %v564_v33 = vshrl.u32 %v563_v32, 7  ;;  %v4710_v56 = vld [vmem:[%s7657_s2 + $0x70] sm:$0x1] }
   0xe   :  { %5989 = vmatprep.subr.bf16.mxu1 %v5988_v36 }
   0xf   :  { %5655 = vmatmul.mubr.msk.f32.gmra.mrb[4].mxu0 %vm32_vm1, %v22_v13  ;;  %v6688_v34 = vsub.s32 0, %v564_v33  ;;  %v6690_v35 = vsub.s32 1, %v564_v33 }
  0x10   :  { %5657 = vmatprep.mubr.msk.f32.mxu0 %vm6428_vm0, %v6429_v3 }
  0x13   :  { %5658 = vmatmul.mubr.msk.f32.gmra.mrb[6].mxu0 %vm32_vm1, %v23_v14 }
  0x14   :  { %5660 = vmatprep.mubr.msk.f32.mxu0 %vm6428_vm0, %v6429_v3 }
  0x17   :  { %5661 = vmatmul.mubr.msk.f32.gmra.mrb[8].mxu0 %vm32_vm1, %v24_v26 }
  0x18   :  { %389 = vmatprep.mubr.f32.mxu0 %v6429_v3 }
  0xda   :  { %v114_v39 = vpop.f32.mrb[0].mxu0 }
  0xdb   :  { %v115_v40 = vadd.f32 %v114_v39, %v27_v38  ;;  %v5650_v41 = vpop.f32.mrb[1].mxu0 }
  0xdd   :  { %v6571_v43 = vmax.f32 %v115_v40, 0.0 }
  0xde   :  { %v119_v44 = vpop.f32.mrb[2].mxu0 }
  0xdf   :  { %v120_v47 = vadd.f32 %v119_v44, %v28_v42  ;;  %v5653_v48 = vpop.f32.mrb[3].mxu0  ;;  %5374 = vmatmul.mubr.msk.f32.vlgmr.msra.gmra.mrb[10].mxu0 %vm155_vm2, %v6571_v43  ;;  %v398_v42 = vld [vmem:[%s7660_s1 + $0x10] sm:$0xff] }
  0xe0   :  { %5682 = vmatpush3.xpose.msk.msra.mxu0 %vm155_vm2, %v401_v37  ;;  %v6697_v48 = vsub.s32 2, %v564_v33 }
  0xe1   :  { %v6585_v50 = vmax.f32 %v120_v47, 0.0  ;;  %6024 = vmatprep.subr.bf16.mxu0 %v6427_v0 }
  0xe2   :  { %v124_v52 = vpop.f32.mrb[4].mxu0 }
  0xe3   :  { %v125_v53 = vadd.f32 %v124_v52, %v29_v49  ;;  %v5656_v54 = vpop.f32.mrb[5].mxu0  ;;  %5370 = vmatmul.mubr.msk.f32.vlgmr.msra.gmra.mrb[0].mxu1 %vm155_vm2, %v6585_v50  ;;  %5683 = vmatprep.mubr.msk.f32.mxu0 %vm155_vm2, %v6585_v50 }
  0xe4   :  { %5991 = vmatpush3.bf16.msra.mxu1 %v5988_v36  ;;  %232 = vmatprep.mubr.f32.mxu1 %v6429_v3 }
  0xe5   :  { %v6593_v55 = vmax.f32 %v125_v53, 0.0  ;;  %5993 = vmatprep.subr.bf16.mxu1 %v5992_v51 }
  0xe6   :  { %v129_v57 = vpop.f32.mrb[6].mxu0 }
  0xe7   :  { %5371 = vmatmul.mubr.msk.f32.gmra.mrb[2].mxu1 %vm155_vm2, %v6593_v55  ;;  %5684 = vmatmul.mubr.msk.f32.vlgmr.msra.gmra.mrb[12].mxu0 %vm155_vm2, %v6593_v55  ;;  %v6607_v58 = vpack.c.bf16 %v6593_v55, %v6585_v50  ;;  %v5659_v59 = vpop.f32.mrb[7].mxu0  ;;  %v130_v61 = vadd.f32 %v129_v57, %v30_v60 }
  0xe8   :  { %5995 = vmatpush3.bf16.msra.mxu1 %v5992_v51  ;;  %5671 = vmatprep.mubr.msk.f32.mxu1 %vm155_vm2, %v6585_v50  ;;  %v399_v59 = vld [vmem:[%s7660_s1 + $0x18] sm:$0xff] }
  0xe9   :  { %6027 = vmatpush3.bf16.xpose.msk.msra.mxu0 %vm6597_vm3, %v6607_v58  ;;  %6004 = vmatprep.subr.bf16.mxu1 %v6427_v0  ;;  %v141_v1 = vmax.f32 %v130_v61, 0.0 }
  0xea   :  { %5718 = vmatprep.mubr.msk.f32.mxu0 %vm6428_vm0, %v6429_v3  ;;  %5721 = vmatprep.subr.mxu0 %v6429_v3  ;;  %v6646_v4 = vpop.f32.mrb[8].mxu0 }
  0xeb   :  { %5672 = vmatmul.mubr.msk.f32.vlgmr.msra.gmra.mrb[4].mxu1 %vm155_vm2, %v6593_v55  ;;  %v5662_v5 = vpop.f32.mrb[9].mxu0 }
  0xec   :  { %5678 = vmatprep.mubr.msk.f32.mxu1 %vm6428_vm0, %v6429_v3 }
  0xf0   :  { %5719 = vmatmul.mubr.msk.f32.vlgmr.msra.gmra.mrb[14].mxu0 %vm155_vm2, %v1122_v62 }
  0xf1   :  { %6007 = vmatpush3.bf16.xpose.msk.msra.mxu1 %vm6597_vm3, %v6607_v58  ;;  %5722 = vmatpush3.xpose.msk.msra.mxu0 %vm155_vm2, %v1123_v63 }
  0xf2   :  { %5723 = vmatprep.mubr.msk.f32.mxu0 %vm6428_vm0, %v6429_v3  ;;  %6028 = vmatprep.subr.bf16.mxu0 %v6427_v0 }
  0xf4   :  { %5724 = vmatmul.mubr.msk.f32.vlgmr.msra.gmra.mrb[16].mxu0 %vm155_vm2, %v141_v1 }
  0xf5   :  { %5730 = vmatprep.mubr.msk.f32.mxu0 %vm6428_vm0, %v6429_v3 }
  0xf8   :  { %5679 = vmatmul.mubr.msk.f32.vlgmr.msra.gmra.mrb[6].mxu1 %vm155_vm2, %v400_v2 }
 0x1b2   :  { %v6650_v8 = vpop.f32.mrb[10].mxu0 }
 0x1b3   :  { %v6652_v9 = vpop.f32.mrb[11].mxu0 }
 0x1b6   :  { %v228_v10 = vpop.f32.mrb[0].mxu1 }
 0x1b7   :  { %v6654_v11 = vpop.f32.mrb[1].mxu1 }
 0x1ba   :  { %v234_v12 = vpop.f32.mrb[2].mxu1  ;;  %v5685_v13 = vpop.f32.mrb[12].mxu0 }
 0x1bb   :  { %v6656_v14 = vpop.f32.mrb[3].mxu1  ;;  %v544_v15 = vpop.f32.mrb[13].mxu0  ;;  %v6658_v16 = vpack.i.bf16 %v234_v12, %v228_v10  ;;  %v6660_v17 = vpack.c.bf16 %v234_v12, %v228_v10  ;;  %v6706_v10 = vsub.s32 3, %v564_v33 }
 0x1bc   :  { %v6032_v18 = vpack.c.bf16 %v6656_v14, %v6654_v11  ;;  %555 = vperm.xlu1 %6163, %v544_v15   ;;  %608 = vperm.xlu0 %6162, %v544_v15   ;;  %v6666_v19 = vpack.i.bf16 %v6656_v14, %v6654_v11 }
 0x1be   :  { %v6668_v20 = vpop.f32.mrb[4].mxu1 }
 0x1bf   :  { %v6670_v21 = vpop.f32.mrb[5].mxu1 }
 0x1c0   :  { %v6048_v22 = vpack.c.bf16 %v6668_v20, %v6670_v21  ;;  %560 = vperm.xlu1 %6163, %v5685_v13   ;;  %612 = vperm.xlu0 %6162, %v5685_v13   ;;  %v6676_v23 = vpack.i.bf16 %v6668_v20, %v6670_v21 }
 0x1c3   :  { %v6684_v28 = vpop.f32.mrb[14].mxu0 }
 0x1c4   :  { %6165 = vset.pattern.permute.xlu1 %v6432_v24  ;;  %6164 = vset.pattern.permute.xlu0 %v6432_v24  ;;  %v5720_v29 = vpop.f32.mrb[15].mxu0 }
 0x1c5   :  { %834 = vperm.xlu1 %6165, %v5685_v13   ;;  %830 = vperm.xlu0 %6164, %v544_v15  }
 0x1c7   :  { %v6686_v30 = vpop.f32.mrb[16].mxu0 }
 0x1c8   :  { %v5725_v31 = vpop.f32.mrb[17].mxu0 }
 0x1c9   :  { %6166 = vset.pattern.permute.xlu1 %v6433_v25  ;;  %6167 = vset.pattern.permute.xlu0 %v6433_v25 }
 0x1ca   :  { %971 = vperm.xlu1 %6166, %v544_v15   ;;  %975 = vperm.xlu0 %6167, %v5685_v13  }
 0x1cb   :  { %v471_v26 = vpop.f32.mrb[6].mxu1 }
 0x1cc   :  { %v5680_v27 = vpop.f32.mrb[7].mxu1  ;;  %v566_v36 = vrot.slane %v471_v26, %v6688_v34  ;;  %v618_v37 = vrot.slane %v471_v26, %v6690_v35  ;;  %v840_v62 = vrot.slane %v471_v26, %v6697_v48 }
 0x1ce   :  { %6183 = vset.pattern.permute.xlu1 %v6430_v6  ;;  %6185 = vset.pattern.permute.xlu0 %v6431_v7 }
 0x23b   :  { %v556_v38 = vpop.permute.xlu1 %555  ;;  %v609_v39 = vpop.permute.xlu0 %608 }
 0x23c   :  { %v567_v40 = vadd.f32 %v566_v36, %v556_v38  ;;  %v619_v41 = vadd.f32 %v618_v37, %v609_v39  ;;  %v981_v38 = vrot.slane %v471_v26, %v6706_v10 }
 0x23e   :  { %v571_v44 = vmul.f32 0.2, %v567_v40  ;;  %v623_v45 = vmul.f32 0.2, %v619_v41  ;;  %vm621_vm4 = vcmp.ge.f32.partialorder %v619_v41, 0.0  ;;  %vm569_vm5 = vcmp.ge.f32.partialorder %v567_v40, 0.0 }
 0x23f   :  { %v561_v46 = vpop.permute.xlu1 %560  ;;  %v613_v47 = vpop.permute.xlu0 %612 }
 0x240   :  { %v568_v49 = vadd.f32 %v566_v36, %v561_v46  ;;  %v620_v51 = vadd.f32 %v618_v37, %v613_v47  ;;  %v625_v52 = vsel %vm621_vm4, %v619_v41, %v623_v45  ;;  %v573_v53 = vsel %vm569_vm5, %v567_v40, %v571_v44 }
 0x241   :  { %v627_v54 = vadd.f32 %v625_v52, %v398_v42  ;;  %v6699_v57 = vadd.f32 %v573_v53, %v398_v42 }
 0x242   :  { %v572_v60 = vmul.f32 0.2, %v568_v49  ;;  %v624_v61 = vmul.f32 0.2, %v620_v51  ;;  %vm622_vm6 = vcmp.ge.f32.partialorder %v620_v51, 0.0  ;;  %vm570_vm7 = vcmp.ge.f32.partialorder %v568_v49, 0.0 }
 0x243   :  { %v629_v63 = vsel %vm32_vm1, %v627_v54, -inf  ;;  %v577_v29 = vsel %vm32_vm1, %v6699_v57, -inf }
 0x244   :  { %v835_v1 = vpop.permute.xlu1 %834  ;;  %630 = vmax.xlane.f32.xlu1 %v629_v63  ;;  %v831_v2 = vpop.permute.xlu0 %830  ;;  %v626_v5 = vsel %vm622_vm6, %v620_v51, %v624_v61  ;;  %v574_v12 = vsel %vm570_vm7, %v568_v49, %v572_v60 }
 0x245   :  { %v842_v13 = vadd.f32 %v840_v62, %v835_v1  ;;  %v841_v15 = vadd.f32 %v840_v62, %v831_v2  ;;  %v628_v27 = vadd.f32 %v626_v5, %v399_v59  ;;  %v576_v37 = vadd.f32 %v574_v12, %v399_v59 }
 0x247   :  { %v846_v31 = vmul.f32 0.2, %v842_v13  ;;  %v845_v32 = vmul.f32 0.2, %v841_v15  ;;  %v632_v36 = vsel %vm32_vm1, %v628_v27, -inf  ;;  %vm843_vm8 = vcmp.ge.f32.partialorder %v841_v15, 0.0 }
 0x248   :  { %578 = vmax.xlane.f32.xlu1 %v577_v29  ;;  %633 = vmax.xlane.f32.xlu0 %v632_v36  ;;  %vm844_vm9 = vcmp.ge.f32.partialorder %v842_v13, 0.0  ;;  %v580_v47 = vsel %vm32_vm1, %v576_v37, -inf }
 0x249   :  { %v972_v33 = vpop.permute.xlu1 %971  ;;  %v976_v39 = vpop.permute.xlu0 %975  ;;  %v847_v40 = vsel %vm843_vm8, %v841_v15, %v845_v32  ;;  %v848_v41 = vsel %vm844_vm9, %v842_v13, %v846_v31 }
 0x24a   :  { %v982_v44 = vadd.f32 %v981_v38, %v972_v33  ;;  %v983_v45 = vadd.f32 %v981_v38, %v976_v39  ;;  %v849_v46 = vadd.f32 %v847_v40, %v398_v42  ;;  %v850_v49 = vadd.f32 %v848_v41, %v399_v59 }
 0x24c   :  { %v986_v51 = vmul.f32 0.2, %v982_v44  ;;  %v987_v52 = vmul.f32 0.2, %v983_v45  ;;  %581 = vmax.xlane.f32.xlu0 %v580_v47  ;;  %v851_v53 = vsel %vm32_vm1, %v849_v46, -inf  ;;  %vm984_vm10 = vcmp.ge.f32.partialorder %v982_v44, 0.0 }
 0x24d   :  { %852 = vmax.xlane.f32.xlu1 %v851_v53  ;;  %vm985_vm11 = vcmp.ge.f32.partialorder %v983_v45, 0.0  ;;  %v854_v61 = vsel %vm32_vm1, %v850_v49, -inf }
 0x24e   :  { %v988_v26 = vsel %vm984_vm10, %v982_v44, %v986_v51  ;;  %v989_v60 = vsel %vm985_vm11, %v983_v45, %v987_v52  ;;  %v396_v45 = vld [vmem:[%s7660_s1] sm:$0xff] }
 0x24f   :  { %v990_v62 = vadd.f32 %v988_v26, %v398_v42  ;;  %v991_v63 = vadd.f32 %v989_v60, %v399_v59 }
 0x250   :  { %855 = vmax.xlane.f32.xlu0 %v854_v61 }
 0x251   :  { %v992_v1 = vsel %vm32_vm1, %v990_v62, -inf  ;;  %v995_v2 = vsel %vm32_vm1, %v991_v63, -inf }
 0x252   :  { %993 = vmax.xlane.f32.xlu1 %v992_v1 }
 0x254   :  { %996 = vmax.xlane.f32.xlu0 %v995_v2 }
 0x263   :  { %6169 = vrot.lane.b32.xlu1 %v6658_v16, %s6434_s15 }
 0x2d1   :  { %v631_v5 = vpop.xlane.xlu1 %630 }
 0x2d2   :  { %v635_v12 = vsub.f32 %v627_v54, %v631_v5 }
 0x2d4   :  { %v637_v13 = vmul.f32 1.442695, %v635_v12 }
 0x2d5   :  { %v579_v15 = vpop.xlane.xlu1 %578  ;;  %v634_v29 = vpop.xlane.xlu0 %633 }
 0x2d6   :  { %6253 = vpow2.f32 %v637_v13  ;;  %v583_v42 = vsub.f32 %v6699_v57, %v579_v15  ;;  %v636_v59 = vsub.f32 %v628_v27, %v634_v29 }
 0x2d8   :  { %v585_v31 = vmul.f32 1.442695, %v583_v42  ;;  %v639_v32 = vmul.f32 1.442695, %v636_v59 }
 0x2d9   :  { %v582_v36 = vpop.xlane.xlu0 %581 }
 0x2da   :  { %6255 = vpow2.f32 %v585_v31  ;;  %v584_v38 = vsub.f32 %v576_v37, %v582_v36  ;;  %v853_v33 = vpop.xlane.xlu1 %852 }
 0x2db   :  { %6257 = vpow2.f32 %v639_v32  ;;  %v857_v39 = vsub.f32 %v849_v46, %v853_v33 }
 0x2dc   :  { %v587_v40 = vmul.f32 1.442695, %v584_v38 }
 0x2dd   :  { %v859_v41 = vmul.f32 1.442695, %v857_v39  ;;  %v856_v44 = vpop.xlane.xlu0 %855 }
 0x2de   :  { %6259 = vpow2.f32 %v587_v40  ;;  %v858_v54 = vsub.f32 %v850_v49, %v856_v44  ;;  %v397_v49 = vld [vmem:[%s7660_s1 + $0x8] sm:$0xff] }
 0x2df   :  { %6261 = vpow2.f32 %v859_v41  ;;  %v994_v57 = vpop.xlane.xlu1 %993 }
 0x2e0   :  { %v6254_v27 = vpop.eup %6253  ;;  %v861_v47 = vmul.f32 1.442695, %v858_v54  ;;  %v998_v51 = vsub.f32 %v990_v62, %v994_v57 }
 0x2e1   :  { %v997_v52 = vpop.xlane.xlu0 %996  ;;  %v6723_v53 = vmul.f32 %v6254_v27, %v396_v45 }
 0x2e2   :  { %6263 = vpow2.f32 %v861_v47  ;;  %v999_v37 = vsub.f32 %v991_v63, %v997_v52  ;;  %v1000_v46 = vmul.f32 1.442695, %v998_v51 }
 0x2e3   :  { %v6170_v26 = vpop.permute.xlu1 %6169  ;;  %v643_v60 = vsel %vm32_vm1, %v6723_v53, 0.0 }
 0x2e4   :  { %v6256_v61 = vpop.eup %6255  ;;  %v1002_v1 = vmul.f32 1.442695, %v999_v37  ;;  %v6172_v2 = vunpack.i.h.bf16 %v6170_v26  ;;  %v6171_v5 = vunpack.i.l.bf16 %v6170_v26  ;;  %644 = vadd.xlane.f32.xlu1 %v643_v60 }
 0x2e5   :  { %v6258_v62 = vpop.eup %6257  ;;  %v6730_v12 = vmul.f32 %v6256_v61, %v396_v45 }
 0x2e6   :  { %6265 = vpow2.f32 %v1002_v1  ;;  %v6008_v13 = vpack.c.bf16 %v6172_v2, %v6171_v5  ;;  %v6732_v63 = vmul.f32 %v6258_v62, %v397_v49 }
 0x2e7   :  { %6267 = vpow2.f32 %v1000_v46  ;;  %v591_v15 = vsel %vm32_vm1, %v6730_v12, 0.0 }
 0x2e8   :  { %v6260_v29 = vpop.eup %6259  ;;  %592 = vadd.xlane.f32.xlu1 %v591_v15  ;;  %6009 = vmatprep.subr.bf16.mxu1 %v6008_v13  ;;  %v646_v42 = vsel %vm32_vm1, %v6732_v63, 0.0 }
 0x2e9   :  { %v6262_v59 = vpop.eup %6261  ;;  %647 = vadd.xlane.f32.xlu0 %v646_v42  ;;  %6011 = vmatpush3.bf16.msra.mxu1 %v6008_v13  ;;  %v6738_v31 = vmul.f32 %v6260_v29, %v397_v49 }
 0x2ea   :  { %6013 = vmatprep.subr.bf16.mxu1 %v6660_v17  ;;  %v6741_v32 = vmul.f32 %v6262_v59, %v396_v45 }
 0x2eb   :  { %v594_v36 = vsel %vm32_vm1, %v6738_v31, 0.0 }
 0x2ec   :  { %v6264_v38 = vpop.eup %6263  ;;  %v865_v33 = vsel %vm32_vm1, %v6741_v32, 0.0 }
 0x2ed   :  { %595 = vadd.xlane.f32.xlu0 %v594_v36  ;;  %866 = vadd.xlane.f32.xlu1 %v865_v33  ;;  %v6747_v39 = vmul.f32 %v6264_v38, %v397_v49 }
 0x2ef   :  { %v868_v40 = vsel %vm32_vm1, %v6747_v39, 0.0 }
 0x2f0   :  { %v6266_v41 = vpop.eup %6265 }
 0x2f1   :  { %v6268_v44 = vpop.eup %6267  ;;  %869 = vadd.xlane.f32.xlu0 %v868_v40  ;;  %v6751_v54 = vmul.f32 %v6266_v41, %v397_v49 }
 0x2f2   :  { %v6755_v27 = vmul.f32 %v6268_v44, %v396_v45 }
 0x2f3   :  { %v1009_v57 = vsel %vm32_vm1, %v6751_v54, 0.0 }
 0x2f4   :  { %v1006_v47 = vsel %vm32_vm1, %v6755_v27, 0.0 }
 0x2f5   :  { %1010 = vadd.xlane.f32.xlu0 %v1009_v57 }
 0x2f9   :  { %1007 = vadd.xlane.f32.xlu0 %v1006_v47 }
 0x2fe   :  { %6179 = vrot.lane.b32.xlu1 %v6658_v16, %s6435_s20 }
 0x302   :  { %1303 = vperm.xlu1 %6183, %v6686_v30  }
 0x30f   :  { %6174 = vrot.lane.b32.xlu0 %v6658_v16, %s6436_s21 }
 0x371   :  { %v645_v51 = vpop.xlane.xlu1 %644 }
 0x372   :  { %vm649_vm12 = vcmp.gt.f32.partialorder %v645_v51, 0.0 }
 0x373   :  { %v651_v52 = vsel %vm649_vm12, %v645_v51, 1.0 }
 0x374   :  { %6269 = vrcp.f32 %v651_v52 }
 0x375   :  { %v593_v45 = vpop.xlane.xlu1 %592 }
 0x376   :  { %vm597_vm13 = vcmp.gt.f32.partialorder %v593_v45, 0.0  ;;  %v648_v37 = vpop.xlane.xlu0 %647 }
 0x377   :  { %v599_v46 = vsel %vm597_vm13, %v593_v45, 1.0  ;;  %vm650_vm14 = vcmp.gt.f32.partialorder %v648_v37, 0.0 }
 0x378   :  { %6271 = vrcp.f32 %v599_v46  ;;  %v652_v26 = vsel %vm650_vm14, %v648_v37, 1.0 }
 0x379   :  { %6273 = vrcp.f32 %v652_v26 }
 0x37a   :  { %v596_v60 = vpop.xlane.xlu0 %595  ;;  %v867_v49 = vpop.xlane.xlu1 %866 }
 0x37b   :  { %vm598_vm15 = vcmp.gt.f32.partialorder %v596_v60, 0.0  ;;  %vm871_vm4 = vcmp.gt.f32.partialorder %v867_v49, 0.0 }
 0x37c   :  { %v600_v61 = vsel %vm598_vm15, %v596_v60, 1.0  ;;  %v873_v1 = vsel %vm871_vm4, %v867_v49, 1.0  ;;  %v1710_v49 = vld [vmem:[%s7657_s2 + $0x4c] sm:$0xf] }
 0x37d   :  { %6275 = vrcp.f32 %v600_v61 }
 0x37e   :  { %v6270_v2 = vpop.eup %6269  ;;  %v870_v16 = vpop.xlane.xlu0 %869  ;;  %6277 = vrcp.f32 %v873_v1 }
 0x37f   :  { %v657_v5 = vmul.f32 %v6270_v2, %v6723_v53  ;;  %vm872_vm5 = vcmp.gt.f32.partialorder %v870_v16, 0.0  ;;  %v6180_v53 = vpop.permute.xlu1 %6179 }
 0x380   :  { %v874_v42 = vsel %vm872_vm5, %v870_v16, 1.0  ;;  %v6181_v44 = vunpack.i.l.bf16 %v6180_v53 }
 0x381   :  { %5690 = vmatprep.mubr.msk.f32.mxu1 %vm32_vm1, %v657_v5  ;;  %6279 = vrcp.f32 %v874_v42  ;;  %v1121_v42 = vld [vmem:[%s7660_s1 + $0x30] sm:$0xff] }
 0x382   :  { %v6272_v62 = vpop.eup %6271  ;;  %v1011_v13 = vpop.xlane.xlu0 %1010 }
 0x383   :  { %v6274_v15 = vpop.eup %6273  ;;  %v605_v29 = vmul.f32 %v6272_v62, %v6730_v12  ;;  %vm1013_vm7 = vcmp.gt.f32.partialorder %v1011_v13, 0.0  ;;  %v6182_v12 = vunpack.i.h.bf16 %v6180_v53  ;;  %v1309_v62 = vrot.slane %v6684_v28, %v6690_v35 }
 0x384   :  { %v658_v59 = vmul.f32 %v6274_v15, %v6732_v63  ;;  %v1015_v47 = vsel %vm1013_vm7, %v1011_v13, 1.0  ;;  %v1304_v13 = vpop.permute.xlu1 %1303 }
 0x385   :  { %v6020_v45 = vpack.c.bf16 %v6182_v12, %v6181_v44  ;;  %v1310_v15 = vadd.f32 %v1309_v62, %v1304_v13  ;;  %v6834_v44 = vld [vmem:[%s7660_s1 + $0x50] sm:$0xff] }
 0x386   :  { %5691 = vmatmul.mubr.msk.f32.vlgmr.msra.gmra.mrb[8].mxu1 %vm32_vm1, %v658_v59  ;;  %v1008_v36 = vpop.xlane.xlu0 %1007 }
 0x387   :  { %6015 = vmatpush3.bf16.msra.mxu1 %v6660_v17  ;;  %vm1012_vm6 = vcmp.gt.f32.partialorder %v1008_v36, 0.0  ;;  %5697 = vmatprep.mubr.msk.f32.mxu1 %vm32_vm1, %v605_v29  ;;  %v6276_v33 = vpop.eup %6275  ;;  %v1312_v29 = vmul.f32 0.2, %v1310_v15  ;;  %vm1311_vm8 = vcmp.ge.f32.partialorder %v1310_v15, 0.0 }
 0x388   :  { %v1014_v38 = vsel %vm1012_vm6, %v1008_v36, 1.0  ;;  %v6278_v40 = vpop.eup %6277  ;;  %v606_v51 = vmul.f32 %v6276_v33, %v6738_v31 }
 0x389   :  { %6281 = vrcp.f32 %v1014_v38  ;;  %v879_v17 = vmul.f32 %v6278_v40, %v6741_v32  ;;  %v1313_v59 = vsel %vm1311_vm8, %v1310_v15, %v1312_v29 }
 0x38a   :  { %v6175_v41 = vpop.permute.xlu0 %6174  ;;  %6283 = vrcp.f32 %v1015_v47  ;;  %v1314_v36 = vadd.f32 %v1313_v59, %v1121_v42  ;;  %v1281_v47 = vrot.slane %v6684_v28, %v6688_v34 }
 0x38b   :  { %v6177_v57 = vunpack.i.h.bf16 %v6175_v41  ;;  %v6176_v63 = vunpack.i.l.bf16 %v6175_v41  ;;  %v6280_v37 = vpop.eup %6279 }
 0x38c   :  { %v880_v26 = vmul.f32 %v6280_v37, %v6747_v39  ;;  %v31_v39 = vld [vmem:[%s7657_s2 + $0x30] sm:$0xff] }
 0x38d   :  { %v6016_v52 = vpack.c.bf16 %v6177_v57, %v6176_v63 }
 0x38e   :  { %5698 = vmatmul.mubr.msk.f32.vlgmr.msra.gmra.mrb[8].mxu1 %vm32_vm1, %v606_v51  ;;  %v1599_v51 = vrot.slane %v6684_v28, %v6706_v10 }
 0x38f   :  { %6017 = vmatprep.subr.bf16.mxu1 %v6016_v52  ;;  %5704 = vmatprep.mubr.msk.f32.mxu1 %vm32_vm1, %v879_v17 }
 0x390   :  { %6019 = vmatpush3.bf16.msra.mxu1 %v6016_v52 }
 0x391   :  { %6021 = vmatprep.subr.bf16.mxu1 %v6020_v45 }
 0x393   :  { %v6282_v46 = vpop.eup %6281 }
 0x394   :  { %v1020_v60 = vmul.f32 %v6282_v46, %v6755_v27  ;;  %v6284_v31 = vpop.eup %6283  ;;  %v1709_v27 = vld [vmem:[%s7657_s2 + $0x48] sm:$0xf] }
 0x395   :  { %v1021_v32 = vmul.f32 %v6284_v31, %v6751_v54  ;;  %v135_v54 = vadd.f32 %v6646_v4, %v31_v39 }
 0x396   :  { %5705 = vmatmul.mubr.msk.f32.vlgmr.msra.gmra.mrb[8].mxu1 %vm32_vm1, %v880_v26 }
 0x397   :  { %6023 = vmatpush3.bf16.msra.mxu1 %v6020_v45  ;;  %5711 = vmatprep.mubr.msk.f32.mxu1 %vm32_vm1, %v1020_v60 }
 0x398   :  { %6040 = vmatprep.subr.bf16.mxu1 %v6427_v0 }
 0x39e   :  { %5712 = vmatmul.mubr.msk.f32.vlgmr.msra.gmra.mrb[8].mxu1 %vm32_vm1, %v1021_v32 }
 0x39f   :  { %5758 = vmatprep.mubr.msk.f32.mxu1 %vm6428_vm0, %v6429_v3 }
 0x3a0   :  { %6043 = vmatpush3.bf16.xpose.msk.msra.mxu1 %vm6597_vm3, %v6607_v58  ;;  %v142_v58 = vmax.f32 %v135_v54, 0.0  ;;  %v1491_v54 = vrot.slane %v6684_v28, %v6697_v48 }
 0x3a1   :  { %5761 = vmatprep.subr.mxu1 %v6429_v3 }
 0x3a7   :  { %5759 = vmatmul.mubr.msk.f32.vlgmr.msra.gmra.mrb[10].mxu1 %vm155_vm2, %v1709_v27 }
 0x3a8   :  { %5762 = vmatpush3.xpose.msk.msra.mxu1 %vm155_vm2, %v1710_v49  ;;  %5763 = vmatprep.mubr.msk.f32.mxu1 %vm6428_vm0, %v6429_v3 }
 0x3a9   :  { %6044 = vmatprep.subr.bf16.mxu1 %v6427_v0 }
 0x3ab   :  { %5764 = vmatmul.mubr.msk.f32.vlgmr.msra.gmra.mrb[12].mxu1 %vm155_vm2, %v142_v58 }
 0x3ac   :  { %5770 = vmatprep.mubr.msk.f32.mxu1 %vm6428_vm0, %v6429_v3 }
 0x471   :  { %v6806_v4 = vpop.f32.mrb[8].mxu1 }
 0x472   :  { %v6808_v61 = vpop.f32.mrb[9].mxu1 }
 0x47a   :  { %v6810_v1 = vpop.f32.mrb[10].mxu1 }
 0x47b   :  { %v5760_v2 = vpop.f32.mrb[11].mxu1  ;;  %v1868_v53 = vrot.slane %v6810_v1, %v6688_v34  ;;  %v1896_v38 = vrot.slane %v6810_v1, %v6690_v35  ;;  %v2078_v15 = vrot.slane %v6810_v1, %v6697_v48 }
 0x47e   :  { %v1856_v16 = vpop.f32.mrb[12].mxu1 }
 0x47f   :  { %1862 = vperm.xlu0 %6185, %v1856_v16   ;;  %v5765_v5 = vpop.f32.mrb[13].mxu1  ;;  %1890 = vperm.xlu1 %6183, %v1856_v16  }
 0x483   :  { %6187 = vset.pattern.permute.xlu0 %v6433_v25  ;;  %6184 = vset.pattern.permute.xlu1 %v6431_v7 }
 0x484   :  { %1593 = vperm.xlu0 %6187, %v6686_v30   ;;  %1275 = vperm.xlu1 %6184, %v6686_v30  }
 0x488   :  { %6186 = vset.pattern.permute.xlu1 %v6432_v24  ;;  %6220 = vset.pattern.permute.xlu0 %v6431_v7 }
 0x489   :  { %1485 = vperm.xlu1 %6186, %v6686_v30   ;;  %v1315_v30 = vsel %vm32_vm1, %v1314_v36, -inf }
 0x48d   :  { %2072 = vperm.xlu1 %6186, %v1856_v16  }
 0x491   :  { %6188 = vset.pattern.permute.xlu1 %v6433_v25 }
 0x492   :  { %2180 = vperm.xlu1 %6188, %v1856_v16  }
 0x496   :  { %6219 = vset.pattern.permute.xlu1 %v6430_v6 }
 0x4b6   :  { %1316 = vmax.xlane.f32.xlu1 %v1315_v30 }
 0x4fe   :  { %v1863_v33 = vpop.permute.xlu0 %1862  ;;  %v1891_v40 = vpop.permute.xlu1 %1890 }
 0x4ff   :  { %v1869_v41 = vadd.f32 %v1868_v53, %v1863_v33  ;;  %v1897_v12 = vadd.f32 %v1896_v38, %v1891_v40 }
 0x501   :  { %vm1870_vm9 = vcmp.ge.f32.partialorder %v1869_v41, 0.0  ;;  %v1871_v57 = vmul.f32 0.2, %v1869_v41  ;;  %v1899_v63 = vmul.f32 0.2, %v1897_v12  ;;  %vm1898_vm10 = vcmp.ge.f32.partialorder %v1897_v12, 0.0 }
 0x503   :  { %v1594_v52 = vpop.permute.xlu0 %1593  ;;  %v1276_v17 = vpop.permute.xlu1 %1275  ;;  %v1872_v45 = vsel %vm1870_vm9, %v1869_v41, %v1871_v57  ;;  %v1900_v37 = vsel %vm1898_vm10, %v1897_v12, %v1899_v63 }
 0x504   :  { %v1282_v46 = vadd.f32 %v1281_v47, %v1276_v17  ;;  %v6841_v26 = vadd.f32 %v1872_v45, %v6834_v44  ;;  %v6844_v60 = vadd.f32 %v1900_v37, %v6834_v44  ;;  %v1600_v31 = vadd.f32 %v1599_v51, %v1594_v52  ;;  %v1120_v45 = vld [vmem:[%s7660_s1 + $0x20] sm:$0xff] }
 0x506   :  { %v1284_v32 = vmul.f32 0.2, %v1282_v46  ;;  %v1874_v39 = vsel %vm32_vm1, %v6841_v26, -inf  ;;  %v1902_v27 = vsel %vm32_vm1, %v6844_v60, -inf  ;;  %vm1283_vm11 = vcmp.ge.f32.partialorder %v1282_v46, 0.0 }
 0x507   :  { %1875 = vmax.xlane.f32.xlu1 %v1874_v39  ;;  %1903 = vmax.xlane.f32.xlu0 %v1902_v27  ;;  %v1602_v2 = vmul.f32 0.2, %v1600_v31  ;;  %vm1601_vm12 = vcmp.ge.f32.partialorder %v1600_v31, 0.0 }
 0x508   :  { %v1486_v49 = vpop.permute.xlu1 %1485  ;;  %v1285_v58 = vsel %vm1283_vm11, %v1282_v46, %v1284_v32 }
 0x509   :  { %v1492_v16 = vadd.f32 %v1491_v54, %v1486_v49  ;;  %v1286_v5 = vadd.f32 %v1285_v58, %v1121_v42  ;;  %v1603_v28 = vsel %vm1601_vm12, %v1600_v31, %v1602_v2 }
 0x50a   :  { %v1604_v40 = vadd.f32 %v1603_v28, %v1121_v42 }
 0x50b   :  { %v1494_v62 = vmul.f32 0.2, %v1492_v16  ;;  %v1287_v13 = vsel %vm32_vm1, %v1286_v5, -inf  ;;  %vm1493_vm13 = vcmp.ge.f32.partialorder %v1492_v16, 0.0 }
 0x50c   :  { %1288 = vmax.xlane.f32.xlu0 %v1287_v13  ;;  %v2073_v29 = vpop.permute.xlu1 %2072  ;;  %v1605_v57 = vsel %vm32_vm1, %v1604_v40, -inf }
 0x50d   :  { %v2079_v59 = vadd.f32 %v2078_v15, %v2073_v29  ;;  %v1495_v30 = vsel %vm1493_vm13, %v1492_v16, %v1494_v62  ;;  %v2186_v62 = vrot.slane %v6810_v1, %v6706_v10  ;;  %vm2475_vm13 = vcmask 64512  }
 0x50e   :  { %v1496_v53 = vadd.f32 %v1495_v30, %v1121_v42 }
 0x50f   :  { %v2081_v38 = vmul.f32 0.2, %v2079_v59  ;;  %vm2080_vm14 = vcmp.ge.f32.partialorder %v2079_v59, 0.0 }
 0x510   :  { %v1497_v33 = vsel %vm32_vm1, %v1496_v53, -inf }
 0x511   :  { %1498 = vmax.xlane.f32.xlu0 %v1497_v33  ;;  %v2082_v41 = vsel %vm2080_vm14, %v2079_v59, %v2081_v38  ;;  %v2181_v47 = vpop.permute.xlu1 %2180 }
 0x512   :  { %v2083_v12 = vadd.f32 %v2082_v41, %v6834_v44  ;;  %v2187_v15 = vadd.f32 %v2186_v62, %v2181_v47 }
 0x514   :  { %v2084_v63 = vsel %vm32_vm1, %v2083_v12, -inf  ;;  %v2189_v30 = vmul.f32 0.2, %v2187_v15  ;;  %vm2188_vm15 = vcmp.ge.f32.partialorder %v2187_v15, 0.0 }
 0x515   :  { %1606 = vmax.xlane.f32.xlu0 %v1605_v57  ;;  %2085 = vmax.xlane.f32.xlu1 %v2084_v63 }
 0x516   :  { %v2190_v1 = vsel %vm2188_vm15, %v2187_v15, %v2189_v30 }
 0x517   :  { %v2191_v41 = vadd.f32 %v2190_v1, %v6834_v44 }
 0x519   :  { %v2192_v57 = vsel %vm32_vm1, %v2191_v41, -inf }
 0x543   :  { %v1317_v51 = vpop.xlane.xlu1 %1316 }
 0x544   :  { %v1318_v52 = vsub.f32 %v1314_v36, %v1317_v51 }
 0x546   :  { %v1319_v17 = vmul.f32 1.442695, %v1318_v52 }
 0x548   :  { %6285 = vpow2.f32 %v1319_v17 }
 0x552   :  { %v6286_v42 = vpop.eup %6285 }
 0x553   :  { %v6862_v37 = vmul.f32 %v6286_v42, %v1120_v45 }
 0x555   :  { %v1322_v46 = vsel %vm32_vm1, %v6862_v37, 0.0 }
 0x556   :  { %1323 = vadd.xlane.f32.xlu0 %v1322_v46 }
 0x594   :  { %v1904_v31 = vpop.xlane.xlu0 %1903  ;;  %v1876_v47 = vpop.xlane.xlu1 %1875 }
 0x595   :  { %v1905_v63 = vsub.f32 %v6844_v60, %v1904_v31  ;;  %v1877_v52 = vsub.f32 %v6841_v26, %v1876_v47 }
 0x597   :  { %v1906_v51 = vmul.f32 1.442695, %v1905_v63 }
 0x599   :  { %v1289_v32 = vpop.xlane.xlu0 %1288 }
 0x59a   :  { %v1290_v39 = vsub.f32 %v1286_v5, %v1289_v32  ;;  %v1707_v32 = vld [vmem:[%s7660_s1 + $0x40] sm:$0xff] }
 0x59c   :  { %v1291_v27 = vmul.f32 1.442695, %v1290_v39 }
 0x59e   :  { %6287 = vpow2.f32 %v1291_v27  ;;  %v1499_v54 = vpop.xlane.xlu0 %1498 }
 0x59f   :  { %v1500_v36 = vsub.f32 %v1496_v53, %v1499_v54 }
 0x5a1   :  { %v1501_v49 = vmul.f32 1.442695, %v1500_v36 }
 0x5a2   :  { %v1607_v58 = vpop.xlane.xlu0 %1606  ;;  %v2086_v17 = vpop.xlane.xlu1 %2085 }
 0x5a3   :  { %6289 = vpow2.f32 %v1501_v49  ;;  %v1608_v2 = vsub.f32 %v1604_v40, %v1607_v58  ;;  %v2087_v44 = vsub.f32 %v2083_v12, %v2086_v17 }
 0x5a5   :  { %v1609_v16 = vmul.f32 1.442695, %v1608_v2  ;;  %v2088_v42 = vmul.f32 1.442695, %v2087_v44 }
 0x5a7   :  { %6291 = vpow2.f32 %v1609_v16 }
 0x5a8   :  { %v6288_v13 = vpop.eup %6287  ;;  %6293 = vpow2.f32 %v1906_v51 }
 0x5a9   :  { %v6868_v29 = vmul.f32 %v6288_v13, %v1120_v45 }
 0x5ab   :  { %v1294_v5 = vsel %vm32_vm1, %v6868_v29, 0.0 }
 0x5ac   :  { %1295 = vadd.xlane.f32.xlu0 %v1294_v5 }
 0x5ad   :  { %v6290_v59 = vpop.eup %6289 }
 0x5ae   :  { %v6872_v28 = vmul.f32 %v6290_v59, %v1120_v45 }
 0x5b0   :  { %v1504_v53 = vsel %vm32_vm1, %v6872_v28, 0.0 }
 0x5b1   :  { %v6292_v38 = vpop.eup %6291  ;;  %1505 = vadd.xlane.f32.xlu0 %v1504_v53 }
 0x5b2   :  { %v6876_v33 = vmul.f32 %v6292_v38, %v1120_v45  ;;  %v1878_v45 = vmul.f32 1.442695, %v1877_v52  ;;  %v6294_v46 = vpop.eup %6293 }
 0x5b3   :  { %v6891_v39 = vmul.f32 %v6294_v46, %v1707_v32 }
 0x5b4   :  { %v1612_v40 = vsel %vm32_vm1, %v6876_v33, 0.0  ;;  %6295 = vpow2.f32 %v1878_v45 }
 0x5b5   :  { %1613 = vadd.xlane.f32.xlu1 %v1612_v40  ;;  %6297 = vpow2.f32 %v2088_v42  ;;  %v1909_v60 = vsel %vm32_vm1, %v6891_v39, 0.0 }
 0x5b9   :  { %2193 = vmax.xlane.f32.xlu1 %v2192_v57 }
 0x5be   :  { %v6296_v27 = vpop.eup %6295 }
 0x5bf   :  { %v6895_v31 = vmul.f32 %v6296_v27, %v1707_v32  ;;  %v6298_v26 = vpop.eup %6297 }
 0x5c0   :  { %v6899_v54 = vmul.f32 %v6298_v26, %v1707_v32 }
 0x5c1   :  { %v1881_v12 = vsel %vm32_vm1, %v6895_v31, 0.0 }
 0x5c2   :  { %v2091_v36 = vsel %vm32_vm1, %v6899_v54, 0.0 }
 0x5c7   :  { %6190 = vrot.lane.b32.xlu0 %v6666_v19, %s6434_s15 }
 0x5ca   :  { %6195 = vrot.lane.b32.xlu1 %v6676_v23, %s6434_s15 }
 0x5e3   :  { %v1324_v49 = vpop.xlane.xlu0 %1323 }
 0x5e4   :  { %vm1325_vm4 = vcmp.gt.f32.partialorder %v1324_v49, 0.0 }
 0x5e5   :  { %v1326_v58 = vsel %vm1325_vm4, %v1324_v49, 1.0 }
 0x5e6   :  { %6299 = vrcp.f32 %v1326_v58 }
 0x5ee   :  { %1910 = vadd.xlane.f32.xlu1 %v1909_v60 }
 0x5f0   :  { %v6300_v30 = vpop.eup %6299 }
 0x5f2   :  { %1882 = vadd.xlane.f32.xlu1 %v1881_v12 }
 0x5f6   :  { %2092 = vadd.xlane.f32.xlu1 %v2091_v36 }
 0x607   :  { %6200 = vrot.lane.b32.xlu1 %v6666_v19, %s6436_s21 }
 0x60b   :  { %6205 = vrot.lane.b32.xlu1 %v6676_v23, %s6436_s21 }
 0x60f   :  { %6210 = vrot.lane.b32.xlu1 %v6666_v19, %s6435_s20 }
 0x613   :  { %6215 = vrot.lane.b32.xlu1 %v6676_v23, %s6435_s20  ;;  %v1329_v23 = vmul.f32 %v6300_v30, %v6862_v37 }
 0x639   :  { %v1296_v2 = vpop.xlane.xlu0 %1295 }
 0x63a   :  { %vm1297_vm5 = vcmp.gt.f32.partialorder %v1296_v2, 0.0 }
 0x63b   :  { %v1298_v62 = vsel %vm1297_vm5, %v1296_v2, 1.0 }
 0x63c   :  { %6301 = vrcp.f32 %v1298_v62 }
 0x63e   :  { %v1506_v16 = vpop.xlane.xlu0 %1505 }
 0x63f   :  { %vm1507_vm6 = vcmp.gt.f32.partialorder %v1506_v16, 0.0 }
 0x640   :  { %v1508_v52 = vsel %vm1507_vm6, %v1506_v16, 1.0 }
 0x642   :  { %v6191_v13 = vpop.permute.xlu0 %6190  ;;  %v1614_v15 = vpop.xlane.xlu1 %1613 }
 0x643   :  { %v6193_v5 = vunpack.i.h.bf16 %v6191_v13  ;;  %v6192_v59 = vunpack.i.l.bf16 %v6191_v13  ;;  %vm1615_vm9 = vcmp.gt.f32.partialorder %v1614_v15, 0.0 }
 0x644   :  { %v1616_v42 = vsel %vm1615_vm9, %v1614_v15, 1.0 }
 0x645   :  { %v6029_v53 = vpack.c.bf16 %v6193_v5, %v6192_v59 }
 0x646   :  { %v2194_v38 = vpop.xlane.xlu1 %2193 }
 0x647   :  { %v2195_v19 = vsub.f32 %v2191_v41, %v2194_v38  ;;  %6030 = vmatpush3.bf16.msra.mxu0 %v6029_v53  ;;  %v6302_v41 = vpop.eup %6301 }
 0x648   :  { %6031 = vmatprep.subr.bf16.mxu0 %v6427_v0  ;;  %v1301_v47 = vmul.f32 %v6302_v41, %v6868_v29  ;;  %v3014_v41 = vld [vmem:[%s7657_s2 + $0x5c] sm:$0xf] }
 0x649   :  { %v2196_v1 = vmul.f32 1.442695, %v2195_v19 }
 0x64a   :  { %5731 = vmatmul.mubr.msk.f32.vlgmr.msra.gmra.mrb[18].mxu0 %vm32_vm1, %v1329_v23  ;;  %v6196_v40 = vpop.permute.xlu1 %6195 }
 0x64b   :  { %6303 = vpow2.f32 %v2196_v1  ;;  %v6198_v57 = vunpack.i.h.bf16 %v6196_v40  ;;  %v6197_v63 = vunpack.i.l.bf16 %v6196_v40  ;;  %6033 = vmatpush3.bf16.msra.mxu0 %v6032_v18  ;;  %5737 = vmatprep.mubr.msk.f32.mxu0 %vm6428_vm0, %v6429_v3  ;;  %v2298_v1 = vld [vmem:[%s7657_s2 + $0x50] sm:$0xf] }
 0x64c   :  { %6034 = vmatprep.subr.bf16.mxu0 %v6427_v0 }
 0x64d   :  { %v6045_v37 = vpack.c.bf16 %v6198_v57, %v6197_v63 }
 0x64f   :  { %6046 = vmatpush3.bf16.msra.mxu1 %v6045_v37  ;;  %v3013_v37 = vld [vmem:[%s7657_s2 + $0x58] sm:$0xf] }
 0x650   :  { %6047 = vmatprep.subr.bf16.mxu1 %v6427_v0 }
 0x652   :  { %5738 = vmatmul.mubr.msk.f32.vlgmr.msra.gmra.mrb[18].mxu0 %vm32_vm1, %v1301_v47 }
 0x653   :  { %5744 = vmatprep.mubr.msk.f32.mxu0 %vm6428_vm0, %v6429_v3 }
 0x655   :  { %v6304_v51 = vpop.eup %6303 }
 0x656   :  { %v6925_v11 = vmul.f32 %v6304_v51, %v1707_v32 }
 0x658   :  { %v2199_v14 = vsel %vm32_vm1, %v6925_v11, 0.0 }
 0x659   :  { %2200 = vadd.xlane.f32.xlu0 %v2199_v14 }
 0x67b   :  { %v1911_v18 = vpop.xlane.xlu1 %1910 }
 0x67c   :  { %vm1912_vm7 = vcmp.gt.f32.partialorder %v1911_v18, 0.0 }
 0x67d   :  { %v1913_v17 = vsel %vm1912_vm7, %v1911_v18, 1.0 }
 0x67e   :  { %6305 = vrcp.f32 %v1913_v17 }
 0x67f   :  { %v1883_v29 = vpop.xlane.xlu1 %1882  ;;  %6307 = vrcp.f32 %v1508_v52 }
 0x680   :  { %vm1884_vm8 = vcmp.gt.f32.partialorder %v1883_v29, 0.0 }
 0x681   :  { %v1885_v45 = vsel %vm1884_vm8, %v1883_v29, 1.0 }
 0x682   :  { %6309 = vrcp.f32 %v1885_v45 }
 0x683   :  { %v2093_v44 = vpop.xlane.xlu1 %2092  ;;  %6311 = vrcp.f32 %v1616_v42 }
 0x684   :  { %vm2094_vm10 = vcmp.gt.f32.partialorder %v2093_v44, 0.0 }
 0x685   :  { %v2095_v26 = vsel %vm2094_vm10, %v2093_v44, 1.0 }
 0x686   :  { %6313 = vrcp.f32 %v2095_v26 }
 0x687   :  { %v6201_v46 = vpop.permute.xlu1 %6200 }
 0x688   :  { %v6306_v32 = vpop.eup %6305  ;;  %v6203_v27 = vunpack.i.h.bf16 %v6201_v46  ;;  %v6202_v60 = vunpack.i.l.bf16 %v6201_v46 }
 0x689   :  { %v1916_v12 = vmul.f32 %v6306_v32, %v6891_v39  ;;  %v6308_v36 = vpop.eup %6307 }
 0x68a   :  { %v6035_v49 = vpack.c.bf16 %v6203_v27, %v6202_v60  ;;  %v1511_v2 = vmul.f32 %v6308_v36, %v6872_v28  ;;  %v2296_v60 = vld [vmem:[%s7660_s1 + $0x70] sm:$0xff] }
 0x68b   :  { %v6206_v58 = vpop.permute.xlu1 %6205  ;;  %5771 = vmatmul.mubr.msk.f32.vlgmr.msra.gmra.mrb[14].mxu1 %vm32_vm1, %v1916_v12 }
 0x68c   :  { %6049 = vmatpush3.bf16.msra.mxu1 %v6048_v22  ;;  %6036 = vmatpush3.bf16.msra.mxu0 %v6035_v49  ;;  %v6310_v16 = vpop.eup %6309  ;;  %v6208_v39 = vunpack.i.h.bf16 %v6206_v58  ;;  %v6207_v62 = vunpack.i.l.bf16 %v6206_v58 }
 0x68d   :  { %5777 = vmatprep.mubr.msk.f32.mxu1 %vm6428_vm0, %v6429_v3  ;;  %6050 = vmatprep.subr.bf16.mxu1 %v6427_v0  ;;  %v1888_v20 = vmul.f32 %v6310_v16, %v6895_v31  ;;  %v6312_v21 = vpop.eup %6311 }
 0x68e   :  { %6037 = vmatprep.subr.bf16.mxu0 %v6427_v0  ;;  %v6051_v22 = vpack.c.bf16 %v6208_v39, %v6207_v62  ;;  %v1619_v30 = vmul.f32 %v6312_v21, %v6876_v33  ;;  %v2299_v33 = vld [vmem:[%s7657_s2 + $0x54] sm:$0xf] }
 0x68f   :  { %v6211_v13 = vpop.permute.xlu1 %6210  ;;  %5745 = vmatmul.mubr.msk.f32.vlgmr.msra.gmra.mrb[18].mxu0 %vm32_vm1, %v1511_v2  ;;  %v7012_v2 = vld [vmem:[%s7660_s1 + $0x78] sm:$0xff] }
 0x690   :  { %v6213_v15 = vunpack.i.h.bf16 %v6211_v13  ;;  %v6212_v5 = vunpack.i.l.bf16 %v6211_v13  ;;  %5751 = vmatprep.mubr.msk.f32.mxu0 %vm6428_vm0, %v6429_v3  ;;  %v6314_v53 = vpop.eup %6313 }
 0x691   :  { %v2098_v31 = vmul.f32 %v6314_v53, %v6899_v54 }
 0x692   :  { %v6038_v28 = vpack.c.bf16 %v6213_v15, %v6212_v5 }
 0x693   :  { %v6216_v59 = vpop.permute.xlu1 %6215  ;;  %5778 = vmatmul.mubr.msk.f32.vlgmr.msra.gmra.mrb[14].mxu1 %vm32_vm1, %v1888_v20 }
 0x694   :  { %6052 = vmatpush3.bf16.msra.mxu1 %v6051_v22  ;;  %6039 = vmatpush3.bf16.msra.mxu0 %v6038_v28  ;;  %v6218_v38 = vunpack.i.h.bf16 %v6216_v59  ;;  %v6217_v19 = vunpack.i.l.bf16 %v6216_v59 }
 0x695   :  { %5784 = vmatprep.mubr.msk.f32.mxu1 %vm6428_vm0, %v6429_v3  ;;  %6053 = vmatprep.subr.bf16.mxu1 %v6427_v0 }
 0x696   :  { %5794 = vmatprep.subr.mxu0 %v6429_v3  ;;  %v6054_v23 = vpack.c.bf16 %v6218_v38, %v6217_v19 }
 0x697   :  { %5752 = vmatmul.mubr.msk.f32.vlgmr.msra.gmra.mrb[18].mxu0 %vm32_vm1, %v1619_v30 }
 0x698   :  { %5796 = vmatprep.mubr.msk.f32.mxu0 %vm6428_vm0, %v6429_v3 }
 0x69b   :  { %5785 = vmatmul.mubr.msk.f32.vlgmr.msra.gmra.mrb[14].mxu1 %vm32_vm1, %v2098_v31 }
 0x69c   :  { %6055 = vmatpush3.bf16.msra.mxu1 %v6054_v23  ;;  %5791 = vmatprep.mubr.msk.f32.mxu1 %vm6428_vm0, %v6429_v3 }
 0x69d   :  { %5795 = vmatpush3.xpose.msk.msra.mxu0 %vm155_vm2, %v6571_v43  ;;  %5824 = vmatprep.subr.mxu1 %v6429_v3 }
 0x69e   :  { %5799 = vmatprep.subr.msk.mxu0 %vm155_vm2, %v2299_v33 }
 0x6a0   :  { %5797 = vmatmul.mubr.msk.f32.vlgmr.msra.gmra.mrb[20].mxu0 %vm155_vm2, %v2298_v1 }
 0x6a1   :  { %5800 = vmatpush3.xpose.msk.msra.mxu0 %vm155_vm2, %v2299_v33  ;;  %5801 = vmatprep.mubr.msk.f32.mxu0 %vm155_vm2, %v6585_v50 }
 0x6a4   :  { %5802 = vmatmul.mubr.msk.f32.vlgmr.msra.gmra.mrb[22].mxu0 %vm155_vm2, %v6593_v55 }
 0x6e6   :  { %v2201_v54 = vpop.xlane.xlu0 %2200 }
 0x6e7   :  { %vm2202_vm11 = vcmp.gt.f32.partialorder %v2201_v54, 0.0 }
 0x6e8   :  { %v2203_v40 = vsel %vm2202_vm11, %v2201_v54, 1.0 }
 0x6e9   :  { %6315 = vrcp.f32 %v2203_v40 }
 0x6f3   :  { %v6316_v57 = vpop.eup %6315 }
 0x6f4   :  { %v2206_v63 = vmul.f32 %v6316_v57, %v6925_v11 }
 0x6f6   :  { %5792 = vmatmul.mubr.msk.f32.vlgmr.msra.gmra.mrb[14].mxu1 %vm32_vm1, %v2206_v63 }
 0x6f7   :  { %5825 = vmatpush3.xpose.msk.msra.mxu1 %vm155_vm2, %v6571_v43  ;;  %5826 = vmatprep.mubr.msk.f32.mxu1 %vm6428_vm0, %v6429_v3 }
 0x6f8   :  { %5829 = vmatprep.subr.msk.mxu1 %vm155_vm2, %v3014_v41 }
 0x6fa   :  { %5827 = vmatmul.mubr.msk.f32.vlgmr.msra.gmra.mrb[16].mxu1 %vm155_vm2, %v3013_v37 }
 0x6fb   :  { %5830 = vmatpush3.xpose.msk.msra.mxu1 %vm155_vm2, %v3014_v41  ;;  %5831 = vmatprep.mubr.msk.f32.mxu1 %vm155_vm2, %v6585_v50 }
 0x6fe   :  { %5832 = vmatmul.mubr.msk.f32.vlgmr.msra.gmra.mrb[18].mxu1 %vm155_vm2, %v6593_v55 }
 0x76a   :  { %v6991_v47 = vpop.f32.mrb[18].mxu0 }
 0x76b   :  { %v5753_v51 = vpop.f32.mrb[19].mxu0 }
 0x773   :  { %v6993_v11 = vpop.f32.mrb[20].mxu0 }
 0x774   :  { %v5798_v14 = vpop.f32.mrb[21].mxu0  ;;  %v2517_v42 = vrot.slane %v6993_v11, %v6690_v35  ;;  %v2464_v16 = vrot.slane %v6993_v11, %v6688_v34  ;;  %v2735_v22 = vrot.slane %v6993_v11, %v6697_v48  ;;  %v7037_v23 = vrot.slane %v6993_v11, %v6706_v10 }
 0x777   :  { %v5803_v18 = vpop.f32.mrb[22].mxu0 }
 0x778   :  { %v2442_v52 = vpop.f32.mrb[23].mxu0 }
 0x779   :  { %2453 = vperm.xlu0 %6220, %v2442_v52   ;;  %2507 = vperm.xlu1 %6219, %v2442_v52  }
 0x77d   :  { %2511 = vperm.xlu1 %6219, %v5803_v18   ;;  %6252 = vset.pattern.permute.xlu0 %v6433_v25 }
 0x781   :  { %6221 = vset.pattern.permute.xlu1 %v6431_v7 }
 0x782   :  { %2458 = vperm.xlu1 %6221, %v5803_v18  }
 0x786   :  { %6222 = vset.pattern.permute.xlu1 %v6432_v24 }
 0x787   :  { %2725 = vperm.xlu1 %6222, %v2442_v52  }
 0x78b   :  { %2729 = vperm.xlu1 %6222, %v5803_v18  }
 0x78f   :  { %6223 = vset.pattern.permute.xlu1 %v6433_v25 }
 0x790   :  { %2863 = vperm.xlu1 %6223, %v2442_v52  }
 0x794   :  { %2867 = vperm.xlu1 %6223, %v5803_v18  }
 0x798   :  { %6224 = vset.pattern.permute.xlu1 %v6430_v6 }
 0x7c9   :  { %v7000_v50 = vpop.f32.mrb[14].mxu1 }
 0x7ca   :  { %v5793_v55 = vpop.f32.mrb[15].mxu1 }
 0x7cd   :  { %v7002_v17 = vpop.f32.mrb[16].mxu1 }
 0x7ce   :  { %v5828_v29 = vpop.f32.mrb[17].mxu1 }
 0x7d1   :  { %v5833_v45 = vpop.f32.mrb[18].mxu1 }
 0x7d2   :  { %v3157_v44 = vpop.f32.mrb[19].mxu1 }
 0x7f8   :  { %v2508_v46 = vpop.permute.xlu1 %2507  ;;  %v2454_v30 = vpop.permute.xlu0 %2453 }
 0x7f9   :  { %v2518_v32 = vadd.f32 %v2517_v42, %v2508_v46  ;;  %v2465_v53 = vadd.f32 %v2464_v16, %v2454_v30 }
 0x7fb   :  { %vm2520_vm12 = vcmp.ge.f32.partialorder %v2518_v32, 0.0  ;;  %v2522_v27 = vmul.f32 0.2, %v2518_v32  ;;  %v2469_v38 = vmul.f32 0.2, %v2465_v53  ;;  %vm2467_vm15 = vcmp.ge.f32.partialorder %v2465_v53, 0.0 }
 0x7fc   :  { %v2512_v26 = vpop.permute.xlu1 %2511 }
 0x7fd   :  { %v2519_v12 = vadd.f32 %v2517_v42, %v2512_v26  ;;  %v2524_v36 = vsel %vm2520_vm12, %v2518_v32, %v2522_v27  ;;  %v2471_v33 = vsel %vm2467_vm15, %v2465_v53, %v2469_v38  ;;  %v3231_v27 = vrot.slane %v7002_v17, %v6690_v35 }
 0x7fe   :  { %v2526_v49 = vadd.f32 %v2524_v36, %v2296_v60 }
 0x7ff   :  { %vm2521_vm14 = vcmp.ge.f32.partialorder %v2519_v12, 0.0  ;;  %v2523_v58 = vmul.f32 0.2, %v2519_v12 }
 0x800   :  { %v2528_v39 = vsel %vm2475_vm13, %v2526_v49, -inf }
 0x801   :  { %2529 = vmax.xlane.f32.xlu0 %v2528_v39  ;;  %v2459_v62 = vpop.permute.xlu1 %2458  ;;  %v2525_v13 = vsel %vm2521_vm14, %v2519_v12, %v2523_v58  ;;  %v3179_v58 = vrot.slane %v7002_v17, %v6688_v34  ;;  %v7069_v39 = vld [vmem:[%s7660_s1 + $0x90] sm:$0xff] }
 0x802   :  { %v7017_v15 = vadd.f32 %v2464_v16, %v2459_v62  ;;  %v7020_v5 = vadd.f32 %v2525_v13, %v7012_v2 }
 0x804   :  { %v2531_v20 = vsel %vm2475_vm13, %v7020_v5, -inf  ;;  %v2470_v62 = vmul.f32 0.2, %v7017_v15  ;;  %vm2468_vm8 = vcmp.ge.f32.partialorder %v7017_v15, 0.0 }
 0x805   :  { %2532 = vmax.xlane.f32.xlu1 %v2531_v20 }
 0x806   :  { %v2726_v21 = vpop.permute.xlu1 %2725 }
 0x807   :  { %v2736_v19 = vadd.f32 %v2735_v22, %v2726_v21  ;;  %v3012_v21 = vld [vmem:[%s7660_s1 + $0x98] sm:$0xff] }
 0x809   :  { %vm2738_vm4 = vcmp.ge.f32.partialorder %v2736_v19, 0.0 }
 0x80a   :  { %v2730_v28 = vpop.permute.xlu1 %2729 }
 0x80b   :  { %v7026_v59 = vadd.f32 %v2735_v22, %v2730_v28 }
 0x80d   :  { %vm2739_vm10 = vcmp.ge.f32.partialorder %v7026_v59, 0.0 }
 0x80f   :  { %v2864_v31 = vpop.permute.xlu1 %2863 }
 0x813   :  { %v2868_v51 = vpop.permute.xlu1 %2867 }
 0x816   :  { %3225 = vperm.xlu1 %6224, %v5833_v45  }
 0x81a   :  { %6225 = vset.pattern.permute.xlu1 %v6431_v7 }
 0x81b   :  { %3173 = vperm.xlu1 %6225, %v5833_v45  }
 0x81f   :  { %6226 = vset.pattern.permute.xlu1 %v6432_v24 }
 0x820   :  { %3443 = vperm.xlu1 %6226, %v5833_v45  }
 0x824   :  { %6227 = vset.pattern.permute.xlu1 %v6433_v25 }
 0x825   :  { %3581 = vperm.xlu1 %6227, %v5833_v45   ;;  %v7055_v45 = vld [vmem:[%s7660_s1 + $0x60] sm:$0xff] }
 0x829   :  { %6228 = vset.pattern.permute.xlu1 %v6430_v6  ;;  %v2740_v6 = vmul.f32 0.2, %v2736_v19 }
 0x82a   :  { %3221 = vperm.xlu1 %6228, %v3157_v44  }
 0x82e   :  { %6229 = vset.pattern.permute.xlu1 %v6431_v7  ;;  %v2874_v7 = vadd.f32 %v7037_v23, %v2864_v31  ;;  %v3449_v31 = vrot.slane %v7002_v17, %v6697_v48  ;;  %v3587_v48 = vrot.slane %v7002_v17, %v6706_v10 }
 0x82f   :  { %3168 = vperm.xlu1 %6229, %v3157_v44  }
 0x830   :  { %v2878_v1 = vmul.f32 0.2, %v2874_v7  ;;  %vm2876_vm5 = vcmp.ge.f32.partialorder %v2874_v7, 0.0 }
 0x832   :  { %v2880_v57 = vsel %vm2876_vm5, %v2874_v7, %v2878_v1 }
 0x833   :  { %6230 = vset.pattern.permute.xlu1 %v6432_v24  ;;  %v7040_v24 = vadd.f32 %v2471_v33, %v2296_v60  ;;  %v7048_v41 = vadd.f32 %v2880_v57, %v2296_v60 }
 0x834   :  { %3439 = vperm.xlu1 %6230, %v3157_v44  }
 0x835   :  { %v2476_v54 = vsel %vm2475_vm13, %v7040_v24, -inf  ;;  %v2884_v37 = vsel %vm2475_vm13, %v7048_v41, -inf }
 0x838   :  { %6231 = vset.pattern.permute.xlu1 %v6433_v25  ;;  %v2742_v25 = vsel %vm2738_vm4, %v2736_v19, %v2740_v6  ;;  %v2472_v6 = vsel %vm2468_vm8, %v7017_v15, %v2470_v62 }
 0x839   :  { %3577 = vperm.xlu1 %6231, %v3157_v44   ;;  %v7044_v40 = vadd.f32 %v2742_v25, %v2296_v60  ;;  %v7093_v25 = vadd.f32 %v2472_v6, %v7012_v2 }
 0x83b   :  { %v2746_v63 = vsel %vm2475_vm13, %v7044_v40, -inf }
 0x85d   :  { %2477 = vmax.xlane.f32.xlu1 %v2476_v54  ;;  %v2741_v54 = vmul.f32 0.2, %v7026_v59 }
 0x861   :  { %2747 = vmax.xlane.f32.xlu1 %v2746_v63 }
 0x865   :  { %2885 = vmax.xlane.f32.xlu1 %v2884_v37 }
 0x88e   :  { %v2530_v11 = vpop.xlane.xlu0 %2529 }
 0x88f   :  { %v2534_v14 = vsub.f32 %v2526_v49, %v2530_v11 }
 0x891   :  { %v2536_v18 = vmul.f32 1.442695, %v2534_v14  ;;  %v2479_v14 = vsel %vm2475_vm13, %v7093_v25, -inf }
 0x892   :  { %v2533_v52 = vpop.xlane.xlu1 %2532 }
 0x893   :  { %6317 = vpow2.f32 %v2536_v18  ;;  %v2535_v15 = vsub.f32 %v7020_v5, %v2533_v52 }
 0x896   :  { %v3226_v55 = vpop.permute.xlu1 %3225 }
 0x897   :  { %v3233_v26 = vadd.f32 %v3231_v27, %v3226_v55  ;;  %v2875_v55 = vadd.f32 %v7037_v23, %v2868_v51 }
 0x899   :  { %v3237_v36 = vmul.f32 0.2, %v3233_v26  ;;  %vm3235_vm6 = vcmp.ge.f32.partialorder %v3233_v26, 0.0  ;;  %v2879_v5 = vmul.f32 0.2, %v2875_v55  ;;  %vm2877_vm12 = vcmp.ge.f32.partialorder %v2875_v55, 0.0 }
 0x89a   :  { %v3174_v29 = vpop.permute.xlu1 %3173 }
 0x89b   :  { %v3181_v13 = vadd.f32 %v3179_v58, %v3174_v29  ;;  %v3239_v22 = vsel %vm3235_vm6, %v3233_v26, %v3237_v36 }
 0x89c   :  { %v7083_v38 = vadd.f32 %v3239_v22, %v3012_v21 }
 0x89d   :  { %v6318_v44 = vpop.eup %6317  ;;  %v3185_v19 = vmul.f32 0.2, %v3181_v13  ;;  %vm3183_vm9 = vcmp.ge.f32.partialorder %v3181_v13, 0.0 }
 0x89e   :  { %v7058_v42 = vmul.f32 %v6318_v44, %v7055_v45  ;;  %v3245_v1 = vsel %vm2475_vm13, %v7083_v38, -inf  ;;  %v2743_v44 = vsel %vm2739_vm10, %v7026_v59, %v2741_v54 }
 0x89f   :  { %v3444_v46 = vpop.permute.xlu1 %3443  ;;  %v3187_v63 = vsel %vm3183_vm9, %v3181_v13, %v3185_v19  ;;  %v7111_v17 = vadd.f32 %v2743_v44, %v7012_v2 }
 0x8a0   :  { %v2542_v32 = vsel %vm2475_vm13, %v7058_v42, 0.0  ;;  %v3451_v57 = vadd.f32 %v3449_v31, %v3444_v46  ;;  %v7104_v18 = vadd.f32 %v3187_v63, %v3012_v21  ;;  %v2538_v46 = vmul.f32 1.442695, %v2535_v15 }
 0x8a1   :  { %2543 = vadd.xlane.f32.xlu1 %v2542_v32  ;;  %v2749_v23 = vsel %vm2475_vm13, %v7111_v17, -inf }
 0x8a2   :  { %v3455_v29 = vmul.f32 0.2, %v3451_v57  ;;  %vm3453_vm11 = vcmp.ge.f32.partialorder %v3451_v57, 0.0  ;;  %v3193_v10 = vsel %vm2475_vm13, %v7104_v18, -inf  ;;  %6319 = vpow2.f32 %v2538_v46 }
 0x8a4   :  { %v3582_v60 = vpop.permute.xlu1 %3581  ;;  %v3457_v32 = vsel %vm3453_vm11, %v3451_v57, %v3455_v29 }
 0x8a5   :  { %v3589_v52 = vadd.f32 %v3587_v48, %v3582_v60  ;;  %v7115_v51 = vadd.f32 %v3457_v32, %v3012_v21 }
 0x8a7   :  { %v3593_v59 = vmul.f32 0.2, %v3589_v52  ;;  %vm3591_vm14 = vcmp.ge.f32.partialorder %v3589_v52, 0.0  ;;  %v3463_v26 = vsel %vm2475_vm13, %v7115_v51, -inf }
 0x8a9   :  { %v3222_v12 = vpop.permute.xlu1 %3221  ;;  %v3595_v60 = vsel %vm3591_vm14, %v3589_v52, %v3593_v59 }
 0x8aa   :  { %v3232_v49 = vadd.f32 %v3231_v27, %v3222_v12  ;;  %v2881_v27 = vsel %vm2877_vm12, %v2875_v55, %v2879_v5 }
 0x8ab   :  { %v7120_v12 = vadd.f32 %v2881_v27, %v7012_v2 }
 0x8ac   :  { %vm3234_vm7 = vcmp.ge.f32.partialorder %v3232_v49, 0.0  ;;  %v3236_v16 = vmul.f32 0.2, %v3232_v49 }
 0x8ad   :  { %v2887_v36 = vsel %vm2475_vm13, %v7120_v12, -inf }
 0x8ae   :  { %v3169_v35 = vpop.permute.xlu1 %3168  ;;  %v3238_v20 = vsel %vm3234_vm7, %v3232_v49, %v3236_v16  ;;  %v7124_v49 = vadd.f32 %v3595_v60, %v3012_v21  ;;  %v7129_v16 = vld [vmem:[%s7660_s1 + $0x68] sm:$0xff] }
 0x8af   :  { %v7076_v28 = vadd.f32 %v3179_v58, %v3169_v35  ;;  %v7079_v30 = vadd.f32 %v3238_v20, %v7069_v39  ;;  %v6320_v58 = vpop.eup %6319 }
 0x8b0   :  { %v3601_v62 = vsel %vm2475_vm13, %v7124_v49, -inf  ;;  %v7134_v2 = vmul.f32 %v6320_v58, %v7129_v16 }
 0x8b1   :  { %v3242_v53 = vsel %vm2475_vm13, %v7079_v30, -inf  ;;  %vm3182_vm15 = vcmp.ge.f32.partialorder %v7076_v28, 0.0 }
 0x8b2   :  { %3243 = vmax.xlane.f32.xlu0 %v3242_v53  ;;  %v2545_v13 = vsel %vm2475_vm13, %v7134_v2, 0.0 }
 0x8b3   :  { %v3440_v7 = vpop.permute.xlu1 %3439 }
 0x8b4   :  { %v7088_v33 = vadd.f32 %v3449_v31, %v3440_v7 }
 0x8b6   :  { %3246 = vmax.xlane.f32.xlu0 %v3245_v1  ;;  %v3454_v29 = vmul.f32 0.2, %v7088_v33  ;;  %vm3452_vm5 = vcmp.ge.f32.partialorder %v7088_v33, 0.0 }
 0x8b8   :  { %v3578_v37 = vpop.permute.xlu1 %3577 }
 0x8b9   :  { %v7100_v11 = vadd.f32 %v3587_v48, %v3578_v37  ;;  %v3184_v37 = vmul.f32 0.2, %v7076_v28 }
 0x8ba   :  { %2480 = vmax.xlane.f32.xlu0 %v2479_v14 }
 0x8bb   :  { %v3592_v46 = vmul.f32 0.2, %v7100_v11  ;;  %vm3590_vm6 = vcmp.ge.f32.partialorder %v7100_v11, 0.0 }
 0x8be   :  { %3194 = vmax.xlane.f32.xlu0 %v3193_v10  ;;  %v3456_v10 = vsel %vm3452_vm5, %v7088_v33, %v3454_v29 }
 0x8bf   :  { %v7172_v52 = vadd.f32 %v3456_v10, %v7069_v39 }
 0x8c1   :  { %v3460_v59 = vsel %vm2475_vm13, %v7172_v52, -inf }
 0x8c2   :  { %2750 = vmax.xlane.f32.xlu0 %v2749_v23 }
 0x8c6   :  { %3464 = vmax.xlane.f32.xlu0 %v3463_v26 }
 0x8ca   :  { %2888 = vmax.xlane.f32.xlu0 %v2887_v36 }
 0x8ce   :  { %3602 = vmax.xlane.f32.xlu0 %v3601_v62 }
 0x8d2   :  { %2546 = vadd.xlane.f32.xlu0 %v2545_v13 }
 0x8ea   :  { %v2478_v35 = vpop.xlane.xlu1 %2477 }
 0x8eb   :  { %v2482_v20 = vsub.f32 %v7040_v24, %v2478_v35 }
 0x8ed   :  { %v2484_v21 = vmul.f32 1.442695, %v2482_v20 }
 0x8ee   :  { %v2748_v22 = vpop.xlane.xlu1 %2747 }
 0x8ef   :  { %6321 = vpow2.f32 %v2484_v21  ;;  %v2752_v53 = vsub.f32 %v7044_v40, %v2748_v22 }
 0x8f1   :  { %v2754_v19 = vmul.f32 1.442695, %v2752_v53 }
 0x8f2   :  { %v2886_v31 = vpop.xlane.xlu1 %2885 }
 0x8f3   :  { %6323 = vpow2.f32 %v2754_v19  ;;  %v2890_v6 = vsub.f32 %v7048_v41, %v2886_v31 }
 0x8f5   :  { %v2892_v7 = vmul.f32 1.442695, %v2890_v6 }
 0x8f7   :  { %6325 = vpow2.f32 %v2892_v7 }
 0x8f9   :  { %v6322_v1 = vpop.eup %6321 }
 0x8fa   :  { %v7142_v54 = vmul.f32 %v6322_v1, %v7055_v45 }
 0x8fc   :  { %v2490_v57 = vsel %vm2475_vm13, %v7142_v54, 0.0 }
 0x8fd   :  { %v6324_v24 = vpop.eup %6323  ;;  %2491 = vadd.xlane.f32.xlu1 %v2490_v57 }
 0x8fe   :  { %v7147_v63 = vmul.f32 %v6324_v24, %v7055_v45 }
 0x900   :  { %v2760_v40 = vsel %vm2475_vm13, %v7147_v63, 0.0 }
 0x901   :  { %v6326_v48 = vpop.eup %6325  ;;  %2761 = vadd.xlane.f32.xlu1 %v2760_v40 }
 0x902   :  { %v7152_v41 = vmul.f32 %v6326_v48, %v7055_v45  ;;  %v3186_v45 = vsel %vm3182_vm15, %v7076_v28, %v3184_v37  ;;  %v3594_v28 = vsel %vm3590_vm6, %v7100_v11, %v3592_v46  ;;  %v7205_v48 = vld [vmem:[%s7660_s1 + $0x88] sm:$0xff] }
 0x903   :  { %v7164_v44 = vadd.f32 %v3186_v45, %v7069_v39  ;;  %v7179_v27 = vadd.f32 %v3594_v28, %v7069_v39 }
 0x904   :  { %v2898_v15 = vsel %vm2475_vm13, %v7152_v41, 0.0 }
 0x905   :  { %2899 = vadd.xlane.f32.xlu1 %v2898_v15  ;;  %v3190_v5 = vsel %vm2475_vm13, %v7164_v44, -inf  ;;  %v3598_v26 = vsel %vm2475_vm13, %v7179_v27, -inf }
 0x916   :  { %2559 = vrot.lane.b32.xlu1 %v6650_v8, %s6434_s15 }
 0x92e   :  { %v2544_v14 = vpop.xlane.xlu1 %2543 }
 0x92f   :  { %vm2548_vm4 = vcmp.gt.f32.partialorder %v2544_v14, 0.0 }
 0x930   :  { %v2550_v55 = vsel %vm2548_vm4, %v2544_v14, 1.0 }
 0x931   :  { %6327 = vrcp.f32 %v2550_v55 }
 0x93a   :  { %3191 = vmax.xlane.f32.xlu1 %v3190_v5 }
 0x93b   :  { %v6328_v32 = vpop.eup %6327 }
 0x93c   :  { %v2556_v23 = vmul.f32 %v6328_v32, %v7058_v42 }
 0x93e   :  { %3461 = vmax.xlane.f32.xlu1 %v3460_v59  ;;  %5806 = vmatprep.mubr.msk.f32.mxu0 %vm2475_vm13, %v2556_v23 }
 0x93f   :  { %v3244_v33 = vpop.xlane.xlu0 %3243 }
 0x940   :  { %v3248_v7 = vsub.f32 %v7079_v30, %v3244_v33 }
 0x942   :  { %3599 = vmax.xlane.f32.xlu1 %v3598_v26  ;;  %v3250_v24 = vmul.f32 1.442695, %v3248_v7 }
 0x943   :  { %v3247_v60 = vpop.xlane.xlu0 %3246 }
 0x944   :  { %v3249_v35 = vsub.f32 %v7083_v38, %v3247_v60 }
 0x946   :  { %v3252_v22 = vmul.f32 1.442695, %v3249_v35 }
 0x947   :  { %v2481_v36 = vpop.xlane.xlu0 %2480 }
 0x948   :  { %v2483_v11 = vsub.f32 %v7093_v25, %v2481_v36 }
 0x94a   :  { %v2486_v58 = vmul.f32 1.442695, %v2483_v11 }
 0x94b   :  { %v3195_v42 = vpop.xlane.xlu0 %3194 }
 0x94c   :  { %6329 = vpow2.f32 %v2486_v58  ;;  %v3197_v25 = vsub.f32 %v7104_v18, %v3195_v42 }
 0x94e   :  { %v3200_v38 = vmul.f32 1.442695, %v3197_v25 }
 0x94f   :  { %v2751_v62 = vpop.xlane.xlu0 %2750 }
 0x950   :  { %v2753_v13 = vsub.f32 %v7111_v17, %v2751_v62 }
 0x952   :  { %v2756_v39 = vmul.f32 1.442695, %v2753_v13 }
 0x953   :  { %v3465_v20 = vpop.xlane.xlu0 %3464  ;;  %2776 = vrot.lane.b32.xlu1 %v6650_v8, %s6436_s21 }
 0x954   :  { %6331 = vpow2.f32 %v2756_v39  ;;  %v3467_v26 = vsub.f32 %v7115_v51, %v3465_v20 }
 0x955   :  { %6333 = vpow2.f32 %v3252_v22 }
 0x956   :  { %v6330_v21 = vpop.eup %6329  ;;  %v3470_v36 = vmul.f32 1.442695, %v3467_v26 }
 0x957   :  { %v2889_v53 = vpop.xlane.xlu0 %2888  ;;  %v7190_v19 = vmul.f32 %v6330_v21, %v7129_v16 }
 0x958   :  { %v2891_v31 = vsub.f32 %v7120_v12, %v2889_v53 }
 0x959   :  { %v2493_v17 = vsel %vm2475_vm13, %v7190_v19, 0.0 }
 0x95a   :  { %v2894_v6 = vmul.f32 1.442695, %v2891_v31  ;;  %2494 = vadd.xlane.f32.xlu0 %v2493_v17 }
 0x95b   :  { %v3603_v28 = vpop.xlane.xlu0 %3602 }
 0x95c   :  { %6335 = vpow2.f32 %v2894_v6  ;;  %v3605_v11 = vsub.f32 %v7124_v49, %v3603_v28 }
 0x95d   :  { %6337 = vpow2.f32 %v3200_v38 }
 0x95e   :  { %v6332_v1 = vpop.eup %6331  ;;  %6339 = vpow2.f32 %v3250_v24  ;;  %v3608_v62 = vmul.f32 1.442695, %v3605_v11 }
 0x95f   :  { %v7198_v57 = vmul.f32 %v6332_v1, %v7129_v16  ;;  %v6334_v12 = vpop.eup %6333  ;;  %v2547_v32 = vpop.xlane.xlu0 %2546 }
 0x960   :  { %v7213_v37 = vmul.f32 %v6334_v12, %v7205_v48  ;;  %vm2549_vm7 = vcmp.gt.f32.partialorder %v2547_v32, 0.0 }
 0x961   :  { %v2763_v18 = vsel %vm2475_vm13, %v7198_v57, 0.0  ;;  %v2551_v23 = vsel %vm2549_vm7, %v2547_v32, 1.0 }
 0x962   :  { %2764 = vadd.xlane.f32.xlu0 %v2763_v18  ;;  %v3259_v55 = vsel %vm2475_vm13, %v7213_v37, 0.0  ;;  %6341 = vrcp.f32 %v2551_v23 }
 0x966   :  { %v6336_v40 = vpop.eup %6335 }
 0x967   :  { %v7208_v30 = vmul.f32 %v6336_v40, %v7129_v16  ;;  %v6338_v14 = vpop.eup %6337  ;;  %v7223_v16 = vld [vmem:[%s7660_s1 + $0x80] sm:$0xff] }
 0x968   :  { %v7218_v29 = vmul.f32 %v6338_v14, %v7205_v48  ;;  %v6340_v45 = vpop.eup %6339 }
 0x969   :  { %v2901_v15 = vsel %vm2475_vm13, %v7208_v30, 0.0  ;;  %v7228_v10 = vmul.f32 %v6340_v45, %v7223_v16 }
 0x96a   :  { %2902 = vadd.xlane.f32.xlu0 %v2901_v15  ;;  %v3207_v46 = vsel %vm2475_vm13, %v7218_v29, 0.0 }
 0x96b   :  { %v3256_v5 = vsel %vm2475_vm13, %v7228_v10, 0.0 }
 0x96c   :  { %v6342_v42 = vpop.eup %6341 }
 0x96d   :  { %v2557_v35 = vmul.f32 %v6342_v42, %v7134_v2 }
 0x96e   :  { %3260 = vadd.xlane.f32.xlu0 %v3259_v55 }
 0x972   :  { %3208 = vadd.xlane.f32.xlu0 %v3207_v46 }
 0x977   :  { %3257 = vadd.xlane.f32.xlu1 %v3256_v5 }
 0x988   :  { %3273 = vrot.lane.b32.xlu0 %v6652_v9, %s6434_s15  ;;  %3490 = vrot.lane.b32.xlu1 %v6652_v9, %s6436_s21 }
 0x98a   :  { %v2492_v59 = vpop.xlane.xlu1 %2491 }
 0x98b   :  { %vm2496_vm8 = vcmp.gt.f32.partialorder %v2492_v59, 0.0 }
 0x98c   :  { %v2498_v33 = vsel %vm2496_vm8, %v2492_v59, 1.0 }
 0x98d   :  { %6343 = vrcp.f32 %v2498_v33 }
 0x98e   :  { %v2762_v60 = vpop.xlane.xlu1 %2761  ;;  %6345 = vpow2.f32 %v3470_v36 }
 0x98f   :  { %6347 = vpow2.f32 %v3608_v62  ;;  %vm2766_vm9 = vcmp.gt.f32.partialorder %v2762_v60, 0.0 }
 0x990   :  { %v2768_v45 = vsel %vm2766_vm9, %v2762_v60, 1.0 }
 0x992   :  { %v2900_v58 = vpop.xlane.xlu1 %2899 }
 0x993   :  { %vm2904_vm11 = vcmp.gt.f32.partialorder %v2900_v58, 0.0 }
 0x994   :  { %v2906_v28 = vsel %vm2904_vm11, %v2900_v58, 1.0 }
 0x996   :  { %v2560_v13 = vpop.permute.xlu1 %2559 }
 0x997   :  { %v6344_v39 = vpop.eup %6343  ;;  %5804 = vmatprep.subr.mxu0 %v2560_v13 }
 0x998   :  { %5805 = vmatpush3.msra.mxu0 %v2560_v13  ;;  %v2504_v21 = vmul.f32 %v6344_v39, %v7142_v54  ;;  %v6346_v51 = vpop.eup %6345 }
 0x999   :  { %5807 = vmatmul.mubr.msk.f32.vlgmr.msra.gmra.mrb[24].mxu0 %vm2475_vm13, %v2557_v35  ;;  %5809 = vmatprep.subr.mxu0 %v6650_v8  ;;  %v7245_v49 = vmul.f32 %v6346_v51, %v7205_v48  ;;  %v6348_v20 = vpop.eup %6347 }
 0x99a   :  { %5810 = vmatpush3.msra.mxu0 %v6650_v8  ;;  %5811 = vmatprep.mubr.msk.f32.mxu0 %vm2475_vm13, %v2504_v21  ;;  %v7250_v22 = vmul.f32 %v6348_v20, %v7205_v48 }
 0x99b   :  { %v3477_v2 = vsel %vm2475_vm13, %v7245_v49, 0.0 }
 0x99c   :  { %v3615_v54 = vsel %vm2475_vm13, %v7250_v22, 0.0 }
 0x9a7   :  { %3478 = vadd.xlane.f32.xlu0 %v3477_v2 }
 0x9ab   :  { %3616 = vadd.xlane.f32.xlu0 %v3615_v54 }
 0x9c1   :  { %2914 = vrot.lane.b32.xlu0 %v6650_v8, %s6435_s20 }
 0x9c7   :  { %v3192_v53 = vpop.xlane.xlu1 %3191 }
 0x9c8   :  { %v3196_v25 = vsub.f32 %v7164_v44, %v3192_v53 }
 0x9ca   :  { %v3198_v31 = vmul.f32 1.442695, %v3196_v25 }
 0x9cb   :  { %v3462_v17 = vpop.xlane.xlu1 %3461 }
 0x9cc   :  { %6349 = vpow2.f32 %v3198_v31  ;;  %v3466_v6 = vsub.f32 %v7172_v52, %v3462_v17 }
 0x9ce   :  { %v3468_v38 = vmul.f32 1.442695, %v3466_v6 }
 0x9cf   :  { %v3600_v7 = vpop.xlane.xlu1 %3599 }
 0x9d0   :  { %6351 = vpow2.f32 %v3468_v38  ;;  %v3604_v1 = vsub.f32 %v7179_v27, %v3600_v7 }
 0x9d2   :  { %v3606_v24 = vmul.f32 1.442695, %v3604_v1 }
 0x9d3   :  { %v2777_v18 = vpop.permute.xlu1 %2776 }
 0x9d4   :  { %6353 = vpow2.f32 %v3606_v24  ;;  %5814 = vmatprep.subr.mxu0 %v2777_v18 }
 0x9d5   :  { %6355 = vrcp.f32 %v2768_v45 }
 0x9d6   :  { %v6350_v12 = vpop.eup %6349 }
 0x9d7   :  { %v7260_v8 = vmul.f32 %v6350_v12, %v7223_v16 }
 0x9d9   :  { %v3204_v44 = vsel %vm2475_vm13, %v7260_v8, 0.0 }
 0x9da   :  { %v6352_v40 = vpop.eup %6351  ;;  %3205 = vadd.xlane.f32.xlu1 %v3204_v44 }
 0x9db   :  { %v7265_v52 = vmul.f32 %v6352_v40, %v7223_v16 }
 0x9dd   :  { %v3474_v15 = vsel %vm2475_vm13, %v7265_v52, 0.0 }
 0x9de   :  { %v6354_v27 = vpop.eup %6353  ;;  %3475 = vadd.xlane.f32.xlu1 %v3474_v15 }
 0x9df   :  { %v7270_v14 = vmul.f32 %v6354_v27, %v7223_v16  ;;  %v6356_v59 = vpop.eup %6355 }
 0x9e0   :  { %v2774_v60 = vmul.f32 %v6356_v59, %v7147_v63 }
 0x9e1   :  { %v3612_v55 = vsel %vm2475_vm13, %v7270_v14, 0.0 }
 0x9e2   :  { %3613 = vadd.xlane.f32.xlu1 %v3612_v55 }
 0x9e7   :  { %v2495_v46 = vpop.xlane.xlu0 %2494 }
 0x9e8   :  { %vm2497_vm10 = vcmp.gt.f32.partialorder %v2495_v46, 0.0 }
 0x9e9   :  { %v2499_v5 = vsel %vm2497_vm10, %v2495_v46, 1.0 }
 0x9ea   :  { %6357 = vrcp.f32 %v2499_v5 }
 0x9eb   :  { %6359 = vrcp.f32 %v2906_v28 }
 0x9ef   :  { %v2765_v32 = vpop.xlane.xlu0 %2764 }
 0x9f0   :  { %vm2767_vm12 = vcmp.gt.f32.partialorder %v2765_v32, 0.0 }
 0x9f1   :  { %v2769_v23 = vsel %vm2767_vm12, %v2765_v32, 1.0 }
 0x9f2   :  { %6361 = vrcp.f32 %v2769_v23  ;;  %v3736_v23 = vld [vmem:[%s7658_s3 + $0xd0] sm:$0xff] }
 0x9f3   :  { %3628 = vrot.lane.b32.xlu1 %v6652_v9, %s6435_s20 }
 0x9f4   :  { %v6358_v33 = vpop.eup %6357 }
 0x9f5   :  { %v2505_v26 = vmul.f32 %v6358_v33, %v7190_v19  ;;  %v6360_v11 = vpop.eup %6359  ;;  %v1112_v33 = vmul.f32 0.25, %v6806_v4 }
 0x9f6   :  { %v2912_v13 = vmul.f32 %v6360_v11, %v7152_v41  ;;  %v5423_v11 = vld [vmem:[%s7657_s2 + $0x63] ss:$0 sm:$0xff] }
 0x9f7   :  { %v2903_v36 = vpop.xlane.xlu0 %2902  ;;  %5812 = vmatmul.mubr.msk.f32.vlgmr.msra.gmra.mrb[24].mxu0 %vm2475_vm13, %v2505_v26  ;;  %v5389_v26 = vld [vmem:[%s7657_s2 + $0x60] ss:$0 sm:$0xff] }
 0x9f8   :  { %5815 = vmatpush3.msra.mxu0 %v2777_v18  ;;  %5816 = vmatprep.mubr.msk.f32.mxu0 %vm2475_vm13, %v2774_v60  ;;  %vm2905_vm4 = vcmp.gt.f32.partialorder %v2903_v36, 0.0  ;;  %v1111_v60 = vmul.f32 0.25, %v6808_v61 }
 0x9f9   :  { %v2907_v54 = vsel %vm2905_vm4, %v2903_v36, 1.0 }
 0x9fb   :  { %v3261_v58 = vpop.xlane.xlu0 %3260 }
 0x9fc   :  { %v6362_v42 = vpop.eup %6361  ;;  %vm3263_vm14 = vcmp.gt.f32.partialorder %v3261_v58, 0.0 }
 0x9fd   :  { %v2775_v62 = vmul.f32 %v6362_v42, %v7198_v57  ;;  %v3265_v63 = vsel %vm3263_vm14, %v3261_v58, 1.0 }
 0x9fe   :  { %6363 = vrcp.f32 %v3265_v63  ;;  %v1118_v63 = vadd.f32 %v5389_v26, %v1111_v60 }
 0x9ff   :  { %v3209_v39 = vpop.xlane.xlu0 %3208  ;;  %5817 = vmatmul.mubr.msk.f32.vlgmr.msra.gmra.mrb[24].mxu0 %vm2475_vm13, %v2775_v62 }
 0xa00   :  { %5821 = vmatprep.mubr.msk.f32.mxu0 %vm2475_vm13, %v2912_v13  ;;  %vm3211_vm5 = vcmp.gt.f32.partialorder %v3209_v39, 0.0  ;;  %v1119_v13 = vadd.f32 %v5389_v26, %v1112_v33 }
 0xa03   :  { %v3274_v19 = vpop.permute.xlu0 %3273 }
 0xa04   :  { %5834 = vmatprep.subr.mxu1 %v3274_v19  ;;  %v3258_v35 = vpop.xlane.xlu1 %3257 }
 0xa05   :  { %vm3262_vm15 = vcmp.gt.f32.partialorder %v3258_v35, 0.0  ;;  %5835 = vmatpush3.msra.mxu1 %v3274_v19 }
 0xa06   :  { %v3264_v21 = vsel %vm3262_vm15, %v3258_v35, 1.0  ;;  %5839 = vmatprep.subr.mxu1 %v6652_v9 }
 0xa07   :  { %6365 = vrcp.f32 %v3264_v21 }
 0xa08   :  { %v6364_v57 = vpop.eup %6363  ;;  %v3491_v2 = vpop.permute.xlu1 %3490  ;;  %6367 = vrcp.f32 %v2907_v54 }
 0xa09   :  { %v3271_v20 = vmul.f32 %v6364_v57, %v7213_v37  ;;  %v3213_v37 = vsel %vm3211_vm5, %v3209_v39, 1.0  ;;  %v5437_v57 = vld [vmem:[%s7657_s2 + $0x64] ss:$0 sm:$0xff] }
 0xa0a   :  { %6369 = vrcp.f32 %v3213_v37  ;;  %v5444_v37 = vld [vmem:[%s7657_s2 + $0x69] ss:$0 sm:$0xff] }
 0xa11   :  { %v6366_v51 = vpop.eup %6365 }
 0xa12   :  { %v3270_v41 = vmul.f32 %v6366_v51, %v7228_v10  ;;  %v6368_v31 = vpop.eup %6367 }
 0xa13   :  { %v2913_v10 = vmul.f32 %v6368_v31, %v7208_v30  ;;  %v7334_v31 = vld [vmem:[%s7658_s3 + $0x30] sm:$0xff] }
 0xa14   :  { %5836 = vmatprep.mubr.msk.f32.mxu1 %vm2475_vm13, %v3270_v41  ;;  %v6370_v18 = vpop.eup %6369 }
 0xa15   :  { %5837 = vmatmul.mubr.msk.f32.vlgmr.msra.gmra.mrb[20].mxu1 %vm2475_vm13, %v3271_v20  ;;  %v3219_v15 = vmul.f32 %v6370_v18, %v7218_v29 }
 0xa16   :  { %5840 = vmatpush3.msra.mxu1 %v6652_v9 }
 0xa17   :  { %5844 = vmatprep.subr.mxu1 %v3491_v2 }
 0xa34   :  { %v3479_v53 = vpop.xlane.xlu0 %3478 }
 0xa35   :  { %vm3481_vm7 = vcmp.gt.f32.partialorder %v3479_v53, 0.0 }
 0xa36   :  { %v3483_v1 = vsel %vm3481_vm7, %v3479_v53, 1.0 }
 0xa38   :  { %v3617_v25 = vpop.xlane.xlu0 %3616 }
 0xa39   :  { %vm3619_vm10 = vcmp.gt.f32.partialorder %v3617_v25, 0.0 }
 0xa3a   :  { %v3621_v40 = vsel %vm3619_vm10, %v3617_v25, 1.0 }
 0xa3c   :  { %v2915_v17 = vpop.permute.xlu0 %2914 }
 0xa3d   :  { %5819 = vmatprep.subr.mxu0 %v2915_v17 }
 0xa3e   :  { %5820 = vmatpush3.msra.mxu0 %v2915_v17  ;;  %v7339_v17 = vld [vmem:[%s7658_s3 + $0x68] sm:$0xff] }
 0xa3f   :  { %5822 = vmatmul.mubr.msk.f32.vlgmr.msra.gmra.mrb[24].mxu0 %vm2475_vm13, %v2913_v10 }
 0xa67   :  { %v3206_v6 = vpop.xlane.xlu1 %3205 }
 0xa68   :  { %vm3210_vm6 = vcmp.gt.f32.partialorder %v3206_v6, 0.0 }
 0xa69   :  { %v3212_v9 = vsel %vm3210_vm6, %v3206_v6, 1.0  ;;  %v7347_v6 = vld [vmem:[%s7657_s2 + $0x6f] ss:$0 sm:$0xff] }
 0xa6a   :  { %6371 = vrcp.f32 %v3212_v9 }
 0xa6b   :  { %v3476_v38 = vpop.xlane.xlu1 %3475 }
 0xa6c   :  { %vm3480_vm8 = vcmp.gt.f32.partialorder %v3476_v38, 0.0 }
 0xa6d   :  { %v3482_v7 = vsel %vm3480_vm8, %v3476_v38, 1.0 }
 0xa6e   :  { %6373 = vrcp.f32 %v3482_v7  ;;  %v6065_v7 = vpack.c.bf16 %v7339_v17, %v7334_v31 }
 0xa6f   :  { %v3614_v24 = vpop.xlane.xlu1 %3613  ;;  %6375 = vrcp.f32 %v3483_v1 }
 0xa70   :  { %vm3618_vm9 = vcmp.gt.f32.partialorder %v3614_v24, 0.0 }
 0xa71   :  { %v3620_v30 = vsel %vm3618_vm9, %v3614_v24, 1.0  ;;  %v7359_v24 = vld [vmem:[%s7658_s3 + $0xa0] sm:$0xff] }
 0xa72   :  { %6377 = vrcp.f32 %v3620_v30  ;;  %v7364_v30 = vld [vmem:[%s7658_s3 + $0xd8] sm:$0xff] }
 0xa73   :  { %6379 = vrcp.f32 %v3621_v40  ;;  %v3629_v55 = vpop.permute.xlu1 %3628 }
 0xa74   :  { %v6372_v12 = vpop.eup %6371 }
 0xa75   :  { %v3218_v44 = vmul.f32 %v6372_v12, %v7260_v8 }
 0xa77   :  { %5841 = vmatprep.mubr.msk.f32.mxu1 %vm2475_vm13, %v3218_v44 }
 0xa78   :  { %v6374_v27 = vpop.eup %6373  ;;  %5842 = vmatmul.mubr.msk.f32.vlgmr.msra.gmra.mrb[20].mxu1 %vm2475_vm13, %v3219_v15 }
 0xa79   :  { %5845 = vmatpush3.msra.mxu1 %v3491_v2  ;;  %v3488_v45 = vmul.f32 %v6374_v27, %v7265_v52  ;;  %v6376_v46 = vpop.eup %6375  ;;  %v3734_v52 = vld [vmem:[%s7658_s3 + $0x60] sm:$0xff]  ;;  %v6068_v27 = vpack.c.bf16 %v7364_v30, %v7359_v24 }
 0xa7a   :  { %5849 = vmatprep.subr.mxu1 %v3629_v55  ;;  %v3489_v8 = vmul.f32 %v6376_v46, %v7245_v49  ;;  %v3733_v49 = vld [vmem:[%s7658_s3 + $0x28] sm:$0xff] }
 0xa7b   :  { %5846 = vmatprep.mubr.msk.f32.mxu1 %vm2475_vm13, %v3488_v45 }
 0xa7c   :  { %v6378_v5 = vpop.eup %6377 }
 0xa7d   :  { %v3626_v28 = vmul.f32 %v6378_v5, %v7270_v14  ;;  %v6380_v29 = vpop.eup %6379  ;;  %v6056_v14 = vpack.c.bf16 %v3734_v52, %v3733_v49 }
 0xa7e   :  { %v3627_v32 = vmul.f32 %v6380_v29, %v7250_v22  ;;  %v3735_v22 = vld [vmem:[%s7658_s3 + $0x98] sm:$0xff] }
 0xa7f   :  { %6057 = vmatprep.subr.bf16.mxu0 %v6056_v14  ;;  %v6060_v59 = vpack.c.bf16 %v3736_v23, %v3735_v22 }
 0xa80   :  { %5847 = vmatmul.mubr.msk.f32.vlgmr.msra.gmra.mrb[20].mxu1 %vm2475_vm13, %v3489_v8  ;;  %6059 = vmatpush3.bf16.msra.mxu0 %v6056_v14 }
 0xa81   :  { %5850 = vmatpush3.msra.mxu1 %v3629_v55  ;;  %5851 = vmatprep.mubr.msk.f32.mxu1 %vm2475_vm13, %v3626_v28  ;;  %v3892_v55 = vld [vmem:[%s7657_s2 + $0x68] sm:$0x1] }
 0xa82   :  { %6070 = vmatprep.subr.bf16.mxu1 %v6427_v0  ;;  %6061 = vmatprep.subr.bf16.mxu0 %v6060_v59 }
 0xa84   :  { %6063 = vmatpush3.bf16.msra.mxu0 %v6060_v59 }
 0xa85   :  { %6064 = vmatprep.subr.bf16.mxu0 %v6427_v0 }
 0xa88   :  { %5852 = vmatmul.mubr.msk.f32.vlgmr.msra.gmra.mrb[20].mxu1 %vm2475_vm13, %v3627_v32 }
 0xa89   :  { %5880 = vmatprep.mubr.msk.f32.mxu1 %vm6428_vm0, %v6429_v3 }
 0xb12   :  { %v5823_v36 = vpop.f32.mrb[24].mxu0 }
 0xb13   :  { %v3001_v58 = vmul.f32 0.25, %v5823_v36  ;;  %v2989_v42 = vpop.f32.mrb[25].mxu0 }
 0xb14   :  { %v3000_v62 = vmul.f32 0.25, %v2989_v42 }
 0xb15   :  { %v3008_v39 = vadd.f32 %v5423_v11, %v3001_v58 }
 0xb16   :  { %v3007_v19 = vadd.f32 %v5423_v11, %v3000_v62  ;;  %v6413_v11 = vld [vmem:[%s7660_s1 + $0x10] sm:$0xff]  ;;  %v6414_v62 = vld [vmem:[%s7660_s1 + $0x18] sm:$0xff] }
 0xb17   :  { %v3724_v35 = vadd.f32 %v3008_v39, %v1119_v13 }
 0xb18   :  { %v3723_v4 = vadd.f32 %v3007_v19, %v1118_v63 }
 0xb5b   :  { %v5853_v21 = vpop.f32.mrb[20].mxu1 }
 0xb5c   :  { %v3715_v61 = vmul.f32 0.25, %v5853_v21  ;;  %v3703_v51 = vpop.f32.mrb[21].mxu1 }
 0xb5d   :  { %v3714_v41 = vmul.f32 0.25, %v3703_v51 }
 0xb5e   :  { %v3722_v20 = vadd.f32 %v5437_v57, %v3715_v61  ;;  %v5399_v61 = vld [vmem:[%s7657_s2 + $0x61] ss:$0 sm:$0xff] }
 0xb5f   :  { %v3721_v2 = vadd.f32 %v5437_v57, %v3714_v41  ;;  %v1700_v57 = vmul.f32 0.25, %v6991_v47 }
 0xb60   :  { %v3726_v54 = vadd.f32 %v3724_v35, %v3722_v20 }
 0xb61   :  { %v3725_v53 = vadd.f32 %v3723_v4, %v3721_v2  ;;  %v1706_v41 = vadd.f32 %v5399_v61, %v1700_v57 }
 0xb62   :  { %v3728_v25 = vmul.f32 0.33333334, %v3726_v54  ;;  %v5451_v54 = vld [vmem:[%s7657_s2 + $0x6b] ss:$0 sm:$0xff] }
 0xb63   :  { %v3727_v10 = vmul.f32 0.33333334, %v3725_v53  ;;  %v3731_v20 = vmax.f32 %v1706_v41, 0.0  ;;  %v6415_v53 = vld [vmem:[%s7660_s1] sm:$0xff] }
 0xb64   :  { %v7349_v9 = vmax.f32 %v3728_v25, 0.0 }
 0xb65   :  { %v7351_v38 = vmax.f32 %v3727_v10, 0.0  ;;  %v4188_v10 = vmul.f32 %v5451_v54, %v3731_v20  ;;  %v5457_v54 = vld [vmem:[%s7657_s2 + $0x6d] ss:$0 sm:$0xff] }
 0xb66   :  { %v3972_v1 = vmul.f32 %v5444_v37, %v7349_v9  ;;  %v7368_v18 = vmul.f32 %v7347_v6, %v7349_v9 }
 0xb67   :  { %5862 = vmatprep.mubr.msk.f32.mxu0 %vm155_vm2, %v7351_v38  ;;  %v7374_v12 = vpack.c.bf16 %v7349_v9, %v7351_v38  ;;  %v3971_v44 = vmul.f32 %v5444_v37, %v7351_v38 }
 0xb68   :  { %5863 = vmatmul.mubr.msk.f32.vlgmr.msra.gmra.mrb[26].mxu0 %vm155_vm2, %v7349_v9  ;;  %v3976_v40 = vsel %vm155_vm2, %v3972_v1, 0.0 }
 0xb69   :  { %6066 = vmatpush3.bf16.msra.mxu0 %v6065_v7  ;;  %3977 = vadd.xlane.f32.xlu1 %v3976_v40  ;;  %v3973_v15 = vsel %vm155_vm2, %v3971_v44, 0.0  ;;  %v6416_v7 = vld [vmem:[%s7660_s1 + $0x8] sm:$0xff]  ;;  %v4189_v44 = vsel %vm155_vm2, %v4188_v10, 0.0 }
 0xb6a   :  { %6073 = vmatpush3.bf16.xpose.msk.msra.mxu1 %vm6597_vm3, %v7374_v12  ;;  %3974 = vadd.xlane.f32.xlu0 %v3973_v15 }
 0xb6b   :  { %6067 = vmatprep.subr.bf16.mxu0 %v6427_v0  ;;  %5873 = vmatprep.mubr.msk.f32.mxu0 %vm6428_vm0, %v6429_v3 }
 0xb6c   :  { %6082 = vmatprep.subr.bf16.mxu1 %v6427_v0 }
 0xb6d   :  { %6069 = vmatpush3.bf16.msra.mxu0 %v6068_v27 }
 0xb70   :  { %5874 = vmatmul.mubr.msk.f32.vlgmr.msra.gmra.mrb[28].mxu0 %vm155_vm2, %v6571_v43 }
 0xb71   :  { %5881 = vmatmul.mubr.msk.f32.vlgmr.msra.gmra.mrb[22].mxu1 %vm155_vm2, %v3892_v55 }
 0xb72   :  { %5901 = vmatprep.mubr.msk.f32.mxu1 %vm6428_vm0, %v6429_v3 }
 0xbf6   :  { %v3978_v14 = vpop.xlane.xlu1 %3977 }
 0xbf7   :  { %v3975_v22 = vpop.xlane.xlu0 %3974 }
 0xc3b   :  { %v5864_v45 = vpop.f32.mrb[26].mxu0 }
 0xc3c   :  { %v3809_v46 = vpop.f32.mrb[27].mxu0 }
 0xc3d   :  { %v7398_v5 = vpack.i.bf16 %v5864_v45, %v3809_v46  ;;  %v6074_v8 = vpack.c.bf16 %v5864_v45, %v3809_v46 }
 0xc3f   :  { %6075 = vmatprep.subr.bf16.mxu0 %v6074_v8 }
 0xc40   :  { %6077 = vmatpush3.bf16.msra.mxu0 %v6074_v8 }
 0xc41   :  { %6078 = vmatprep.subr.bf16.mxu0 %v6427_v0 }
 0xc43   :  { %v7401_v28 = vpop.f32.mrb[28].mxu0 }
 0xc44   :  { %v5875_v29 = vpop.f32.mrb[29].mxu0  ;;  %v3963_v32 = vpop.f32.mrb[22].mxu1 }
 0xc45   :  { %v3982_v49 = vrot.slane %v3963_v32, %v6688_v34  ;;  %v5882_v52 = vpop.f32.mrb[23].mxu1 }
 0xc47   :  { %v3983_v23 = vadd.f32 %v3982_v49, %v3975_v22  ;;  %v3984_v59 = vadd.f32 %v3982_v49, %v3978_v14  ;;  %v4109_v49 = vld [vmem:[%s7657_s2 + $0x6a] sm:$0x1] }
 0xc49   :  { %v3987_v33 = vmul.f32 0.2, %v3983_v23  ;;  %v3988_v26 = vmul.f32 0.2, %v3984_v59  ;;  %vm3985_vm11 = vcmp.ge.f32.partialorder %v3983_v23, 0.0  ;;  %vm3986_vm12 = vcmp.ge.f32.partialorder %v3984_v59, 0.0 }
 0xc4b   :  { %v3989_v60 = vsel %vm3985_vm11, %v3983_v23, %v3987_v33  ;;  %v3990_v36 = vsel %vm3986_vm12, %v3984_v59, %v3988_v26 }
 0xc4c   :  { %v3991_v58 = vadd.f32 %v6413_v11, %v3989_v60  ;;  %v3992_v13 = vadd.f32 %v6414_v62, %v3990_v36  ;;  %v6417_v60 = vld [vmem:[%s7660_s1 + $0x30] sm:$0xff] }
 0xc4e   :  { %v3993_v42 = vsel %vm32_vm1, %v3991_v58, -inf  ;;  %v3996_v39 = vsel %vm32_vm1, %v3992_v13, -inf }
 0xc4f   :  { %3994 = vmax.xlane.f32.xlu0 %v3993_v42  ;;  %v5468_v42 = vld [vmem:[%s7657_s2 + $0x71] ss:$0 sm:$0xff] }
 0xc53   :  { %3997 = vmax.xlane.f32.xlu0 %v3996_v39 }
 0xcdc   :  { %v3995_v63 = vpop.xlane.xlu0 %3994 }
 0xcdd   :  { %v3999_v19 = vsub.f32 %v3991_v58, %v3995_v63  ;;  %v4572_v58 = vmul.f32 %v7347_v6, %v7351_v38  ;;  %v4790_v63 = vmul.f32 %v5468_v42, %v7349_v9 }
 0xcdf   :  { %v4001_v35 = vmul.f32 1.442695, %v3999_v19  ;;  %v4574_v62 = vsel %vm155_vm2, %v4572_v58, 0.0  ;;  %v4794_v19 = vsel %vm155_vm2, %v4790_v63, 0.0 }
 0xce0   :  { %v3998_v4 = vpop.xlane.xlu0 %3997 }
 0xce1   :  { %6381 = vpow2.f32 %v4001_v35  ;;  %v4000_v21 = vsub.f32 %v3992_v13, %v3998_v4  ;;  %v4789_v13 = vmul.f32 %v5468_v42, %v7351_v38  ;;  %v5409_v38 = vld [vmem:[%s7657_s2 + $0x62] ss:$0 sm:$0xff] }
 0xce3   :  { %v4003_v51 = vmul.f32 1.442695, %v4000_v21  ;;  %v4791_v39 = vsel %vm155_vm2, %v4789_v13, 0.0 }
 0xce5   :  { %6383 = vpow2.f32 %v4003_v51  ;;  %v2287_v51 = vmul.f32 0.25, %v7000_v50 }
 0xce7   :  { %v2293_v9 = vadd.f32 %v5409_v38, %v2287_v51 }
 0xce9   :  { %v3732_v20 = vmax.f32 %v2293_v9, 0.0 }
 0xceb   :  { %v6382_v2 = vpop.eup %6381 }
 0xcec   :  { %v4005_v25 = vmul.f32 %v6415_v53, %v6382_v2  ;;  %v6418_v53 = vld [vmem:[%s7660_s1 + $0x20] sm:$0xff] }
 0xcee   :  { %v4007_v47 = vsel %vm32_vm1, %v4005_v25, 0.0 }
 0xcef   :  { %v6384_v37 = vpop.eup %6383  ;;  %4008 = vadd.xlane.f32.xlu1 %v4007_v47  ;;  %v4381_v47 = vmul.f32 %v5457_v54, %v3732_v20  ;;  %v4493_v20 = vld [vmem:[%s7657_s2 + $0x6e] sm:$0x1] }
 0xcf0   :  { %v4006_v1 = vmul.f32 %v6416_v7, %v6384_v37 }
 0xcf1   :  { %v4382_v10 = vsel %vm155_vm2, %v4381_v47, 0.0 }
 0xcf2   :  { %v4010_v40 = vsel %vm32_vm1, %v4006_v1, 0.0 }
 0xcf3   :  { %4190 = vadd.xlane.f32.xlu1 %v4189_v44  ;;  %4011 = vadd.xlane.f32.xlu0 %v4010_v40  ;;  %v4302_v40 = vld [vmem:[%s7657_s2 + $0x6c] sm:$0x1] }
 0xd7c   :  { %v4009_v15 = vpop.xlane.xlu1 %4008 }
 0xd7d   :  { %vm4013_vm14 = vcmp.gt.f32.partialorder %v4009_v15, 0.0 }
 0xd7e   :  { %v4015_v27 = vsel %vm4013_vm14, %v4009_v15, 1.0 }
 0xd7f   :  { %6385 = vrcp.f32 %v4015_v27 }
 0xd80   :  { %v4012_v55 = vpop.xlane.xlu0 %4011  ;;  %v4191_v23 = vpop.xlane.xlu1 %4190 }
 0xd81   :  { %vm4014_vm15 = vcmp.gt.f32.partialorder %v4012_v55, 0.0 }
 0xd82   :  { %v4016_v45 = vsel %vm4014_vm15, %v4012_v55, 1.0 }
 0xd83   :  { %6387 = vrcp.f32 %v4016_v45 }
 0xd89   :  { %v6386_v46 = vpop.eup %6385 }
 0xd8a   :  { %v4021_v8 = vmul.f32 %v6386_v46, %v4005_v25 }
 0xd8c   :  { %5887 = vmatprep.mubr.msk.f32.mxu0 %vm32_vm1, %v4021_v8 }
 0xd8d   :  { %v6388_v29 = vpop.eup %6387 }
 0xd8e   :  { %v4022_v32 = vmul.f32 %v6388_v29, %v4006_v1 }
 0xd90   :  { %5888 = vmatmul.mubr.msk.f32.vlgmr.msra.gmra.mrb[30].mxu0 %vm32_vm1, %v4022_v32 }
 0xd91   :  { %6081 = vmatpush3.bf16.xpose.msk.msra.mxu0 %vm6597_vm3, %v7374_v12  ;;  %5894 = vmatprep.mubr.msk.f32.mxu0 %vm6428_vm0, %v6429_v3 }
 0xd92   :  { %6089 = vmatprep.subr.bf16.mxu0 %v6427_v0 }
 0xd98   :  { %5895 = vmatmul.mubr.msk.f32.vlgmr.msra.gmra.mrb[32].mxu0 %vm155_vm2, %v4109_v49 }
 0xd99   :  { %5915 = vmatprep.mubr.msk.f32.mxu0 %vm6428_vm0, %v6429_v3 }
 0xe6b   :  { %v4180_v52 = vpop.f32.mrb[32].mxu0 }
 0xe6c   :  { %v4195_v14 = vrot.slane %v4180_v52, %v6688_v34  ;;  %v5896_v22 = vpop.f32.mrb[33].mxu0 }
 0xe6e   :  { %v4196_v59 = vadd.f32 %v4195_v14, %v4191_v23  ;;  %v6419_v14 = vld [vmem:[%s7660_s1 + $0x50] sm:$0xff] }
 0xe70   :  { %v4198_v33 = vmul.f32 0.2, %v4196_v59  ;;  %vm4197_vm4 = vcmp.ge.f32.partialorder %v4196_v59, 0.0 }
 0xe72   :  { %v4199_v26 = vsel %vm4197_vm4, %v4196_v59, %v4198_v33 }
 0xe73   :  { %v4200_v36 = vadd.f32 %v6417_v60, %v4199_v26 }
 0xe75   :  { %v4201_v11 = vsel %vm32_vm1, %v4200_v36, -inf }
 0xe76   :  { %4202 = vmax.xlane.f32.xlu0 %v4201_v11 }
 0xe8c   :  { %6233 = vrot.lane.b32.xlu0 %v7398_v5, %s6437_s30 }
 0xeab   :  { %4575 = vadd.xlane.f32.xlu0 %v4574_v62 }
 0xeaf   :  { %4792 = vadd.xlane.f32.xlu0 %v4791_v39 }
 0xeb3   :  { %4795 = vadd.xlane.f32.xlu0 %v4794_v19 }
 0xf03   :  { %v4203_v35 = vpop.xlane.xlu0 %4202 }
 0xf04   :  { %v4204_v4 = vsub.f32 %v4200_v36, %v4203_v35  ;;  %v6420_v36 = vld [vmem:[%s7660_s1 + $0x40] sm:$0xff]  ;;  %v4577_v35 = vsel %vm155_vm2, %v7368_v18, 0.0 }
 0xf06   :  { %v4205_v6 = vmul.f32 1.442695, %v4204_v4  ;;  %v6421_v4 = vld [vmem:[%s7660_s1 + $0x90] sm:$0xff] }
 0xf07   :  { %v6234_v21 = vpop.permute.xlu0 %6233 }
 0xf08   :  { %6389 = vpow2.f32 %v4205_v6  ;;  %v6236_v57 = vunpack.i.h.bf16 %v6234_v21  ;;  %v6235_v61 = vunpack.i.l.bf16 %v6234_v21 }
 0xf0a   :  { %v6083_v41 = vpack.c.bf16 %v6236_v57, %v6235_v61 }
 0xf0c   :  { %6084 = vmatpush3.bf16.msra.mxu1 %v6083_v41 }
 0xf0d   :  { %6085 = vmatprep.subr.bf16.mxu1 %v6427_v0 }
 0xf12   :  { %v6390_v2 = vpop.eup %6389 }
 0xf13   :  { %v4207_v50 = vmul.f32 %v6418_v53, %v6390_v2 }
 0xf15   :  { %v4208_v25 = vsel %vm32_vm1, %v4207_v50, 0.0 }
 0xf16   :  { %4209 = vadd.xlane.f32.xlu1 %v4208_v25 }
 0xf1a   :  { %4383 = vadd.xlane.f32.xlu1 %v4382_v10 }
 0xf38   :  { %v4576_v42 = vpop.xlane.xlu0 %4575 }
 0xf3c   :  { %v4793_v13 = vpop.xlane.xlu0 %4792 }
 0xfa3   :  { %v4210_v37 = vpop.xlane.xlu1 %4209 }
 0xfa4   :  { %vm4211_vm5 = vcmp.gt.f32.partialorder %v4210_v37, 0.0 }
 0xfa5   :  { %v4212_v7 = vsel %vm4211_vm5, %v4210_v37, 1.0 }
 0xfa6   :  { %6391 = vrcp.f32 %v4212_v7 }
 0xfa7   :  { %v4384_v46 = vpop.xlane.xlu1 %4383 }
 0xfb0   :  { %v6392_v1 = vpop.eup %6391 }
 0xfb1   :  { %v4215_v44 = vmul.f32 %v6392_v1, %v4207_v50 }
 0xfb3   :  { %5902 = vmatmul.mubr.msk.f32.vlgmr.msra.gmra.mrb[24].mxu1 %vm32_vm1, %v4215_v44 }
 0xfb4   :  { %6088 = vmatpush3.bf16.xpose.msk.msra.mxu1 %vm6597_vm3, %v7374_v12  ;;  %5908 = vmatprep.mubr.msk.f32.mxu1 %vm6428_vm0, %v6429_v3 }
 0xfb5   :  { %5928 = vmatprep.subr.mxu1 %v6429_v3 }
 0xfbb   :  { %5909 = vmatmul.mubr.msk.f32.vlgmr.msra.gmra.mrb[26].mxu1 %vm155_vm2, %v4302_v40 }
 0xfbc   :  { %5929 = vmatpush3.xpose.msk.msra.mxu1 %vm155_vm2, %v6571_v43  ;;  %5930 = vmatprep.mubr.msk.f32.mxu1 %vm6428_vm0, %v6429_v3 }
 0xfbd   :  { %6092 = vmatprep.subr.bf16.mxu1 %v6427_v0 }
 0xfbf   :  { %5931 = vmatmul.mubr.msk.f32.vlgmr.msra.gmra.mrb[28].mxu1 %vm155_vm2, %v4710_v56  ;;  %v4796_v56 = vpop.xlane.xlu0 %4795 }
 0xfc0   :  { %5946 = vmatprep.mubr.msk.f32.mxu1 %vm6428_vm0, %v6429_v3 }
0x1086   :  { %v7494_v12 = vpop.f32.mrb[24].mxu1 }
0x1087   :  { %v5903_v15 = vpop.f32.mrb[25].mxu1 }
0x108e   :  { %v4373_v27 = vpop.f32.mrb[26].mxu1 }
0x108f   :  { %v4388_v55 = vrot.slane %v4373_v27, %v6688_v34  ;;  %v5910_v45 = vpop.f32.mrb[27].mxu1 }
0x1091   :  { %v4389_v8 = vadd.f32 %v4388_v55, %v4384_v46 }
0x1092   :  { %v4781_v29 = vpop.f32.mrb[28].mxu1 }
0x1093   :  { %v4391_v32 = vmul.f32 0.2, %v4389_v8  ;;  %vm4390_vm3 = vcmp.ge.f32.partialorder %v4389_v8, 0.0  ;;  %v5932_v49 = vpop.f32.mrb[29].mxu1  ;;  %v4800_v62 = vrot.slane %v4781_v29, %v6688_v34 }
0x1095   :  { %v4392_v52 = vsel %vm4390_vm3, %v4389_v8, %v4391_v32  ;;  %v4801_v39 = vadd.f32 %v4800_v62, %v4793_v13  ;;  %v4802_v15 = vadd.f32 %v4800_v62, %v4796_v56  ;;  %v6422_v32 = vld [vmem:[%s7660_s1 + $0x70] sm:$0xff] }
0x1096   :  { %v4393_v22 = vadd.f32 %v6419_v14, %v4392_v52  ;;  %v6423_v52 = vld [vmem:[%s7660_s1 + $0x78] sm:$0xff] }
0x1097   :  { %v4805_v63 = vmul.f32 0.2, %v4801_v39  ;;  %vm4803_vm6 = vcmp.ge.f32.partialorder %v4801_v39, 0.0  ;;  %vm4804_vm10 = vcmp.ge.f32.partialorder %v4802_v15, 0.0 }
0x1098   :  { %v4394_v23 = vsel %vm32_vm1, %v4393_v22, -inf }
0x1099   :  { %4395 = vmax.xlane.f32.xlu1 %v4394_v23  ;;  %v4807_v19 = vsel %vm4803_vm6, %v4801_v39, %v4805_v63 }
0x109a   :  { %v4809_v6 = vadd.f32 %v6421_v4, %v4807_v19 }
0x109c   :  { %v4811_v21 = vsel %vm2475_vm13, %v4809_v6, -inf }
0x1126   :  { %v4396_v59 = vpop.xlane.xlu1 %4395 }
0x1127   :  { %v4397_v33 = vsub.f32 %v4393_v22, %v4396_v59  ;;  %v6424_v59 = vld [vmem:[%s7660_s1 + $0x98] sm:$0xff] }
0x1129   :  { %v4398_v26 = vmul.f32 1.442695, %v4397_v33 }
0x112b   :  { %6393 = vpow2.f32 %v4398_v26 }
0x1135   :  { %v6394_v60 = vpop.eup %6393 }
0x1136   :  { %v4400_v11 = vmul.f32 %v6420_v36, %v6394_v60 }
0x1138   :  { %v4401_v58 = vsel %vm32_vm1, %v4400_v11, 0.0 }
0x1139   :  { %4402 = vadd.xlane.f32.xlu1 %v4401_v58 }
0x114a   :  { %6238 = vrot.lane.b32.xlu1 %v7398_v5, %s6434_s15 }
0x116e   :  { %4578 = vadd.xlane.f32.xlu1 %v4577_v35  ;;  %v6425_v35 = vld [vmem:[%s7660_s1 + $0x60] sm:$0xff] }
0x1172   :  { %4812 = vmax.xlane.f32.xlu1 %v4811_v21 }
0x11c6   :  { %v4403_v5 = vpop.xlane.xlu1 %4402 }
0x11c7   :  { %vm4404_vm7 = vcmp.gt.f32.partialorder %v4403_v5, 0.0 }
0x11c8   :  { %v4405_v57 = vsel %vm4404_vm7, %v4403_v5, 1.0  ;;  %v6426_v5 = vld [vmem:[%s7660_s1 + $0x68] sm:$0xff] }
0x11c9   :  { %6395 = vrcp.f32 %v4405_v57 }
0x11ca   :  { %v6239_v61 = vpop.permute.xlu1 %6238 }
0x11cb   :  { %v6241_v51 = vunpack.i.h.bf16 %v6239_v61  ;;  %v6240_v38 = vunpack.i.l.bf16 %v6239_v61 }
0x11cd   :  { %v6090_v41 = vpack.c.bf16 %v6241_v51, %v6240_v38 }
0x11cf   :  { %6091 = vmatpush3.bf16.msra.mxu0 %v6090_v41 }
0x11d0   :  { %5918 = vmatprep.subr.mxu0 %v6429_v3 }
0x11d3   :  { %v6396_v18 = vpop.eup %6395 }
0x11d4   :  { %v4408_v9 = vmul.f32 %v6396_v18, %v4400_v11  ;;  %v6242_v18 = vpack.i.bf16 %v7339_v17, %v7334_v31 }
0x11d6   :  { %5916 = vmatmul.mubr.msk.f32.vlgmr.msra.gmra.mrb[34].mxu0 %vm32_vm1, %v4408_v9  ;;  %v6247_v9 = vpack.i.bf16 %v7364_v30, %v7359_v24 }
0x11d7   :  { %5920 = vmatprep.mubr.msk.f32.mxu0 %vm6428_vm0, %v6429_v3 }
0x11d8   :  { %5919 = vmatpush3.xpose.msk.msra.mxu0 %vm155_vm2, %v6571_v43 }
0x11d9   :  { %5923 = vmatprep.subr.mxu0 %v7401_v28 }
0x11db   :  { %5921 = vmatmul.mubr.msk.f32.vlgmr.msra.gmra.mrb[36].mxu0 %vm155_vm2, %v4493_v20 }
0x11dc   :  { %5924 = vmatpush3.msra.mxu0 %v7401_v28 }
0x11fb   :  { %v4579_v2 = vpop.xlane.xlu1 %4578 }
0x11ff   :  { %v4813_v54 = vpop.xlane.xlu1 %4812 }
0x1200   :  { %v4817_v53 = vsub.f32 %v4809_v6, %v4813_v54 }
0x1202   :  { %v4819_v50 = vmul.f32 1.442695, %v4817_v53 }
0x1204   :  { %6397 = vpow2.f32 %v4819_v50 }
0x120e   :  { %v6398_v25 = vpop.eup %6397 }
0x120f   :  { %v7527_v47 = vmul.f32 %v6398_v25, %v7223_v16  ;;  %v4806_v16 = vmul.f32 0.2, %v4802_v15 }
0x1211   :  { %v4825_v10 = vsel %vm2475_vm13, %v7527_v47, 0.0  ;;  %v4808_v22 = vsel %vm4804_vm10, %v4802_v15, %v4806_v16 }
0x1212   :  { %4826 = vadd.xlane.f32.xlu1 %v4825_v10  ;;  %v4810_v33 = vadd.f32 %v6424_v59, %v4808_v22  ;;  %v5472_v22 = vld [vmem:[%s7657_s2 + $0x80] ss:$0 sm:$0xff] }
0x1214   :  { %v4814_v26 = vsel %vm2475_vm13, %v4810_v33, -inf }
0x129f   :  { %v4827_v20 = vpop.xlane.xlu1 %4826 }
0x12a0   :  { %vm4831_vm11 = vcmp.gt.f32.partialorder %v4827_v20, 0.0 }
0x12a1   :  { %v4833_v54 = vsel %vm4831_vm11, %v4827_v20, 1.0 }
0x12a9   :  { %v7531_v37 = vpop.f32.mrb[34].mxu0 }
0x12aa   :  { %v5917_v7 = vpop.f32.mrb[35].mxu0 }
0x12ae   :  { %v4564_v1 = vpop.f32.mrb[36].mxu0 }
0x12af   :  { %v4583_v44 = vrot.slane %v4564_v1, %v6688_v34  ;;  %v5922_v40 = vpop.f32.mrb[37].mxu0 }
0x12b1   :  { %v4584_v27 = vadd.f32 %v4583_v44, %v4576_v42  ;;  %v4585_v55 = vadd.f32 %v4583_v44, %v4579_v2 }
0x12b3   :  { %v4588_v45 = vmul.f32 0.2, %v4584_v27  ;;  %v4589_v46 = vmul.f32 0.2, %v4585_v55  ;;  %vm4586_vm8 = vcmp.ge.f32.partialorder %v4584_v27, 0.0  ;;  %vm4587_vm9 = vcmp.ge.f32.partialorder %v4585_v55, 0.0 }
0x12b5   :  { %v4590_v8 = vsel %vm4586_vm8, %v4584_v27, %v4588_v45  ;;  %v4591_v29 = vsel %vm4587_vm9, %v4585_v55, %v4589_v46 }
0x12b6   :  { %v4592_v49 = vadd.f32 %v6422_v32, %v4590_v8  ;;  %v4593_v14 = vadd.f32 %v6423_v52, %v4591_v29  ;;  %v5109_v32 = vld [vmem:[%s7661_s4 + $0x10] sm:$0xff]  ;;  %v5199_v52 = vld [vmem:[%s7661_s4 + $0x20] sm:$0xff] }
0x12b8   :  { %v4594_v34 = vsel %vm2475_vm13, %v4592_v49, -inf  ;;  %v4597_v23 = vsel %vm2475_vm13, %v4593_v14, -inf }
0x12b9   :  { %4595 = vmax.xlane.f32.xlu0 %v4594_v34 }
0x12bd   :  { %4598 = vmax.xlane.f32.xlu0 %v4597_v23 }
0x12c1   :  { %4815 = vmax.xlane.f32.xlu0 %v4814_v26 }
0x1346   :  { %v4596_v60 = vpop.xlane.xlu0 %4595 }
0x1347   :  { %v4600_v36 = vsub.f32 %v4592_v49, %v4596_v60  ;;  %v5110_v49 = vld [vmem:[%s7661_s4 + $0x18] sm:$0xff] }
0x1348   :  { %v6101_v34 = vpack.c.bf16 %v5110_v49, %v5109_v32 }
0x1349   :  { %v4602_v11 = vmul.f32 1.442695, %v4600_v36  ;;  %v5445_v36 = vld [vmem:[%s7657_s2 + $0x78] ss:$0 sm:$0xff] }
0x134a   :  { %v4599_v58 = vpop.xlane.xlu0 %4598 }
0x134b   :  { %6399 = vpow2.f32 %v4602_v11  ;;  %v4601_v42 = vsub.f32 %v4593_v14, %v4599_v58  ;;  %v5200_v14 = vld [vmem:[%s7661_s4 + $0x28] sm:$0xff]  ;;  %v5463_v11 = vld [vmem:[%s7657_s2 + $0x7b] ss:$0 sm:$0xff] }
0x134c   :  { %v6106_v59 = vpack.c.bf16 %v5200_v14, %v5199_v52  ;;  %v6114_v58 = vadd.f32 %v5463_v11, %v5445_v36 }
0x134d   :  { %v4604_v62 = vmul.f32 1.442695, %v4601_v42 }
0x134e   :  { %v4816_v13 = vpop.xlane.xlu0 %4815 }
0x134f   :  { %6401 = vpow2.f32 %v4604_v62  ;;  %v4818_v39 = vsub.f32 %v4810_v33, %v4816_v13  ;;  %v5469_v62 = vld [vmem:[%s7657_s2 + $0x7c] ss:$0 sm:$0xff] }
0x1351   :  { %v4821_v63 = vmul.f32 1.442695, %v4818_v39 }
0x1353   :  { %6403 = vpow2.f32 %v4821_v63 }
0x1355   :  { %v6400_v19 = vpop.eup %6399 }
0x1356   :  { %v4606_v4 = vmul.f32 %v6425_v35, %v6400_v19  ;;  %v5280_v19 = vld [vmem:[%s7661_s4 + $0x30] sm:$0xff]  ;;  %v5281_v35 = vld [vmem:[%s7661_s4 + $0x38] sm:$0xff] }
0x1358   :  { %v4608_v6 = vsel %vm2475_vm13, %v4606_v4, 0.0 }
0x1359   :  { %v6402_v21 = vpop.eup %6401  ;;  %4609 = vadd.xlane.f32.xlu1 %v4608_v6 }
0x135a   :  { %v4607_v57 = vmul.f32 %v6426_v5, %v6402_v21  ;;  %v6109_v21 = vpack.c.bf16 %v5281_v35, %v5280_v19 }
0x135c   :  { %v4611_v61 = vsel %vm2475_vm13, %v4607_v57, 0.0 }
0x135d   :  { %v6404_v51 = vpop.eup %6403  ;;  %4612 = vadd.xlane.f32.xlu0 %v4611_v61 }
0x135e   :  { %v4824_v38 = vmul.f32 %v6404_v51, %v7205_v48  ;;  %v5474_v51 = vld [vmem:[%s7661_s4 + $0x40] ss:$0 sm:$0xff] }
0x1360   :  { %v4828_v41 = vsel %vm2475_vm13, %v4824_v38, 0.0 }
0x1361   :  { %4829 = vadd.xlane.f32.xlu0 %v4828_v41 }
0x136a   :  { %6243 = vrot.lane.b32.xlu1 %v6242_v18, %s6434_s15 }
0x136e   :  { %6248 = vrot.lane.b32.xlu1 %v6247_v9, %s6434_s15  ;;  %v5479_v9 = vld [vmem:[%s7661_s4 + $0x42] ss:$0 sm:$0xff] }
0x1377   :  { %4847 = vrot.lane.b32.xlu0 %v7401_v28, %s6437_s30 }
0x13e6   :  { %v4610_v2 = vpop.xlane.xlu1 %4609 }
0x13e7   :  { %vm4614_vm12 = vcmp.gt.f32.partialorder %v4610_v2, 0.0 }
0x13e8   :  { %v4616_v48 = vsel %vm4614_vm12, %v4610_v2, 1.0  ;;  %v5476_v2 = vld [vmem:[%s7661_s4 + $0x41] ss:$0 sm:$0xff] }
0x13e9   :  { %6405 = vrcp.f32 %v4616_v48 }
0x13ea   :  { %v6244_v53 = vpop.permute.xlu1 %6243  ;;  %v4613_v50 = vpop.xlane.xlu0 %4612  ;;  %6407 = vrcp.f32 %v4833_v54 }
0x13eb   :  { %v6246_v31 = vunpack.i.h.bf16 %v6244_v53  ;;  %v6245_v17 = vunpack.i.l.bf16 %v6244_v53  ;;  %vm4615_vm14 = vcmp.gt.f32.partialorder %v4613_v50, 0.0 }
0x13ec   :  { %v4617_v25 = vsel %vm4615_vm14, %v4613_v50, 1.0 }
0x13ed   :  { %v6093_v24 = vpack.c.bf16 %v6246_v31, %v6245_v17  ;;  %6409 = vrcp.f32 %v4617_v25  ;;  %v5481_v31 = vld [vmem:[%s7661_s4 + $0x43] ss:$0 sm:$0xff] }
0x13ee   :  { %v6249_v30 = vpop.permute.xlu1 %6248  ;;  %v4830_v10 = vpop.xlane.xlu0 %4829 }
0x13ef   :  { %v6251_v7 = vunpack.i.h.bf16 %v6249_v30  ;;  %v6250_v28 = vunpack.i.l.bf16 %v6249_v30  ;;  %vm4832_vm15 = vcmp.gt.f32.partialorder %v4830_v10, 0.0  ;;  %6094 = vmatpush3.bf16.msra.mxu1 %v6093_v24 }
0x13f0   :  { %v4834_v1 = vsel %vm4832_vm15, %v4830_v10, 1.0  ;;  %6095 = vmatprep.subr.bf16.mxu1 %v6427_v0 }
0x13f1   :  { %v6096_v44 = vpack.c.bf16 %v6251_v7, %v6250_v28  ;;  %6411 = vrcp.f32 %v4834_v1 }
0x13f2   :  { %v4848_v40 = vpop.permute.xlu0 %4847 }
0x13f3   :  { %v6406_v56 = vpop.eup %6405  ;;  %5933 = vmatprep.subr.mxu0 %v4848_v40  ;;  %6097 = vmatpush3.bf16.msra.mxu1 %v6096_v44 }
0x13f4   :  { %v4622_v15 = vmul.f32 %v6406_v56, %v4606_v4  ;;  %v6408_v27 = vpop.eup %6407  ;;  %6102 = vmatprep.subr.bf16.mxu1 %v6101_v34 }
0x13f5   :  { %v4839_v46 = vmul.f32 %v6408_v27, %v7527_v47  ;;  %v5029_v47 = vld [vmem:[%s7661_s4 + $0x8] sm:$0xff] }
0x13f6   :  { %5925 = vmatprep.mubr.msk.f32.mxu0 %vm2475_vm13, %v4622_v15  ;;  %5947 = vmatmul.mubr.msk.f32.vlgmr.msra.gmra.mrb[30].mxu1 %vm155_vm2, %v6571_v43  ;;  %v5028_v43 = vld [vmem:[%s7661_s4] sm:$0xff] }
0x13f7   :  { %v6410_v55 = vpop.eup %6409  ;;  %v6099_v29 = vpack.c.bf16 %v5029_v47, %v5028_v43  ;;  %6104 = vmatpush3.bf16.msra.mxu1 %v6101_v34 }
0x13f8   :  { %v4623_v45 = vmul.f32 %v6410_v55, %v4607_v57  ;;  %6108 = vmatprep.subr.bf16.mxu1 %v6427_v0  ;;  %v5458_v57 = vld [vmem:[%s7657_s2 + $0x7a] ss:$0 sm:$0xff] }
0x13f9   :  { %v4490_v61 = vadd.f32 %v5458_v57, %v7531_v37 }
0x13fa   :  { %5926 = vmatmul.mubr.msk.f32.vlgmr.msra.gmra.mrb[30].mxu0 %vm2475_vm13, %v4623_v45 }
0x13fb   :  { %5934 = vmatpush3.msra.mxu0 %v4848_v40  ;;  %5935 = vmatprep.mubr.msk.f32.mxu0 %vm2475_vm13, %v4839_v46  ;;  %v6412_v16 = vpop.eup %6411 }
0x13fc   :  { %6098 = vmatprep.subr.bf16.mxu0 %v6427_v0  ;;  %v4840_v8 = vmul.f32 %v6412_v16, %v4824_v38 }
0x1402   :  { %5936 = vmatmul.mubr.msk.f32.vlgmr.msra.gmra.mrb[30].mxu0 %vm2475_vm13, %v4840_v8 }
0x1403   :  { %5953 = vmatprep.mubr.msk.f32.mxu0 %vm6428_vm0, %v6429_v3  ;;  %6100 = vmatpush3.bf16.msra.mxu0 %v6099_v29 }
0x1404   :  { %6105 = vmatprep.subr.bf16.mxu0 %v6427_v0  ;;  %v5452_v0 = vld [vmem:[%s7657_s2 + $0x79] ss:$0 sm:$0xff] }
0x1405   :  { %v4299_v60 = vadd.f32 %v5452_v0, %v7494_v12 }
0x14c9   :  { %v5024_v23 = vpop.f32.mrb[30].mxu1 }
0x14ca   :  { %v5025_v33 = vadd.f32 %v5472_v22, %v5024_v23  ;;  %v5948_v26 = vpop.f32.mrb[31].mxu1 }
0x14cc   :  { %5954 = vmatmul.mubr.msk.f32.vlgmr.msra.gmra.mrb[38].mxu0 %vm32_vm1, %v5025_v33 }
0x14cd   :  { %6107 = vmatpush3.bf16.msra.mxu0 %v6106_v59  ;;  %5967 = vmatprep.mubr.msk.f32.mxu0 %vm6428_vm0, %v6429_v3 }
0x14d0   :  { %5968 = vmatmul.mubr.msk.f32.vlgmr.msra.gmra.mrb[40].mxu0 %vm32_vm1, %v4299_v60 }
0x14d5   :  { %v5937_v42 = vpop.f32.mrb[30].mxu0 }
0x14d6   :  { %v6112_v13 = vadd.f32 %v6114_v58, %v5937_v42  ;;  %v4922_v39 = vpop.f32.mrb[31].mxu0 }
0x14d7   :  { %v6115_v63 = vadd.f32 %v6114_v58, %v4922_v39 }
0x14d8   :  { %v6113_v12 = vadd.f32 %v6112_v13, %v5469_v62 }
0x14d9   :  { %v6116_v4 = vadd.f32 %v6115_v63, %v5469_v62 }
0x14da   :  { %v4936_v5 = vmul.f32 0.33333334, %v6113_v12 }
0x14db   :  { %v4935_v6 = vmul.f32 0.33333334, %v6116_v4 }
0x14dd   :  { %5960 = vmatprep.mubr.msk.f32.mxu1 %vm32_vm1, %v4935_v6 }
0x14de   :  { %5961 = vmatmul.mubr.msk.f32.vlgmr.msra.gmra.mrb[32].mxu1 %vm32_vm1, %v4936_v5 }
0x14df   :  { %6110 = vmatpush3.bf16.msra.mxu1 %v6109_v21  ;;  %5974 = vmatprep.mubr.msk.f32.mxu1 %vm6428_vm0, %v6429_v3 }
0x14e2   :  { %5975 = vmatmul.mubr.msk.f32.vlgmr.msra.gmra.mrb[34].mxu1 %vm32_vm1, %v4490_v61 }
0x159f   :  { %v5104_v38 = vpop.f32.mrb[38].mxu0 }
0x15a0   :  { %v5105_v41 = vadd.f32 %v5474_v51, %v5104_v38  ;;  %v5955_v18 = vpop.f32.mrb[39].mxu0 }
0x15a2   :  { %5108 = vst [vmem:[%s7662_s5] sm:$0xff] %v5105_v41 }
0x15a3   :  { %v5275_v3 = vpop.f32.mrb[40].mxu0 }
0x15a4   :  { %v5276_v20 = vadd.f32 %v5479_v9, %v5275_v3  ;;  %v5969_v37 = vpop.f32.mrb[41].mxu0 }
0x15a6   :  { %5279 = vst [vmem:[%s7662_s5 + $0x18] sm:$0xff] %v5276_v20 }
0x15b1   :  { %v5962_v48 = vpop.f32.mrb[32].mxu1 }
0x15b2   :  { %v5194_v54 = vadd.f32 %v5962_v48, %v5476_v2  ;;  %v5188_v53 = vpop.f32.mrb[33].mxu1 }
0x15b3   :  { %v5189_v50 = vadd.f32 %v5476_v2, %v5188_v53 }
0x15b4   :  { %5198 = vst [vmem:[%s7662_s5 + $0x10] sm:$0xff] %v5194_v54 }
0x15b5   :  { %5197 = vst [vmem:[%s7662_s5 + $0x8] sm:$0xff] %v5189_v50  ;;  %v5356_v17 = vpop.f32.mrb[34].mxu1 }
0x15b6   :  { %v5357_v25 = vadd.f32 %v5481_v31, %v5356_v17  ;;  %v5976_v24 = vpop.f32.mrb[35].mxu1 }
0x15b8   :  { %5360 = vst [vmem:[%s7662_s5 + $0x20] sm:$0xff] %v5357_v25 }

</bundles_post_ra>
